<compile_context>
chip_gen: v5e
topology: v5e:2x2
jax: 0.10.0
libtpu: 0.0.40
codegen_flags: <defaults>
</compile_context>

<pallas_src>
import math

import jax
import jax.numpy as jnp
from jax.experimental import pallas as pl
from jax.experimental.pallas import tpu as pltpu  # noqa: F401

# ----------------------- synthetic "t5-small-like" config -----------------------
VOCAB = 64
D_MODEL = 32
D_FF = 64
N_HEADS = 4
D_KV = 8
INNER = N_HEADS * D_KV          # 32
N_LAYERS = 2
REL_BUCKETS = 8
REL_MAX_DIST = 16
LN_EPS = 1e-6
MAX_DECODER_LENGTH = 4          # model_args.max_decoder_length
DEC_T = 8                       # decoder length padded to a full sublane group;
                                # with causal masking, position-0 output equals
                                # the T=4 result exactly.
NEG_INF = -1e9


# ------------------------- fused whole-model Pallas kernel -------------------------

def _t5_fused_kernel(
    # activations / masks / biases
    x_ref, y_ref, mask_ref, enc_bias_ref, dec_bias_ref,
    # encoder weights (stacked over layers)
    e_aln_ref, e_qkv_ref, e_ao_ref, e_fln_ref, e_wi_ref, e_wo_ref, e_final_ref,
    # decoder weights (stacked over layers)
    d_sln_ref, d_sqkv_ref, d_so_ref,
    d_cln_ref, d_cq_ref, d_ckv_ref, d_co_ref,
    d_fln_ref, d_wi_ref, d_wo_ref, d_final_ref,
    # output
    out_ref,
):
    """Full T5 encoder-decoder forward for one batch, fully VMEM-resident."""
    B = mask_ref.shape[0]
    S = mask_ref.shape[2]
    T = dec_bias_ref.shape[1]

    mask_bias = mask_ref[...]          # (B, 1, S)  additive (-1e9 on padding)
    enc_bias = enc_bias_ref[...]       # (H, S, S)  encoder rel-pos bias
    dec_bias = dec_bias_ref[...]       # (H, T, T)  decoder rel-pos bias + causal

    def rms(x, w):                     # T5LayerNorm: RMS, no mean subtraction, no bias
        var = jnp.mean(x * x, axis=-1, keepdims=True)
        return x * jax.lax.rsqrt(var + LN_EPS) * w

    def softmax_last(s):
        m = jnp.max(s, axis=-1, keepdims=True)
        p = jnp.exp(s - m)
        denom = jnp.sum(p, axis=-1, keepdims=True)
        return p * pl.reciprocal(denom, approx=True)

    def attend(h_in, q_all, k_all, v_all, o_w, bias_fn, Lq, Lk):
        # q_all: (B*Lq, INNER); k_all/v_all: (B*Lk, INNER); o_w: (INNER, D).
        # Heads are unrolled (H=4); each head is batched over B via 3-D einsums.
        out = h_in
        for hh in range(N_HEADS):
            lo, hi = hh * D_KV, (hh + 1) * D_KV
            q = q_all[:, lo:hi].reshape(B, Lq, D_KV)
            k = k_all[:, lo:hi].reshape(B, Lk, D_KV)
            v = v_all[:, lo:hi].reshape(B, Lk, D_KV)
            # T5 attention: NO 1/sqrt(d) scaling.
            s = jnp.einsum('bqd,bkd->bqk', q, k,
                           preferred_element_type=jnp.float32)
            s = s + bias_fn(hh)
            p = softmax_last(s)
            o_h = jnp.einsum('bqk,bkd->bqd', p, v,
                             preferred_element_type=jnp.float32)
            # head-merge + output projection + residual folded into an accumulate.
            out = out + jnp.dot(o_h.reshape(B * Lq, D_KV), o_w[lo:hi, :],
                                preferred_element_type=jnp.float32)
        return out

    def self_attn(h_in, ln_w, qkv_w, o_w, pos_bias, use_mask, L):
        normed = rms(h_in, ln_w)
        qkv = jnp.dot(normed, qkv_w, preferred_element_type=jnp.float32)  # (B*L, 3I)
        q_all = qkv[:, 0:INNER]
        k_all = qkv[:, INNER:2 * INNER]
        v_all = qkv[:, 2 * INNER:3 * INNER]
        if use_mask:
            bias_fn = lambda hh: pos_bias[hh:hh + 1] + mask_bias   # (B, L, L)
        else:
            bias_fn = lambda hh: pos_bias[hh:hh + 1]               # (1, L, L)
        return attend(h_in, q_all, k_all, v_all, o_w, bias_fn, L, L)

    def cross_attn(h_in, enc_out, ln_w, q_w, kv_w, o_w):
        normed = rms(h_in, ln_w)
        q_all = jnp.dot(normed, q_w, preferred_element_type=jnp.float32)   # (B*T, I)
        kv = jnp.dot(enc_out, kv_w, preferred_element_type=jnp.float32)    # (B*S, 2I)
        k_all = kv[:, 0:INNER]
        v_all = kv[:, INNER:2 * INNER]
        return attend(h_in, q_all, k_all, v_all, o_w,
                      lambda hh: mask_bias, T, S)

    def ffn(h_in, ln_w, wi, wo):
        normed = rms(h_in, ln_w)
        u = jnp.maximum(jnp.dot(normed, wi, preferred_element_type=jnp.float32), 0.0)
        return h_in + jnp.dot(u, wo, preferred_element_type=jnp.float32)

    # ------------------------------- encoder -------------------------------
    x = x_ref[...]                                         # (B*S, D)
    for l in range(N_LAYERS):
        x = self_attn(x, e_aln_ref[l:l + 1, :], e_qkv_ref[l], e_ao_ref[l],
                      enc_bias, True, S)
        x = ffn(x, e_fln_ref[l:l + 1, :], e_wi_ref[l], e_wo_ref[l])
    enc_out = rms(x, e_final_ref[...])                     # (B*S, D)

    # ------------------------------- decoder -------------------------------
    y = y_ref[...]                                         # (B*T, D)
    for l in range(N_LAYERS):
        y = self_attn(y, d_sln_ref[l:l + 1, :], d_sqkv_ref[l], d_so_ref[l],
                      dec_bias, False, T)
        y = cross_attn(y, enc_out, d_cln_ref[l:l + 1, :], d_cq_ref[l],
                       d_ckv_ref[l], d_co_ref[l])
        y = ffn(y, d_fln_ref[l:l + 1, :], d_wi_ref[l], d_wo_ref[l])
    y = rms(y, d_final_ref[...])                           # (B*T, D)

    # decoder last_hidden_state[:, 0, :]
    first_rows = [y[b * T:b * T + 1, :] for b in range(B)]
    out_ref[...] = jnp.concatenate(first_rows, axis=0).astype(out_ref.dtype)


# -------------------------------- JAX glue (host side) --------------------------------

def _relative_position_bucket(relative_position, bidirectional, num_buckets, max_distance):
    # Mirrors HF T5Attention._relative_position_bucket (integer glue, not hot path).
    relative_buckets = jnp.zeros_like(relative_position)
    if bidirectional:
        num_buckets = num_buckets // 2
        relative_buckets = relative_buckets + (relative_position > 0).astype(jnp.int32) * num_buckets
        relative_position = jnp.abs(relative_position)
    else:
        relative_position = -jnp.minimum(relative_position, 0)
    max_exact = num_buckets // 2
    is_small = relative_position < max_exact
    rp = jnp.maximum(relative_position, 1).astype(jnp.float32)
    rel_if_large = max_exact + (jnp.log(rp / max_exact)
                                / math.log(max_distance / max_exact)
                                * (num_buckets - max_exact)).astype(jnp.int32)
    rel_if_large = jnp.minimum(rel_if_large, num_buckets - 1)
    return relative_buckets + jnp.where(is_small, relative_position, rel_if_large)


def compute_position_bias(table, q_len, k_len, bidirectional):
    ctx = jnp.arange(q_len, dtype=jnp.int32)[:, None]
    mem = jnp.arange(k_len, dtype=jnp.int32)[None, :]
    rel = mem - ctx
    buckets = _relative_position_bucket(rel, bidirectional, REL_BUCKETS, REL_MAX_DIST)
    values = table[buckets]                       # (q_len, k_len, H)
    return jnp.transpose(values, (2, 0, 1))       # (H, q_len, k_len)


def init_params(key):
    keys = iter(jax.random.split(key, 64))

    def w(shape, scale=0.05):
        return jax.random.normal(next(keys), shape, jnp.float32) * scale

    def ones(shape):
        return jnp.ones(shape, jnp.float32)

    return {
        'embed': w((VOCAB, D_MODEL), 1.0),
        'enc_rel_bias': w((REL_BUCKETS, N_HEADS), 0.1),
        'dec_rel_bias': w((REL_BUCKETS, N_HEADS), 0.1),
        'enc': {
            'attn_ln':  ones((N_LAYERS, D_MODEL)),
            'qkv':      w((N_LAYERS, D_MODEL, 3 * INNER)),     # fused q|k|v
            'attn_o':   w((N_LAYERS, INNER, D_MODEL)),
            'ff_ln':    ones((N_LAYERS, D_MODEL)),
            'wi':       w((N_LAYERS, D_MODEL, D_FF)),
            'wo':       w((N_LAYERS, D_FF, D_MODEL)),
            'final_ln': ones((1, D_MODEL)),
        },
        'dec': {
            'self_ln':   ones((N_LAYERS, D_MODEL)),
            'self_qkv':  w((N_LAYERS, D_MODEL, 3 * INNER)),
            'self_o':    w((N_LAYERS, INNER, D_MODEL)),
            'cross_ln':  ones((N_LAYERS, D_MODEL)),
            'cross_q':   w((N_LAYERS, D_MODEL, INNER)),
            'cross_kv':  w((N_LAYERS, D_MODEL, 2 * INNER)),    # fused k|v
            'cross_o':   w((N_LAYERS, INNER, D_MODEL)),
            'ff_ln':     ones((N_LAYERS, D_MODEL)),
            'wi':        w((N_LAYERS, D_MODEL, D_FF)),
            'wo':        w((N_LAYERS, D_FF, D_MODEL)),
            'final_ln':  ones((1, D_MODEL)),
        },
    }


def t5_model_encoder_forward(params, input_ids, attention_mask):
    """T5ModelEncoder.encode(): run encoder-decoder with decoder_input_ids = 0
    everywhere (start_token_id == pad_token_id == 0); return last_hidden[:, 0, :]."""
    B, S = input_ids.shape
    T = DEC_T

    embed = params['embed']
    x_emb = embed[input_ids].reshape(B * S, D_MODEL)                 # (B*S, D)
    y_emb = jnp.tile(embed[0:1, :], (B * T, 1))                      # (B*T, D)

    # compact additive padding mask, broadcast in-kernel: (B, 1, S)
    mask_bias = ((1.0 - attention_mask.astype(jnp.float32)) * NEG_INF)[:, None, :]

    enc_bias = compute_position_bias(params['enc_rel_bias'], S, S, True)   # (H,S,S)
    causal = jnp.where(jnp.arange(T)[:, None] >= jnp.arange(T)[None, :],
                       0.0, NEG_INF).astype(jnp.float32)
    dec_bias = compute_position_bias(params['dec_rel_bias'], T, T, False) + causal[None]

    e, d = params['enc'], params['dec']
    return pl.pallas_call(
        _t5_fused_kernel,
        out_shape=jax.ShapeDtypeStruct((B, D_MODEL), jnp.float32),
    )(x_emb, y_emb, mask_bias, enc_bias, dec_bias,
      e['attn_ln'], e['qkv'], e['attn_o'], e['ff_ln'], e['wi'], e['wo'], e['final_ln'],
      d['self_ln'], d['self_qkv'], d['self_o'],
      d['cross_ln'], d['cross_q'], d['cross_kv'], d['cross_o'],
      d['ff_ln'], d['wi'], d['wo'], d['final_ln'])


def kldiv_t5_model_encoder_forward(params, enc_query, enc_nway_docs, labels):
    """KLDivT5ModelEncoder.forward: encode queries + nway docs, dot-product logits,
    KL-divergence distillation loss."""
    q_reps = t5_model_encoder_forward(params, enc_query['input_ids'],
                                      enc_query['attention_mask'])          # (bz, D)
    bz, d_model = q_reps.shape
    d_reps = t5_model_encoder_forward(params, enc_nway_docs['input_ids'],
                                      enc_nway_docs['attention_mask'])      # (bz*nway, D)
    d_reps = d_reps.reshape(bz, -1, d_model)
    logits = jnp.sum(q_reps[:, None, :] * d_reps, axis=-1)                  # (bz, nway)
    # TODO(synk): the repo's KLDivLoss class is not in the spec; using the standard
    # distillation KL(softmax(labels) || softmax(logits)) with batchmean reduction.
    log_p = jax.nn.log_softmax(logits, axis=-1)
    tgt = jax.nn.softmax(labels.astype(jnp.float32), axis=-1)
    loss = jnp.sum(tgt * (jnp.log(tgt + 1e-20) - log_p)) / bz
    return loss


if __name__ == "__main__":
    key = jax.random.PRNGKey(0)
    pkey, kq, kd, km, kl = jax.random.split(key, 5)
    params = init_params(pkey)

    B, S, NWAY = 2, 8, 3

    # query batch
    q_ids = jax.random.randint(kq, (B, S), 2, VOCAB, dtype=jnp.int32)
    q_mask = jnp.array([[1] * S, [1] * (S - 2) + [0, 0]], dtype=jnp.int32)
    q_ids = q_ids * q_mask                          # pad_token_id = 0 where masked

    # nway docs batch (bz * nway rows)
    d_ids = jax.random.randint(kd, (B * NWAY, S), 2, VOCAB, dtype=jnp.int32)
    d_pad = jax.random.randint(km, (B * NWAY,), 0, 2, dtype=jnp.int32)
    d_mask = jnp.ones((B * NWAY, S), jnp.int32).at[:, S - 1].set(d_pad)
    d_ids = d_ids * d_mask

    labels = jax.random.normal(kl, (B, NWAY), jnp.float32)

    # encode() sanity check (== T5ModelEncoder.encode)
    encode = jax.jit(t5_model_encoder_forward)
    q_reps = encode(params, q_ids, q_mask)
    jax.block_until_ready(q_reps)
    assert q_reps.shape == (B, D_MODEL), q_reps.shape
    assert bool(jnp.all(jnp.isfinite(q_reps)))

    # full KLDivT5ModelEncoder.forward
    fwd = jax.jit(kldiv_t5_model_encoder_forward)
    loss = fwd(params,
               {'input_ids': q_ids, 'attention_mask': q_mask},
               {'input_ids': d_ids, 'attention_mask': d_mask},
               labels)
    jax.block_until_ready(loss)
    assert loss.shape == ()
    assert bool(jnp.isfinite(loss))
    print("KERNEL_OK")
</pallas_src>

<mosaic_0001>
module attributes {stable_mosaic.version = 11 : i64} {
  func.func @_t5_fused_kernel(%arg0: memref<16x32xf32, #tpu.memory_space<vmem>>, %arg1: memref<16x32xf32, #tpu.memory_space<vmem>>, %arg2: memref<2x1x8xf32, #tpu.memory_space<vmem>>, %arg3: memref<4x8x8xf32, #tpu.memory_space<vmem>>, %arg4: memref<4x8x8xf32, #tpu.memory_space<vmem>>, %arg5: memref<2x32xf32, #tpu.memory_space<vmem>>, %arg6: memref<2x32x96xf32, #tpu.memory_space<vmem>>, %arg7: memref<2x32x32xf32, #tpu.memory_space<vmem>>, %arg8: memref<2x32xf32, #tpu.memory_space<vmem>>, %arg9: memref<2x32x64xf32, #tpu.memory_space<vmem>>, %arg10: memref<2x64x32xf32, #tpu.memory_space<vmem>>, %arg11: memref<1x32xf32, #tpu.memory_space<vmem>>, %arg12: memref<2x32xf32, #tpu.memory_space<vmem>>, %arg13: memref<2x32x96xf32, #tpu.memory_space<vmem>>, %arg14: memref<2x32x32xf32, #tpu.memory_space<vmem>>, %arg15: memref<2x32xf32, #tpu.memory_space<vmem>>, %arg16: memref<2x32x32xf32, #tpu.memory_space<vmem>>, %arg17: memref<2x32x64xf32, #tpu.memory_space<vmem>>, %arg18: memref<2x32x32xf32, #tpu.memory_space<vmem>>, %arg19: memref<2x32xf32, #tpu.memory_space<vmem>>, %arg20: memref<2x32x64xf32, #tpu.memory_space<vmem>>, %arg21: memref<2x64x32xf32, #tpu.memory_space<vmem>>, %arg22: memref<1x32xf32, #tpu.memory_space<vmem>>, %arg23: memref<2x32xf32, #tpu.memory_space<vmem>>) attributes {dimension_semantics = [], scalar_prefetch = 0 : i64, scratch_operands = 0 : i64, tpu.core_type = #tpu.core_type<tc>} {
    %c0 = arith.constant 0 : index
    %c0_0 = arith.constant 0 : index
    %c0_1 = arith.constant 0 : index
    %0 = vector.load %arg2[%c0, %c0_0, %c0_1] : memref<2x1x8xf32, #tpu.memory_space<vmem>>, vector<2x1x8xf32>
    %c0_2 = arith.constant 0 : index
    %c0_3 = arith.constant 0 : index
    %c0_4 = arith.constant 0 : index
    %1 = vector.load %arg3[%c0_2, %c0_3, %c0_4] : memref<4x8x8xf32, #tpu.memory_space<vmem>>, vector<4x8x8xf32>
    %c0_5 = arith.constant 0 : index
    %c0_6 = arith.constant 0 : index
    %c0_7 = arith.constant 0 : index
    %2 = vector.load %arg4[%c0_5, %c0_6, %c0_7] : memref<4x8x8xf32, #tpu.memory_space<vmem>>, vector<4x8x8xf32>
    %c0_8 = arith.constant 0 : index
    %c0_9 = arith.constant 0 : index
    %3 = vector.load %arg0[%c0_8, %c0_9] : memref<16x32xf32, #tpu.memory_space<vmem>>, vector<16x32xf32>
    %c0_10 = arith.constant 0 : index
    %c0_11 = arith.constant 0 : index
    %4 = vector.load %arg5[%c0_10, %c0_11] : memref<2x32xf32, #tpu.memory_space<vmem>>, vector<1x32xf32>
    %c0_12 = arith.constant 0 : index
    %c0_13 = arith.constant 0 : index
    %c0_14 = arith.constant 0 : index
    %5 = vector.load %arg6[%c0_12, %c0_13, %c0_14] : memref<2x32x96xf32, #tpu.memory_space<vmem>>, vector<1x32x96xf32>
    %6 = vector.shape_cast %5 : vector<1x32x96xf32> to vector<32x96xf32>
    %c0_15 = arith.constant 0 : index
    %c0_16 = arith.constant 0 : index
    %c0_17 = arith.constant 0 : index
    %7 = vector.load %arg7[%c0_15, %c0_16, %c0_17] : memref<2x32x32xf32, #tpu.memory_space<vmem>>, vector<1x32x32xf32>
    %8 = vector.shape_cast %7 : vector<1x32x32xf32> to vector<32x32xf32>
    %9 = arith.mulf %3, %3 : vector<16x32xf32>
    %cst = arith.constant dense<0.000000e+00> : vector<16xf32>
    %10 = vector.multi_reduction <add>, %9, %cst [1] : vector<16x32xf32> to vector<16xf32>
    %11 = vector.shape_cast %10 : vector<16xf32> to vector<16x1xf32>
    %cst_18 = arith.constant 3.200000e+01 : f32
    %12 = vector.broadcast %cst_18 : f32 to vector<16x1xf32>
    %13 = arith.divf %11, %12 : vector<16x1xf32>
    %cst_19 = arith.constant 9.99999997E-7 : f32
    %14 = vector.broadcast %cst_19 : f32 to vector<16x1xf32>
    %15 = arith.addf %13, %14 : vector<16x1xf32>
    %16 = math.rsqrt %15 : vector<16x1xf32>
    %17 = vector.broadcast %16 : vector<16x1xf32> to vector<16x32xf32>
    %18 = arith.mulf %3, %17 : vector<16x32xf32>
    %19 = vector.broadcast %4 : vector<1x32xf32> to vector<16x32xf32>
    %20 = arith.mulf %18, %19 : vector<16x32xf32>
    %cst_20 = arith.constant dense<0.000000e+00> : vector<16x96xf32>
    %21 = tpu.matmul %20, %6, %cst_20 {dimension_numbers = #tpu.dot_dimension_numbers<[1], [0], [0], [1], [0, 0, 1, 1], [], []>} : vector<16x32xf32>, vector<32x96xf32>, vector<16x96xf32> -> vector<16x96xf32>
    %22 = vector.extract_strided_slice %21 {offsets = [0, 0], sizes = [16, 32], strides = [1, 1]} : vector<16x96xf32> to vector<16x32xf32>
    %23 = vector.extract_strided_slice %21 {offsets = [0, 32], sizes = [16, 32], strides = [1, 1]} : vector<16x96xf32> to vector<16x32xf32>
    %24 = vector.extract_strided_slice %21 {offsets = [0, 64], sizes = [16, 32], strides = [1, 1]} : vector<16x96xf32> to vector<16x32xf32>
    %25 = vector.extract_strided_slice %22 {offsets = [0, 0], sizes = [16, 8], strides = [1, 1]} : vector<16x32xf32> to vector<16x8xf32>
    %26 = vector.shape_cast %25 : vector<16x8xf32> to vector<2x8x8xf32>
    %27 = vector.extract_strided_slice %23 {offsets = [0, 0], sizes = [16, 8], strides = [1, 1]} : vector<16x32xf32> to vector<16x8xf32>
    %28 = vector.shape_cast %27 : vector<16x8xf32> to vector<2x8x8xf32>
    %29 = vector.extract_strided_slice %24 {offsets = [0, 0], sizes = [16, 8], strides = [1, 1]} : vector<16x32xf32> to vector<16x8xf32>
    %30 = vector.shape_cast %29 : vector<16x8xf32> to vector<2x8x8xf32>
    "tpu.trace_start"() <{level = 10 : i32, message = "bqd,bkd->bqk"}> : () -> ()
    %cst_21 = arith.constant dense<0.000000e+00> : vector<2x8x8xf32>
    %31 = tpu.matmul %26, %28, %cst_21 {dimension_numbers = #tpu.dot_dimension_numbers<[2], [2], [1], [1], [0, 0, 0, 1, 1, 1], [0], [0]>} : vector<2x8x8xf32>, vector<2x8x8xf32>, vector<2x8x8xf32> -> vector<2x8x8xf32>
    "tpu.trace_stop"() : () -> ()
    %32 = vector.extract_strided_slice %1 {offsets = [0, 0, 0], sizes = [1, 8, 8], strides = [1, 1, 1]} : vector<4x8x8xf32> to vector<1x8x8xf32>
    %33 = vector.broadcast %32 : vector<1x8x8xf32> to vector<2x8x8xf32>
    %34 = vector.broadcast %0 : vector<2x1x8xf32> to vector<2x8x8xf32>
    %35 = arith.addf %33, %34 : vector<2x8x8xf32>
    %36 = arith.addf %31, %35 : vector<2x8x8xf32>
    %cst_22 = arith.constant dense<0xFF800000> : vector<2x8xf32>
    %37 = vector.multi_reduction <maximumf>, %36, %cst_22 [2] : vector<2x8x8xf32> to vector<2x8xf32>
    %38 = vector.shape_cast %37 : vector<2x8xf32> to vector<2x8x1xf32>
    %39 = vector.broadcast %38 : vector<2x8x1xf32> to vector<2x8x8xf32>
    %40 = arith.subf %36, %39 : vector<2x8x8xf32>
    %41 = math.exp %40 : vector<2x8x8xf32>
    %cst_23 = arith.constant dense<0.000000e+00> : vector<2x8xf32>
    %42 = vector.multi_reduction <add>, %41, %cst_23 [2] : vector<2x8x8xf32> to vector<2x8xf32>
    %43 = vector.shape_cast %42 : vector<2x8xf32> to vector<2x8x1xf32>
    %44 = tpu.reciprocal %43 {approx = true} : vector<2x8x1xf32> -> vector<2x8x1xf32>
    %45 = vector.broadcast %44 : vector<2x8x1xf32> to vector<2x8x8xf32>
    %46 = arith.mulf %41, %45 : vector<2x8x8xf32>
    "tpu.trace_start"() <{level = 10 : i32, message = "bqk,bkd->bqd"}> : () -> ()
    %cst_24 = arith.constant dense<0.000000e+00> : vector<2x8x8xf32>
    %47 = tpu.matmul %46, %30, %cst_24 {dimension_numbers = #tpu.dot_dimension_numbers<[2], [1], [1], [2], [0, 0, 0, 1, 1, 2], [0], [0]>} : vector<2x8x8xf32>, vector<2x8x8xf32>, vector<2x8x8xf32> -> vector<2x8x8xf32>
    "tpu.trace_stop"() : () -> ()
    %48 = vector.shape_cast %47 : vector<2x8x8xf32> to vector<16x8xf32>
    %49 = vector.extract_strided_slice %8 {offsets = [0, 0], sizes = [8, 32], strides = [1, 1]} : vector<32x32xf32> to vector<8x32xf32>
    %cst_25 = arith.constant dense<0.000000e+00> : vector<16x32xf32>
    %50 = tpu.matmul %48, %49, %cst_25 {dimension_numbers = #tpu.dot_dimension_numbers<[1], [0], [0], [1], [0, 0, 1, 1], [], []>} : vector<16x8xf32>, vector<8x32xf32>, vector<16x32xf32> -> vector<16x32xf32>
    %51 = arith.addf %3, %50 : vector<16x32xf32>
    %52 = vector.extract_strided_slice %22 {offsets = [0, 8], sizes = [16, 8], strides = [1, 1]} : vector<16x32xf32> to vector<16x8xf32>
    %53 = vector.shape_cast %52 : vector<16x8xf32> to vector<2x8x8xf32>
    %54 = vector.extract_strided_slice %23 {offsets = [0, 8], sizes = [16, 8], strides = [1, 1]} : vector<16x32xf32> to vector<16x8xf32>
    %55 = vector.shape_cast %54 : vector<16x8xf32> to vector<2x8x8xf32>
    %56 = vector.extract_strided_slice %24 {offsets = [0, 8], sizes = [16, 8], strides = [1, 1]} : vector<16x32xf32> to vector<16x8xf32>
    %57 = vector.shape_cast %56 : vector<16x8xf32> to vector<2x8x8xf32>
    "tpu.trace_start"() <{level = 10 : i32, message = "bqd,bkd->bqk"}> : () -> ()
    %cst_26 = arith.constant dense<0.000000e+00> : vector<2x8x8xf32>
    %58 = tpu.matmul %53, %55, %cst_26 {dimension_numbers = #tpu.dot_dimension_numbers<[2], [2], [1], [1], [0, 0, 0, 1, 1, 1], [0], [0]>} : vector<2x8x8xf32>, vector<2x8x8xf32>, vector<2x8x8xf32> -> vector<2x8x8xf32>
    "tpu.trace_stop"() : () -> ()
    %59 = vector.extract_strided_slice %1 {offsets = [1, 0, 0], sizes = [1, 8, 8], strides = [1, 1, 1]} : vector<4x8x8xf32> to vector<1x8x8xf32>
    %60 = vector.broadcast %59 : vector<1x8x8xf32> to vector<2x8x8xf32>
    %61 = vector.broadcast %0 : vector<2x1x8xf32> to vector<2x8x8xf32>
    %62 = arith.addf %60, %61 : vector<2x8x8xf32>
    %63 = arith.addf %58, %62 : vector<2x8x8xf32>
    %cst_27 = arith.constant dense<0xFF800000> : vector<2x8xf32>
    %64 = vector.multi_reduction <maximumf>, %63, %cst_27 [2] : vector<2x8x8xf32> to vector<2x8xf32>
    %65 = vector.shape_cast %64 : vector<2x8xf32> to vector<2x8x1xf32>
    %66 = vector.broadcast %65 : vector<2x8x1xf32> to vector<2x8x8xf32>
    %67 = arith.subf %63, %66 : vector<2x8x8xf32>
    %68 = math.exp %67 : vector<2x8x8xf32>
    %cst_28 = arith.constant dense<0.000000e+00> : vector<2x8xf32>
    %69 = vector.multi_reduction <add>, %68, %cst_28 [2] : vector<2x8x8xf32> to vector<2x8xf32>
    %70 = vector.shape_cast %69 : vector<2x8xf32> to vector<2x8x1xf32>
    %71 = tpu.reciprocal %70 {approx = true} : vector<2x8x1xf32> -> vector<2x8x1xf32>
    %72 = vector.broadcast %71 : vector<2x8x1xf32> to vector<2x8x8xf32>
    %73 = arith.mulf %68, %72 : vector<2x8x8xf32>
    "tpu.trace_start"() <{level = 10 : i32, message = "bqk,bkd->bqd"}> : () -> ()
    %cst_29 = arith.constant dense<0.000000e+00> : vector<2x8x8xf32>
    %74 = tpu.matmul %73, %57, %cst_29 {dimension_numbers = #tpu.dot_dimension_numbers<[2], [1], [1], [2], [0, 0, 0, 1, 1, 2], [0], [0]>} : vector<2x8x8xf32>, vector<2x8x8xf32>, vector<2x8x8xf32> -> vector<2x8x8xf32>
    "tpu.trace_stop"() : () -> ()
    %75 = vector.shape_cast %74 : vector<2x8x8xf32> to vector<16x8xf32>
    %76 = vector.extract_strided_slice %8 {offsets = [8, 0], sizes = [8, 32], strides = [1, 1]} : vector<32x32xf32> to vector<8x32xf32>
    %cst_30 = arith.constant dense<0.000000e+00> : vector<16x32xf32>
    %77 = tpu.matmul %75, %76, %cst_30 {dimension_numbers = #tpu.dot_dimension_numbers<[1], [0], [0], [1], [0, 0, 1, 1], [], []>} : vector<16x8xf32>, vector<8x32xf32>, vector<16x32xf32> -> vector<16x32xf32>
    %78 = arith.addf %51, %77 : vector<16x32xf32>
    %79 = vector.extract_strided_slice %22 {offsets = [0, 16], sizes = [16, 8], strides = [1, 1]} : vector<16x32xf32> to vector<16x8xf32>
    %80 = vector.shape_cast %79 : vector<16x8xf32> to vector<2x8x8xf32>
    %81 = vector.extract_strided_slice %23 {offsets = [0, 16], sizes = [16, 8], strides = [1, 1]} : vector<16x32xf32> to vector<16x8xf32>
    %82 = vector.shape_cast %81 : vector<16x8xf32> to vector<2x8x8xf32>
    %83 = vector.extract_strided_slice %24 {offsets = [0, 16], sizes = [16, 8], strides = [1, 1]} : vector<16x32xf32> to vector<16x8xf32>
    %84 = vector.shape_cast %83 : vector<16x8xf32> to vector<2x8x8xf32>
    "tpu.trace_start"() <{level = 10 : i32, message = "bqd,bkd->bqk"}> : () -> ()
    %cst_31 = arith.constant dense<0.000000e+00> : vector<2x8x8xf32>
    %85 = tpu.matmul %80, %82, %cst_31 {dimension_numbers = #tpu.dot_dimension_numbers<[2], [2], [1], [1], [0, 0, 0, 1, 1, 1], [0], [0]>} : vector<2x8x8xf32>, vector<2x8x8xf32>, vector<2x8x8xf32> -> vector<2x8x8xf32>
    "tpu.trace_stop"() : () -> ()
    %86 = vector.extract_strided_slice %1 {offsets = [2, 0, 0], sizes = [1, 8, 8], strides = [1, 1, 1]} : vector<4x8x8xf32> to vector<1x8x8xf32>
    %87 = vector.broadcast %86 : vector<1x8x8xf32> to vector<2x8x8xf32>
    %88 = vector.broadcast %0 : vector<2x1x8xf32> to vector<2x8x8xf32>
    %89 = arith.addf %87, %88 : vector<2x8x8xf32>
    %90 = arith.addf %85, %89 : vector<2x8x8xf32>
    %cst_32 = arith.constant dense<0xFF800000> : vector<2x8xf32>
    %91 = vector.multi_reduction <maximumf>, %90, %cst_32 [2] : vector<2x8x8xf32> to vector<2x8xf32>
    %92 = vector.shape_cast %91 : vector<2x8xf32> to vector<2x8x1xf32>
    %93 = vector.broadcast %92 : vector<2x8x1xf32> to vector<2x8x8xf32>
    %94 = arith.subf %90, %93 : vector<2x8x8xf32>
    %95 = math.exp %94 : vector<2x8x8xf32>
    %cst_33 = arith.constant dense<0.000000e+00> : vector<2x8xf32>
    %96 = vector.multi_reduction <add>, %95, %cst_33 [2] : vector<2x8x8xf32> to vector<2x8xf32>
    %97 = vector.shape_cast %96 : vector<2x8xf32> to vector<2x8x1xf32>
    %98 = tpu.reciprocal %97 {approx = true} : vector<2x8x1xf32> -> vector<2x8x1xf32>
    %99 = vector.broadcast %98 : vector<2x8x1xf32> to vector<2x8x8xf32>
    %100 = arith.mulf %95, %99 : vector<2x8x8xf32>
    "tpu.trace_start"() <{level = 10 : i32, message = "bqk,bkd->bqd"}> : () -> ()
    %cst_34 = arith.constant dense<0.000000e+00> : vector<2x8x8xf32>
    %101 = tpu.matmul %100, %84, %cst_34 {dimension_numbers = #tpu.dot_dimension_numbers<[2], [1], [1], [2], [0, 0, 0, 1, 1, 2], [0], [0]>} : vector<2x8x8xf32>, vector<2x8x8xf32>, vector<2x8x8xf32> -> vector<2x8x8xf32>
    "tpu.trace_stop"() : () -> ()
    %102 = vector.shape_cast %101 : vector<2x8x8xf32> to vector<16x8xf32>
    %103 = vector.extract_strided_slice %8 {offsets = [16, 0], sizes = [8, 32], strides = [1, 1]} : vector<32x32xf32> to vector<8x32xf32>
    %cst_35 = arith.constant dense<0.000000e+00> : vector<16x32xf32>
    %104 = tpu.matmul %102, %103, %cst_35 {dimension_numbers = #tpu.dot_dimension_numbers<[1], [0], [0], [1], [0, 0, 1, 1], [], []>} : vector<16x8xf32>, vector<8x32xf32>, vector<16x32xf32> -> vector<16x32xf32>
    %105 = arith.addf %78, %104 : vector<16x32xf32>
    %106 = vector.extract_strided_slice %22 {offsets = [0, 24], sizes = [16, 8], strides = [1, 1]} : vector<16x32xf32> to vector<16x8xf32>
    %107 = vector.shape_cast %106 : vector<16x8xf32> to vector<2x8x8xf32>
    %108 = vector.extract_strided_slice %23 {offsets = [0, 24], sizes = [16, 8], strides = [1, 1]} : vector<16x32xf32> to vector<16x8xf32>
    %109 = vector.shape_cast %108 : vector<16x8xf32> to vector<2x8x8xf32>
    %110 = vector.extract_strided_slice %24 {offsets = [0, 24], sizes = [16, 8], strides = [1, 1]} : vector<16x32xf32> to vector<16x8xf32>
    %111 = vector.shape_cast %110 : vector<16x8xf32> to vector<2x8x8xf32>
    "tpu.trace_start"() <{level = 10 : i32, message = "bqd,bkd->bqk"}> : () -> ()
    %cst_36 = arith.constant dense<0.000000e+00> : vector<2x8x8xf32>
    %112 = tpu.matmul %107, %109, %cst_36 {dimension_numbers = #tpu.dot_dimension_numbers<[2], [2], [1], [1], [0, 0, 0, 1, 1, 1], [0], [0]>} : vector<2x8x8xf32>, vector<2x8x8xf32>, vector<2x8x8xf32> -> vector<2x8x8xf32>
    "tpu.trace_stop"() : () -> ()
    %113 = vector.extract_strided_slice %1 {offsets = [3, 0, 0], sizes = [1, 8, 8], strides = [1, 1, 1]} : vector<4x8x8xf32> to vector<1x8x8xf32>
    %114 = vector.broadcast %113 : vector<1x8x8xf32> to vector<2x8x8xf32>
    %115 = vector.broadcast %0 : vector<2x1x8xf32> to vector<2x8x8xf32>
    %116 = arith.addf %114, %115 : vector<2x8x8xf32>
    %117 = arith.addf %112, %116 : vector<2x8x8xf32>
    %cst_37 = arith.constant dense<0xFF800000> : vector<2x8xf32>
    %118 = vector.multi_reduction <maximumf>, %117, %cst_37 [2] : vector<2x8x8xf32> to vector<2x8xf32>
    %119 = vector.shape_cast %118 : vector<2x8xf32> to vector<2x8x1xf32>
    %120 = vector.broadcast %119 : vector<2x8x1xf32> to vector<2x8x8xf32>
    %121 = arith.subf %117, %120 : vector<2x8x8xf32>
    %122 = math.exp %121 : vector<2x8x8xf32>
    %cst_38 = arith.constant dense<0.000000e+00> : vector<2x8xf32>
    %123 = vector.multi_reduction <add>, %122, %cst_38 [2] : vector<2x8x8xf32> to vector<2x8xf32>
    %124 = vector.shape_cast %123 : vector<2x8xf32> to vector<2x8x1xf32>
    %125 = tpu.reciprocal %124 {approx = true} : vector<2x8x1xf32> -> vector<2x8x1xf32>
    %126 = vector.broadcast %125 : vector<2x8x1xf32> to vector<2x8x8xf32>
    %127 = arith.mulf %122, %126 : vector<2x8x8xf32>
    "tpu.trace_start"() <{level = 10 : i32, message = "bqk,bkd->bqd"}> : () -> ()
    %cst_39 = arith.constant dense<0.000000e+00> : vector<2x8x8xf32>
    %128 = tpu.matmul %127, %111, %cst_39 {dimension_numbers = #tpu.dot_dimension_numbers<[2], [1], [1], [2], [0, 0, 0, 1, 1, 2], [0], [0]>} : vector<2x8x8xf32>, vector<2x8x8xf32>, vector<2x8x8xf32> -> vector<2x8x8xf32>
    "tpu.trace_stop"() : () -> ()
    %129 = vector.shape_cast %128 : vector<2x8x8xf32> to vector<16x8xf32>
    %130 = vector.extract_strided_slice %8 {offsets = [24, 0], sizes = [8, 32], strides = [1, 1]} : vector<32x32xf32> to vector<8x32xf32>
    %cst_40 = arith.constant dense<0.000000e+00> : vector<16x32xf32>
    %131 = tpu.matmul %129, %130, %cst_40 {dimension_numbers = #tpu.dot_dimension_numbers<[1], [0], [0], [1], [0, 0, 1, 1], [], []>} : vector<16x8xf32>, vector<8x32xf32>, vector<16x32xf32> -> vector<16x32xf32>
    %132 = arith.addf %105, %131 : vector<16x32xf32>
    %c0_41 = arith.constant 0 : index
    %c0_42 = arith.constant 0 : index
    %133 = vector.load %arg8[%c0_41, %c0_42] : memref<2x32xf32, #tpu.memory_space<vmem>>, vector<1x32xf32>
    %c0_43 = arith.constant 0 : index
    %c0_44 = arith.constant 0 : index
    %c0_45 = arith.constant 0 : index
    %134 = vector.load %arg9[%c0_43, %c0_44, %c0_45] : memref<2x32x64xf32, #tpu.memory_space<vmem>>, vector<1x32x64xf32>
    %135 = vector.shape_cast %134 : vector<1x32x64xf32> to vector<32x64xf32>
    %c0_46 = arith.constant 0 : index
    %c0_47 = arith.constant 0 : index
    %c0_48 = arith.constant 0 : index
    %136 = vector.load %arg10[%c0_46, %c0_47, %c0_48] : memref<2x64x32xf32, #tpu.memory_space<vmem>>, vector<1x64x32xf32>
    %137 = vector.shape_cast %136 : vector<1x64x32xf32> to vector<64x32xf32>
    %138 = arith.mulf %132, %132 : vector<16x32xf32>
    %cst_49 = arith.constant dense<0.000000e+00> : vector<16xf32>
    %139 = vector.multi_reduction <add>, %138, %cst_49 [1] : vector<16x32xf32> to vector<16xf32>
    %140 = vector.shape_cast %139 : vector<16xf32> to vector<16x1xf32>
    %cst_50 = arith.constant 3.200000e+01 : f32
    %141 = vector.broadcast %cst_50 : f32 to vector<16x1xf32>
    %142 = arith.divf %140, %141 : vector<16x1xf32>
    %cst_51 = arith.constant 9.99999997E-7 : f32
    %143 = vector.broadcast %cst_51 : f32 to vector<16x1xf32>
    %144 = arith.addf %142, %143 : vector<16x1xf32>
    %145 = math.rsqrt %144 : vector<16x1xf32>
    %146 = vector.broadcast %145 : vector<16x1xf32> to vector<16x32xf32>
    %147 = arith.mulf %132, %146 : vector<16x32xf32>
    %148 = vector.broadcast %133 : vector<1x32xf32> to vector<16x32xf32>
    %149 = arith.mulf %147, %148 : vector<16x32xf32>
    %cst_52 = arith.constant dense<0.000000e+00> : vector<16x64xf32>
    %150 = tpu.matmul %149, %135, %cst_52 {dimension_numbers = #tpu.dot_dimension_numbers<[1], [0], [0], [1], [0, 0, 1, 1], [], []>} : vector<16x32xf32>, vector<32x64xf32>, vector<16x64xf32> -> vector<16x64xf32>
    %cst_53 = arith.constant 0.000000e+00 : f32
    %151 = vector.broadcast %cst_53 : f32 to vector<16x64xf32>
    %152 = arith.maximumf %150, %151 : vector<16x64xf32>
    %cst_54 = arith.constant dense<0.000000e+00> : vector<16x32xf32>
    %153 = tpu.matmul %152, %137, %cst_54 {dimension_numbers = #tpu.dot_dimension_numbers<[1], [0], [0], [1], [0, 0, 1, 1], [], []>} : vector<16x64xf32>, vector<64x32xf32>, vector<16x32xf32> -> vector<16x32xf32>
    %154 = arith.addf %132, %153 : vector<16x32xf32>
    %c1 = arith.constant 1 : index
    %c0_55 = arith.constant 0 : index
    %155 = vector.load %arg5[%c1, %c0_55] : memref<2x32xf32, #tpu.memory_space<vmem>>, vector<1x32xf32>
    %c1_56 = arith.constant 1 : index
    %c0_57 = arith.constant 0 : index
    %c0_58 = arith.constant 0 : index
    %156 = vector.load %arg6[%c1_56, %c0_57, %c0_58] : memref<2x32x96xf32, #tpu.memory_space<vmem>>, vector<1x32x96xf32>
    %157 = vector.shape_cast %156 : vector<1x32x96xf32> to vector<32x96xf32>
    %c1_59 = arith.constant 1 : index
    %c0_60 = arith.constant 0 : index
    %c0_61 = arith.constant 0 : index
    %158 = vector.load %arg7[%c1_59, %c0_60, %c0_61] : memref<2x32x32xf32, #tpu.memory_space<vmem>>, vector<1x32x32xf32>
    %159 = vector.shape_cast %158 : vector<1x32x32xf32> to vector<32x32xf32>
    %160 = arith.mulf %154, %154 : vector<16x32xf32>
    %cst_62 = arith.constant dense<0.000000e+00> : vector<16xf32>
    %161 = vector.multi_reduction <add>, %160, %cst_62 [1] : vector<16x32xf32> to vector<16xf32>
    %162 = vector.shape_cast %161 : vector<16xf32> to vector<16x1xf32>
    %cst_63 = arith.constant 3.200000e+01 : f32
    %163 = vector.broadcast %cst_63 : f32 to vector<16x1xf32>
    %164 = arith.divf %162, %163 : vector<16x1xf32>
    %cst_64 = arith.constant 9.99999997E-7 : f32
    %165 = vector.broadcast %cst_64 : f32 to vector<16x1xf32>
    %166 = arith.addf %164, %165 : vector<16x1xf32>
    %167 = math.rsqrt %166 : vector<16x1xf32>
    %168 = vector.broadcast %167 : vector<16x1xf32> to vector<16x32xf32>
    %169 = arith.mulf %154, %168 : vector<16x32xf32>
    %170 = vector.broadcast %155 : vector<1x32xf32> to vector<16x32xf32>
    %171 = arith.mulf %169, %170 : vector<16x32xf32>
    %cst_65 = arith.constant dense<0.000000e+00> : vector<16x96xf32>
    %172 = tpu.matmul %171, %157, %cst_65 {dimension_numbers = #tpu.dot_dimension_numbers<[1], [0], [0], [1], [0, 0, 1, 1], [], []>} : vector<16x32xf32>, vector<32x96xf32>, vector<16x96xf32> -> vector<16x96xf32>
    %173 = vector.extract_strided_slice %172 {offsets = [0, 0], sizes = [16, 32], strides = [1, 1]} : vector<16x96xf32> to vector<16x32xf32>
    %174 = vector.extract_strided_slice %172 {offsets = [0, 32], sizes = [16, 32], strides = [1, 1]} : vector<16x96xf32> to vector<16x32xf32>
    %175 = vector.extract_strided_slice %172 {offsets = [0, 64], sizes = [16, 32], strides = [1, 1]} : vector<16x96xf32> to vector<16x32xf32>
    %176 = vector.extract_strided_slice %173 {offsets = [0, 0], sizes = [16, 8], strides = [1, 1]} : vector<16x32xf32> to vector<16x8xf32>
    %177 = vector.shape_cast %176 : vector<16x8xf32> to vector<2x8x8xf32>
    %178 = vector.extract_strided_slice %174 {offsets = [0, 0], sizes = [16, 8], strides = [1, 1]} : vector<16x32xf32> to vector<16x8xf32>
    %179 = vector.shape_cast %178 : vector<16x8xf32> to vector<2x8x8xf32>
    %180 = vector.extract_strided_slice %175 {offsets = [0, 0], sizes = [16, 8], strides = [1, 1]} : vector<16x32xf32> to vector<16x8xf32>
    %181 = vector.shape_cast %180 : vector<16x8xf32> to vector<2x8x8xf32>
    "tpu.trace_start"() <{level = 10 : i32, message = "bqd,bkd->bqk"}> : () -> ()
    %cst_66 = arith.constant dense<0.000000e+00> : vector<2x8x8xf32>
    %182 = tpu.matmul %177, %179, %cst_66 {dimension_numbers = #tpu.dot_dimension_numbers<[2], [2], [1], [1], [0, 0, 0, 1, 1, 1], [0], [0]>} : vector<2x8x8xf32>, vector<2x8x8xf32>, vector<2x8x8xf32> -> vector<2x8x8xf32>
    "tpu.trace_stop"() : () -> ()
    %183 = vector.extract_strided_slice %1 {offsets = [0, 0, 0], sizes = [1, 8, 8], strides = [1, 1, 1]} : vector<4x8x8xf32> to vector<1x8x8xf32>
    %184 = vector.broadcast %183 : vector<1x8x8xf32> to vector<2x8x8xf32>
    %185 = vector.broadcast %0 : vector<2x1x8xf32> to vector<2x8x8xf32>
    %186 = arith.addf %184, %185 : vector<2x8x8xf32>
    %187 = arith.addf %182, %186 : vector<2x8x8xf32>
    %cst_67 = arith.constant dense<0xFF800000> : vector<2x8xf32>
    %188 = vector.multi_reduction <maximumf>, %187, %cst_67 [2] : vector<2x8x8xf32> to vector<2x8xf32>
    %189 = vector.shape_cast %188 : vector<2x8xf32> to vector<2x8x1xf32>
    %190 = vector.broadcast %189 : vector<2x8x1xf32> to vector<2x8x8xf32>
    %191 = arith.subf %187, %190 : vector<2x8x8xf32>
    %192 = math.exp %191 : vector<2x8x8xf32>
    %cst_68 = arith.constant dense<0.000000e+00> : vector<2x8xf32>
    %193 = vector.multi_reduction <add>, %192, %cst_68 [2] : vector<2x8x8xf32> to vector<2x8xf32>
    %194 = vector.shape_cast %193 : vector<2x8xf32> to vector<2x8x1xf32>
    %195 = tpu.reciprocal %194 {approx = true} : vector<2x8x1xf32> -> vector<2x8x1xf32>
    %196 = vector.broadcast %195 : vector<2x8x1xf32> to vector<2x8x8xf32>
    %197 = arith.mulf %192, %196 : vector<2x8x8xf32>
    "tpu.trace_start"() <{level = 10 : i32, message = "bqk,bkd->bqd"}> : () -> ()
    %cst_69 = arith.constant dense<0.000000e+00> : vector<2x8x8xf32>
    %198 = tpu.matmul %197, %181, %cst_69 {dimension_numbers = #tpu.dot_dimension_numbers<[2], [1], [1], [2], [0, 0, 0, 1, 1, 2], [0], [0]>} : vector<2x8x8xf32>, vector<2x8x8xf32>, vector<2x8x8xf32> -> vector<2x8x8xf32>
    "tpu.trace_stop"() : () -> ()
    %199 = vector.shape_cast %198 : vector<2x8x8xf32> to vector<16x8xf32>
    %200 = vector.extract_strided_slice %159 {offsets = [0, 0], sizes = [8, 32], strides = [1, 1]} : vector<32x32xf32> to vector<8x32xf32>
    %cst_70 = arith.constant dense<0.000000e+00> : vector<16x32xf32>
    %201 = tpu.matmul %199, %200, %cst_70 {dimension_numbers = #tpu.dot_dimension_numbers<[1], [0], [0], [1], [0, 0, 1, 1], [], []>} : vector<16x8xf32>, vector<8x32xf32>, vector<16x32xf32> -> vector<16x32xf32>
    %202 = arith.addf %154, %201 : vector<16x32xf32>
    %203 = vector.extract_strided_slice %173 {offsets = [0, 8], sizes = [16, 8], strides = [1, 1]} : vector<16x32xf32> to vector<16x8xf32>
    %204 = vector.shape_cast %203 : vector<16x8xf32> to vector<2x8x8xf32>
    %205 = vector.extract_strided_slice %174 {offsets = [0, 8], sizes = [16, 8], strides = [1, 1]} : vector<16x32xf32> to vector<16x8xf32>
    %206 = vector.shape_cast %205 : vector<16x8xf32> to vector<2x8x8xf32>
    %207 = vector.extract_strided_slice %175 {offsets = [0, 8], sizes = [16, 8], strides = [1, 1]} : vector<16x32xf32> to vector<16x8xf32>
    %208 = vector.shape_cast %207 : vector<16x8xf32> to vector<2x8x8xf32>
    "tpu.trace_start"() <{level = 10 : i32, message = "bqd,bkd->bqk"}> : () -> ()
    %cst_71 = arith.constant dense<0.000000e+00> : vector<2x8x8xf32>
    %209 = tpu.matmul %204, %206, %cst_71 {dimension_numbers = #tpu.dot_dimension_numbers<[2], [2], [1], [1], [0, 0, 0, 1, 1, 1], [0], [0]>} : vector<2x8x8xf32>, vector<2x8x8xf32>, vector<2x8x8xf32> -> vector<2x8x8xf32>
    "tpu.trace_stop"() : () -> ()
    %210 = vector.extract_strided_slice %1 {offsets = [1, 0, 0], sizes = [1, 8, 8], strides = [1, 1, 1]} : vector<4x8x8xf32> to vector<1x8x8xf32>
    %211 = vector.broadcast %210 : vector<1x8x8xf32> to vector<2x8x8xf32>
    %212 = vector.broadcast %0 : vector<2x1x8xf32> to vector<2x8x8xf32>
    %213 = arith.addf %211, %212 : vector<2x8x8xf32>
    %214 = arith.addf %209, %213 : vector<2x8x8xf32>
    %cst_72 = arith.constant dense<0xFF800000> : vector<2x8xf32>
    %215 = vector.multi_reduction <maximumf>, %214, %cst_72 [2] : vector<2x8x8xf32> to vector<2x8xf32>
    %216 = vector.shape_cast %215 : vector<2x8xf32> to vector<2x8x1xf32>
    %217 = vector.broadcast %216 : vector<2x8x1xf32> to vector<2x8x8xf32>
    %218 = arith.subf %214, %217 : vector<2x8x8xf32>
    %219 = math.exp %218 : vector<2x8x8xf32>
    %cst_73 = arith.constant dense<0.000000e+00> : vector<2x8xf32>
    %220 = vector.multi_reduction <add>, %219, %cst_73 [2] : vector<2x8x8xf32> to vector<2x8xf32>
    %221 = vector.shape_cast %220 : vector<2x8xf32> to vector<2x8x1xf32>
    %222 = tpu.reciprocal %221 {approx = true} : vector<2x8x1xf32> -> vector<2x8x1xf32>
    %223 = vector.broadcast %222 : vector<2x8x1xf32> to vector<2x8x8xf32>
    %224 = arith.mulf %219, %223 : vector<2x8x8xf32>
    "tpu.trace_start"() <{level = 10 : i32, message = "bqk,bkd->bqd"}> : () -> ()
    %cst_74 = arith.constant dense<0.000000e+00> : vector<2x8x8xf32>
    %225 = tpu.matmul %224, %208, %cst_74 {dimension_numbers = #tpu.dot_dimension_numbers<[2], [1], [1], [2], [0, 0, 0, 1, 1, 2], [0], [0]>} : vector<2x8x8xf32>, vector<2x8x8xf32>, vector<2x8x8xf32> -> vector<2x8x8xf32>
    "tpu.trace_stop"() : () -> ()
    %226 = vector.shape_cast %225 : vector<2x8x8xf32> to vector<16x8xf32>
    %227 = vector.extract_strided_slice %159 {offsets = [8, 0], sizes = [8, 32], strides = [1, 1]} : vector<32x32xf32> to vector<8x32xf32>
    %cst_75 = arith.constant dense<0.000000e+00> : vector<16x32xf32>
    %228 = tpu.matmul %226, %227, %cst_75 {dimension_numbers = #tpu.dot_dimension_numbers<[1], [0], [0], [1], [0, 0, 1, 1], [], []>} : vector<16x8xf32>, vector<8x32xf32>, vector<16x32xf32> -> vector<16x32xf32>
    %229 = arith.addf %202, %228 : vector<16x32xf32>
    %230 = vector.extract_strided_slice %173 {offsets = [0, 16], sizes = [16, 8], strides = [1, 1]} : vector<16x32xf32> to vector<16x8xf32>
    %231 = vector.shape_cast %230 : vector<16x8xf32> to vector<2x8x8xf32>
    %232 = vector.extract_strided_slice %174 {offsets = [0, 16], sizes = [16, 8], strides = [1, 1]} : vector<16x32xf32> to vector<16x8xf32>
    %233 = vector.shape_cast %232 : vector<16x8xf32> to vector<2x8x8xf32>
    %234 = vector.extract_strided_slice %175 {offsets = [0, 16], sizes = [16, 8], strides = [1, 1]} : vector<16x32xf32> to vector<16x8xf32>
    %235 = vector.shape_cast %234 : vector<16x8xf32> to vector<2x8x8xf32>
    "tpu.trace_start"() <{level = 10 : i32, message = "bqd,bkd->bqk"}> : () -> ()
    %cst_76 = arith.constant dense<0.000000e+00> : vector<2x8x8xf32>
    %236 = tpu.matmul %231, %233, %cst_76 {dimension_numbers = #tpu.dot_dimension_numbers<[2], [2], [1], [1], [0, 0, 0, 1, 1, 1], [0], [0]>} : vector<2x8x8xf32>, vector<2x8x8xf32>, vector<2x8x8xf32> -> vector<2x8x8xf32>
    "tpu.trace_stop"() : () -> ()
    %237 = vector.extract_strided_slice %1 {offsets = [2, 0, 0], sizes = [1, 8, 8], strides = [1, 1, 1]} : vector<4x8x8xf32> to vector<1x8x8xf32>
    %238 = vector.broadcast %237 : vector<1x8x8xf32> to vector<2x8x8xf32>
    %239 = vector.broadcast %0 : vector<2x1x8xf32> to vector<2x8x8xf32>
    %240 = arith.addf %238, %239 : vector<2x8x8xf32>
    %241 = arith.addf %236, %240 : vector<2x8x8xf32>
    %cst_77 = arith.constant dense<0xFF800000> : vector<2x8xf32>
    %242 = vector.multi_reduction <maximumf>, %241, %cst_77 [2] : vector<2x8x8xf32> to vector<2x8xf32>
    %243 = vector.shape_cast %242 : vector<2x8xf32> to vector<2x8x1xf32>
    %244 = vector.broadcast %243 : vector<2x8x1xf32> to vector<2x8x8xf32>
    %245 = arith.subf %241, %244 : vector<2x8x8xf32>
    %246 = math.exp %245 : vector<2x8x8xf32>
    %cst_78 = arith.constant dense<0.000000e+00> : vector<2x8xf32>
    %247 = vector.multi_reduction <add>, %246, %cst_78 [2] : vector<2x8x8xf32> to vector<2x8xf32>
    %248 = vector.shape_cast %247 : vector<2x8xf32> to vector<2x8x1xf32>
    %249 = tpu.reciprocal %248 {approx = true} : vector<2x8x1xf32> -> vector<2x8x1xf32>
    %250 = vector.broadcast %249 : vector<2x8x1xf32> to vector<2x8x8xf32>
    %251 = arith.mulf %246, %250 : vector<2x8x8xf32>
    "tpu.trace_start"() <{level = 10 : i32, message = "bqk,bkd->bqd"}> : () -> ()
    %cst_79 = arith.constant dense<0.000000e+00> : vector<2x8x8xf32>
    %252 = tpu.matmul %251, %235, %cst_79 {dimension_numbers = #tpu.dot_dimension_numbers<[2], [1], [1], [2], [0, 0, 0, 1, 1, 2], [0], [0]>} : vector<2x8x8xf32>, vector<2x8x8xf32>, vector<2x8x8xf32> -> vector<2x8x8xf32>
    "tpu.trace_stop"() : () -> ()
    %253 = vector.shape_cast %252 : vector<2x8x8xf32> to vector<16x8xf32>
    %254 = vector.extract_strided_slice %159 {offsets = [16, 0], sizes = [8, 32], strides = [1, 1]} : vector<32x32xf32> to vector<8x32xf32>
    %cst_80 = arith.constant dense<0.000000e+00> : vector<16x32xf32>
    %255 = tpu.matmul %253, %254, %cst_80 {dimension_numbers = #tpu.dot_dimension_numbers<[1], [0], [0], [1], [0, 0, 1, 1], [], []>} : vector<16x8xf32>, vector<8x32xf32>, vector<16x32xf32> -> vector<16x32xf32>
    %256 = arith.addf %229, %255 : vector<16x32xf32>
    %257 = vector.extract_strided_slice %173 {offsets = [0, 24], sizes = [16, 8], strides = [1, 1]} : vector<16x32xf32> to vector<16x8xf32>
    %258 = vector.shape_cast %257 : vector<16x8xf32> to vector<2x8x8xf32>
    %259 = vector.extract_strided_slice %174 {offsets = [0, 24], sizes = [16, 8], strides = [1, 1]} : vector<16x32xf32> to vector<16x8xf32>
    %260 = vector.shape_cast %259 : vector<16x8xf32> to vector<2x8x8xf32>
    %261 = vector.extract_strided_slice %175 {offsets = [0, 24], sizes = [16, 8], strides = [1, 1]} : vector<16x32xf32> to vector<16x8xf32>
    %262 = vector.shape_cast %261 : vector<16x8xf32> to vector<2x8x8xf32>
    "tpu.trace_start"() <{level = 10 : i32, message = "bqd,bkd->bqk"}> : () -> ()
    %cst_81 = arith.constant dense<0.000000e+00> : vector<2x8x8xf32>
    %263 = tpu.matmul %258, %260, %cst_81 {dimension_numbers = #tpu.dot_dimension_numbers<[2], [2], [1], [1], [0, 0, 0, 1, 1, 1], [0], [0]>} : vector<2x8x8xf32>, vector<2x8x8xf32>, vector<2x8x8xf32> -> vector<2x8x8xf32>
    "tpu.trace_stop"() : () -> ()
    %264 = vector.extract_strided_slice %1 {offsets = [3, 0, 0], sizes = [1, 8, 8], strides = [1, 1, 1]} : vector<4x8x8xf32> to vector<1x8x8xf32>
    %265 = vector.broadcast %264 : vector<1x8x8xf32> to vector<2x8x8xf32>
    %266 = vector.broadcast %0 : vector<2x1x8xf32> to vector<2x8x8xf32>
    %267 = arith.addf %265, %266 : vector<2x8x8xf32>
    %268 = arith.addf %263, %267 : vector<2x8x8xf32>
    %cst_82 = arith.constant dense<0xFF800000> : vector<2x8xf32>
    %269 = vector.multi_reduction <maximumf>, %268, %cst_82 [2] : vector<2x8x8xf32> to vector<2x8xf32>
    %270 = vector.shape_cast %269 : vector<2x8xf32> to vector<2x8x1xf32>
    %271 = vector.broadcast %270 : vector<2x8x1xf32> to vector<2x8x8xf32>
    %272 = arith.subf %268, %271 : vector<2x8x8xf32>
    %273 = math.exp %272 : vector<2x8x8xf32>
    %cst_83 = arith.constant dense<0.000000e+00> : vector<2x8xf32>
    %274 = vector.multi_reduction <add>, %273, %cst_83 [2] : vector<2x8x8xf32> to vector<2x8xf32>
    %275 = vector.shape_cast %274 : vector<2x8xf32> to vector<2x8x1xf32>
    %276 = tpu.reciprocal %275 {approx = true} : vector<2x8x1xf32> -> vector<2x8x1xf32>
    %277 = vector.broadcast %276 : vector<2x8x1xf32> to vector<2x8x8xf32>
    %278 = arith.mulf %273, %277 : vector<2x8x8xf32>
    "tpu.trace_start"() <{level = 10 : i32, message = "bqk,bkd->bqd"}> : () -> ()
    %cst_84 = arith.constant dense<0.000000e+00> : vector<2x8x8xf32>
    %279 = tpu.matmul %278, %262, %cst_84 {dimension_numbers = #tpu.dot_dimension_numbers<[2], [1], [1], [2], [0, 0, 0, 1, 1, 2], [0], [0]>} : vector<2x8x8xf32>, vector<2x8x8xf32>, vector<2x8x8xf32> -> vector<2x8x8xf32>
    "tpu.trace_stop"() : () -> ()
    %280 = vector.shape_cast %279 : vector<2x8x8xf32> to vector<16x8xf32>
    %281 = vector.extract_strided_slice %159 {offsets = [24, 0], sizes = [8, 32], strides = [1, 1]} : vector<32x32xf32> to vector<8x32xf32>
    %cst_85 = arith.constant dense<0.000000e+00> : vector<16x32xf32>
    %282 = tpu.matmul %280, %281, %cst_85 {dimension_numbers = #tpu.dot_dimension_numbers<[1], [0], [0], [1], [0, 0, 1, 1], [], []>} : vector<16x8xf32>, vector<8x32xf32>, vector<16x32xf32> -> vector<16x32xf32>
    %283 = arith.addf %256, %282 : vector<16x32xf32>
    %c1_86 = arith.constant 1 : index
    %c0_87 = arith.constant 0 : index
    %284 = vector.load %arg8[%c1_86, %c0_87] : memref<2x32xf32, #tpu.memory_space<vmem>>, vector<1x32xf32>
    %c1_88 = arith.constant 1 : index
    %c0_89 = arith.constant 0 : index
    %c0_90 = arith.constant 0 : index
    %285 = vector.load %arg9[%c1_88, %c0_89, %c0_90] : memref<2x32x64xf32, #tpu.memory_space<vmem>>, vector<1x32x64xf32>
    %286 = vector.shape_cast %285 : vector<1x32x64xf32> to vector<32x64xf32>
    %c1_91 = arith.constant 1 : index
    %c0_92 = arith.constant 0 : index
    %c0_93 = arith.constant 0 : index
    %287 = vector.load %arg10[%c1_91, %c0_92, %c0_93] : memref<2x64x32xf32, #tpu.memory_space<vmem>>, vector<1x64x32xf32>
    %288 = vector.shape_cast %287 : vector<1x64x32xf32> to vector<64x32xf32>
    %289 = arith.mulf %283, %283 : vector<16x32xf32>
    %cst_94 = arith.constant dense<0.000000e+00> : vector<16xf32>
    %290 = vector.multi_reduction <add>, %289, %cst_94 [1] : vector<16x32xf32> to vector<16xf32>
    %291 = vector.shape_cast %290 : vector<16xf32> to vector<16x1xf32>
    %cst_95 = arith.constant 3.200000e+01 : f32
    %292 = vector.broadcast %cst_95 : f32 to vector<16x1xf32>
    %293 = arith.divf %291, %292 : vector<16x1xf32>
    %cst_96 = arith.constant 9.99999997E-7 : f32
    %294 = vector.broadcast %cst_96 : f32 to vector<16x1xf32>
    %295 = arith.addf %293, %294 : vector<16x1xf32>
    %296 = math.rsqrt %295 : vector<16x1xf32>
    %297 = vector.broadcast %296 : vector<16x1xf32> to vector<16x32xf32>
    %298 = arith.mulf %283, %297 : vector<16x32xf32>
    %299 = vector.broadcast %284 : vector<1x32xf32> to vector<16x32xf32>
    %300 = arith.mulf %298, %299 : vector<16x32xf32>
    %cst_97 = arith.constant dense<0.000000e+00> : vector<16x64xf32>
    %301 = tpu.matmul %300, %286, %cst_97 {dimension_numbers = #tpu.dot_dimension_numbers<[1], [0], [0], [1], [0, 0, 1, 1], [], []>} : vector<16x32xf32>, vector<32x64xf32>, vector<16x64xf32> -> vector<16x64xf32>
    %cst_98 = arith.constant 0.000000e+00 : f32
    %302 = vector.broadcast %cst_98 : f32 to vector<16x64xf32>
    %303 = arith.maximumf %301, %302 : vector<16x64xf32>
    %cst_99 = arith.constant dense<0.000000e+00> : vector<16x32xf32>
    %304 = tpu.matmul %303, %288, %cst_99 {dimension_numbers = #tpu.dot_dimension_numbers<[1], [0], [0], [1], [0, 0, 1, 1], [], []>} : vector<16x64xf32>, vector<64x32xf32>, vector<16x32xf32> -> vector<16x32xf32>
    %305 = arith.addf %283, %304 : vector<16x32xf32>
    %c0_100 = arith.constant 0 : index
    %c0_101 = arith.constant 0 : index
    %306 = vector.load %arg11[%c0_100, %c0_101] : memref<1x32xf32, #tpu.memory_space<vmem>>, vector<1x32xf32>
    %307 = arith.mulf %305, %305 : vector<16x32xf32>
    %cst_102 = arith.constant dense<0.000000e+00> : vector<16xf32>
    %308 = vector.multi_reduction <add>, %307, %cst_102 [1] : vector<16x32xf32> to vector<16xf32>
    %309 = vector.shape_cast %308 : vector<16xf32> to vector<16x1xf32>
    %cst_103 = arith.constant 3.200000e+01 : f32
    %310 = vector.broadcast %cst_103 : f32 to vector<16x1xf32>
    %311 = arith.divf %309, %310 : vector<16x1xf32>
    %cst_104 = arith.constant 9.99999997E-7 : f32
    %312 = vector.broadcast %cst_104 : f32 to vector<16x1xf32>
    %313 = arith.addf %311, %312 : vector<16x1xf32>
    %314 = math.rsqrt %313 : vector<16x1xf32>
    %315 = vector.broadcast %314 : vector<16x1xf32> to vector<16x32xf32>
    %316 = arith.mulf %305, %315 : vector<16x32xf32>
    %317 = vector.broadcast %306 : vector<1x32xf32> to vector<16x32xf32>
    %318 = arith.mulf %316, %317 : vector<16x32xf32>
    %c0_105 = arith.constant 0 : index
    %c0_106 = arith.constant 0 : index
    %319 = vector.load %arg1[%c0_105, %c0_106] : memref<16x32xf32, #tpu.memory_space<vmem>>, vector<16x32xf32>
    %c0_107 = arith.constant 0 : index
    %c0_108 = arith.constant 0 : index
    %320 = vector.load %arg12[%c0_107, %c0_108] : memref<2x32xf32, #tpu.memory_space<vmem>>, vector<1x32xf32>
    %c0_109 = arith.constant 0 : index
    %c0_110 = arith.constant 0 : index
    %c0_111 = arith.constant 0 : index
    %321 = vector.load %arg13[%c0_109, %c0_110, %c0_111] : memref<2x32x96xf32, #tpu.memory_space<vmem>>, vector<1x32x96xf32>
    %322 = vector.shape_cast %321 : vector<1x32x96xf32> to vector<32x96xf32>
    %c0_112 = arith.constant 0 : index
    %c0_113 = arith.constant 0 : index
    %c0_114 = arith.constant 0 : index
    %323 = vector.load %arg14[%c0_112, %c0_113, %c0_114] : memref<2x32x32xf32, #tpu.memory_space<vmem>>, vector<1x32x32xf32>
    %324 = vector.shape_cast %323 : vector<1x32x32xf32> to vector<32x32xf32>
    %325 = arith.mulf %319, %319 : vector<16x32xf32>
    %cst_115 = arith.constant dense<0.000000e+00> : vector<16xf32>
    %326 = vector.multi_reduction <add>, %325, %cst_115 [1] : vector<16x32xf32> to vector<16xf32>
    %327 = vector.shape_cast %326 : vector<16xf32> to vector<16x1xf32>
    %cst_116 = arith.constant 3.200000e+01 : f32
    %328 = vector.broadcast %cst_116 : f32 to vector<16x1xf32>
    %329 = arith.divf %327, %328 : vector<16x1xf32>
    %cst_117 = arith.constant 9.99999997E-7 : f32
    %330 = vector.broadcast %cst_117 : f32 to vector<16x1xf32>
    %331 = arith.addf %329, %330 : vector<16x1xf32>
    %332 = math.rsqrt %331 : vector<16x1xf32>
    %333 = vector.broadcast %332 : vector<16x1xf32> to vector<16x32xf32>
    %334 = arith.mulf %319, %333 : vector<16x32xf32>
    %335 = vector.broadcast %320 : vector<1x32xf32> to vector<16x32xf32>
    %336 = arith.mulf %334, %335 : vector<16x32xf32>
    %cst_118 = arith.constant dense<0.000000e+00> : vector<16x96xf32>
    %337 = tpu.matmul %336, %322, %cst_118 {dimension_numbers = #tpu.dot_dimension_numbers<[1], [0], [0], [1], [0, 0, 1, 1], [], []>} : vector<16x32xf32>, vector<32x96xf32>, vector<16x96xf32> -> vector<16x96xf32>
    %338 = vector.extract_strided_slice %337 {offsets = [0, 0], sizes = [16, 32], strides = [1, 1]} : vector<16x96xf32> to vector<16x32xf32>
    %339 = vector.extract_strided_slice %337 {offsets = [0, 32], sizes = [16, 32], strides = [1, 1]} : vector<16x96xf32> to vector<16x32xf32>
    %340 = vector.extract_strided_slice %337 {offsets = [0, 64], sizes = [16, 32], strides = [1, 1]} : vector<16x96xf32> to vector<16x32xf32>
    %341 = vector.extract_strided_slice %338 {offsets = [0, 0], sizes = [16, 8], strides = [1, 1]} : vector<16x32xf32> to vector<16x8xf32>
    %342 = vector.shape_cast %341 : vector<16x8xf32> to vector<2x8x8xf32>
    %343 = vector.extract_strided_slice %339 {offsets = [0, 0], sizes = [16, 8], strides = [1, 1]} : vector<16x32xf32> to vector<16x8xf32>
    %344 = vector.shape_cast %343 : vector<16x8xf32> to vector<2x8x8xf32>
    %345 = vector.extract_strided_slice %340 {offsets = [0, 0], sizes = [16, 8], strides = [1, 1]} : vector<16x32xf32> to vector<16x8xf32>
    %346 = vector.shape_cast %345 : vector<16x8xf32> to vector<2x8x8xf32>
    "tpu.trace_start"() <{level = 10 : i32, message = "bqd,bkd->bqk"}> : () -> ()
    %cst_119 = arith.constant dense<0.000000e+00> : vector<2x8x8xf32>
    %347 = tpu.matmul %342, %344, %cst_119 {dimension_numbers = #tpu.dot_dimension_numbers<[2], [2], [1], [1], [0, 0, 0, 1, 1, 1], [0], [0]>} : vector<2x8x8xf32>, vector<2x8x8xf32>, vector<2x8x8xf32> -> vector<2x8x8xf32>
    "tpu.trace_stop"() : () -> ()
    %348 = vector.extract_strided_slice %2 {offsets = [0, 0, 0], sizes = [1, 8, 8], strides = [1, 1, 1]} : vector<4x8x8xf32> to vector<1x8x8xf32>
    %349 = vector.broadcast %348 : vector<1x8x8xf32> to vector<2x8x8xf32>
    %350 = arith.addf %347, %349 : vector<2x8x8xf32>
    %cst_120 = arith.constant dense<0xFF800000> : vector<2x8xf32>
    %351 = vector.multi_reduction <maximumf>, %350, %cst_120 [2] : vector<2x8x8xf32> to vector<2x8xf32>
    %352 = vector.shape_cast %351 : vector<2x8xf32> to vector<2x8x1xf32>
    %353 = vector.broadcast %352 : vector<2x8x1xf32> to vector<2x8x8xf32>
    %354 = arith.subf %350, %353 : vector<2x8x8xf32>
    %355 = math.exp %354 : vector<2x8x8xf32>
    %cst_121 = arith.constant dense<0.000000e+00> : vector<2x8xf32>
    %356 = vector.multi_reduction <add>, %355, %cst_121 [2] : vector<2x8x8xf32> to vector<2x8xf32>
    %357 = vector.shape_cast %356 : vector<2x8xf32> to vector<2x8x1xf32>
    %358 = tpu.reciprocal %357 {approx = true} : vector<2x8x1xf32> -> vector<2x8x1xf32>
    %359 = vector.broadcast %358 : vector<2x8x1xf32> to vector<2x8x8xf32>
    %360 = arith.mulf %355, %359 : vector<2x8x8xf32>
    "tpu.trace_start"() <{level = 10 : i32, message = "bqk,bkd->bqd"}> : () -> ()
    %cst_122 = arith.constant dense<0.000000e+00> : vector<2x8x8xf32>
    %361 = tpu.matmul %360, %346, %cst_122 {dimension_numbers = #tpu.dot_dimension_numbers<[2], [1], [1], [2], [0, 0, 0, 1, 1, 2], [0], [0]>} : vector<2x8x8xf32>, vector<2x8x8xf32>, vector<2x8x8xf32> -> vector<2x8x8xf32>
    "tpu.trace_stop"() : () -> ()
    %362 = vector.shape_cast %361 : vector<2x8x8xf32> to vector<16x8xf32>
    %363 = vector.extract_strided_slice %324 {offsets = [0, 0], sizes = [8, 32], strides = [1, 1]} : vector<32x32xf32> to vector<8x32xf32>
    %cst_123 = arith.constant dense<0.000000e+00> : vector<16x32xf32>
    %364 = tpu.matmul %362, %363, %cst_123 {dimension_numbers = #tpu.dot_dimension_numbers<[1], [0], [0], [1], [0, 0, 1, 1], [], []>} : vector<16x8xf32>, vector<8x32xf32>, vector<16x32xf32> -> vector<16x32xf32>
    %365 = arith.addf %319, %364 : vector<16x32xf32>
    %366 = vector.extract_strided_slice %338 {offsets = [0, 8], sizes = [16, 8], strides = [1, 1]} : vector<16x32xf32> to vector<16x8xf32>
    %367 = vector.shape_cast %366 : vector<16x8xf32> to vector<2x8x8xf32>
    %368 = vector.extract_strided_slice %339 {offsets = [0, 8], sizes = [16, 8], strides = [1, 1]} : vector<16x32xf32> to vector<16x8xf32>
    %369 = vector.shape_cast %368 : vector<16x8xf32> to vector<2x8x8xf32>
    %370 = vector.extract_strided_slice %340 {offsets = [0, 8], sizes = [16, 8], strides = [1, 1]} : vector<16x32xf32> to vector<16x8xf32>
    %371 = vector.shape_cast %370 : vector<16x8xf32> to vector<2x8x8xf32>
    "tpu.trace_start"() <{level = 10 : i32, message = "bqd,bkd->bqk"}> : () -> ()
    %cst_124 = arith.constant dense<0.000000e+00> : vector<2x8x8xf32>
    %372 = tpu.matmul %367, %369, %cst_124 {dimension_numbers = #tpu.dot_dimension_numbers<[2], [2], [1], [1], [0, 0, 0, 1, 1, 1], [0], [0]>} : vector<2x8x8xf32>, vector<2x8x8xf32>, vector<2x8x8xf32> -> vector<2x8x8xf32>
    "tpu.trace_stop"() : () -> ()
    %373 = vector.extract_strided_slice %2 {offsets = [1, 0, 0], sizes = [1, 8, 8], strides = [1, 1, 1]} : vector<4x8x8xf32> to vector<1x8x8xf32>
    %374 = vector.broadcast %373 : vector<1x8x8xf32> to vector<2x8x8xf32>
    %375 = arith.addf %372, %374 : vector<2x8x8xf32>
    %cst_125 = arith.constant dense<0xFF800000> : vector<2x8xf32>
    %376 = vector.multi_reduction <maximumf>, %375, %cst_125 [2] : vector<2x8x8xf32> to vector<2x8xf32>
    %377 = vector.shape_cast %376 : vector<2x8xf32> to vector<2x8x1xf32>
    %378 = vector.broadcast %377 : vector<2x8x1xf32> to vector<2x8x8xf32>
    %379 = arith.subf %375, %378 : vector<2x8x8xf32>
    %380 = math.exp %379 : vector<2x8x8xf32>
    %cst_126 = arith.constant dense<0.000000e+00> : vector<2x8xf32>
    %381 = vector.multi_reduction <add>, %380, %cst_126 [2] : vector<2x8x8xf32> to vector<2x8xf32>
    %382 = vector.shape_cast %381 : vector<2x8xf32> to vector<2x8x1xf32>
    %383 = tpu.reciprocal %382 {approx = true} : vector<2x8x1xf32> -> vector<2x8x1xf32>
    %384 = vector.broadcast %383 : vector<2x8x1xf32> to vector<2x8x8xf32>
    %385 = arith.mulf %380, %384 : vector<2x8x8xf32>
    "tpu.trace_start"() <{level = 10 : i32, message = "bqk,bkd->bqd"}> : () -> ()
    %cst_127 = arith.constant dense<0.000000e+00> : vector<2x8x8xf32>
    %386 = tpu.matmul %385, %371, %cst_127 {dimension_numbers = #tpu.dot_dimension_numbers<[2], [1], [1], [2], [0, 0, 0, 1, 1, 2], [0], [0]>} : vector<2x8x8xf32>, vector<2x8x8xf32>, vector<2x8x8xf32> -> vector<2x8x8xf32>
    "tpu.trace_stop"() : () -> ()
    %387 = vector.shape_cast %386 : vector<2x8x8xf32> to vector<16x8xf32>
    %388 = vector.extract_strided_slice %324 {offsets = [8, 0], sizes = [8, 32], strides = [1, 1]} : vector<32x32xf32> to vector<8x32xf32>
    %cst_128 = arith.constant dense<0.000000e+00> : vector<16x32xf32>
    %389 = tpu.matmul %387, %388, %cst_128 {dimension_numbers = #tpu.dot_dimension_numbers<[1], [0], [0], [1], [0, 0, 1, 1], [], []>} : vector<16x8xf32>, vector<8x32xf32>, vector<16x32xf32> -> vector<16x32xf32>
    %390 = arith.addf %365, %389 : vector<16x32xf32>
    %391 = vector.extract_strided_slice %338 {offsets = [0, 16], sizes = [16, 8], strides = [1, 1]} : vector<16x32xf32> to vector<16x8xf32>
    %392 = vector.shape_cast %391 : vector<16x8xf32> to vector<2x8x8xf32>
    %393 = vector.extract_strided_slice %339 {offsets = [0, 16], sizes = [16, 8], strides = [1, 1]} : vector<16x32xf32> to vector<16x8xf32>
    %394 = vector.shape_cast %393 : vector<16x8xf32> to vector<2x8x8xf32>
    %395 = vector.extract_strided_slice %340 {offsets = [0, 16], sizes = [16, 8], strides = [1, 1]} : vector<16x32xf32> to vector<16x8xf32>
    %396 = vector.shape_cast %395 : vector<16x8xf32> to vector<2x8x8xf32>
    "tpu.trace_start"() <{level = 10 : i32, message = "bqd,bkd->bqk"}> : () -> ()
    %cst_129 = arith.constant dense<0.000000e+00> : vector<2x8x8xf32>
    %397 = tpu.matmul %392, %394, %cst_129 {dimension_numbers = #tpu.dot_dimension_numbers<[2], [2], [1], [1], [0, 0, 0, 1, 1, 1], [0], [0]>} : vector<2x8x8xf32>, vector<2x8x8xf32>, vector<2x8x8xf32> -> vector<2x8x8xf32>
    "tpu.trace_stop"() : () -> ()
    %398 = vector.extract_strided_slice %2 {offsets = [2, 0, 0], sizes = [1, 8, 8], strides = [1, 1, 1]} : vector<4x8x8xf32> to vector<1x8x8xf32>
    %399 = vector.broadcast %398 : vector<1x8x8xf32> to vector<2x8x8xf32>
    %400 = arith.addf %397, %399 : vector<2x8x8xf32>
    %cst_130 = arith.constant dense<0xFF800000> : vector<2x8xf32>
    %401 = vector.multi_reduction <maximumf>, %400, %cst_130 [2] : vector<2x8x8xf32> to vector<2x8xf32>
    %402 = vector.shape_cast %401 : vector<2x8xf32> to vector<2x8x1xf32>
    %403 = vector.broadcast %402 : vector<2x8x1xf32> to vector<2x8x8xf32>
    %404 = arith.subf %400, %403 : vector<2x8x8xf32>
    %405 = math.exp %404 : vector<2x8x8xf32>
    %cst_131 = arith.constant dense<0.000000e+00> : vector<2x8xf32>
    %406 = vector.multi_reduction <add>, %405, %cst_131 [2] : vector<2x8x8xf32> to vector<2x8xf32>
    %407 = vector.shape_cast %406 : vector<2x8xf32> to vector<2x8x1xf32>
    %408 = tpu.reciprocal %407 {approx = true} : vector<2x8x1xf32> -> vector<2x8x1xf32>
    %409 = vector.broadcast %408 : vector<2x8x1xf32> to vector<2x8x8xf32>
    %410 = arith.mulf %405, %409 : vector<2x8x8xf32>
    "tpu.trace_start"() <{level = 10 : i32, message = "bqk,bkd->bqd"}> : () -> ()
    %cst_132 = arith.constant dense<0.000000e+00> : vector<2x8x8xf32>
    %411 = tpu.matmul %410, %396, %cst_132 {dimension_numbers = #tpu.dot_dimension_numbers<[2], [1], [1], [2], [0, 0, 0, 1, 1, 2], [0], [0]>} : vector<2x8x8xf32>, vector<2x8x8xf32>, vector<2x8x8xf32> -> vector<2x8x8xf32>
    "tpu.trace_stop"() : () -> ()
    %412 = vector.shape_cast %411 : vector<2x8x8xf32> to vector<16x8xf32>
    %413 = vector.extract_strided_slice %324 {offsets = [16, 0], sizes = [8, 32], strides = [1, 1]} : vector<32x32xf32> to vector<8x32xf32>
    %cst_133 = arith.constant dense<0.000000e+00> : vector<16x32xf32>
    %414 = tpu.matmul %412, %413, %cst_133 {dimension_numbers = #tpu.dot_dimension_numbers<[1], [0], [0], [1], [0, 0, 1, 1], [], []>} : vector<16x8xf32>, vector<8x32xf32>, vector<16x32xf32> -> vector<16x32xf32>
    %415 = arith.addf %390, %414 : vector<16x32xf32>
    %416 = vector.extract_strided_slice %338 {offsets = [0, 24], sizes = [16, 8], strides = [1, 1]} : vector<16x32xf32> to vector<16x8xf32>
    %417 = vector.shape_cast %416 : vector<16x8xf32> to vector<2x8x8xf32>
    %418 = vector.extract_strided_slice %339 {offsets = [0, 24], sizes = [16, 8], strides = [1, 1]} : vector<16x32xf32> to vector<16x8xf32>
    %419 = vector.shape_cast %418 : vector<16x8xf32> to vector<2x8x8xf32>
    %420 = vector.extract_strided_slice %340 {offsets = [0, 24], sizes = [16, 8], strides = [1, 1]} : vector<16x32xf32> to vector<16x8xf32>
    %421 = vector.shape_cast %420 : vector<16x8xf32> to vector<2x8x8xf32>
    "tpu.trace_start"() <{level = 10 : i32, message = "bqd,bkd->bqk"}> : () -> ()
    %cst_134 = arith.constant dense<0.000000e+00> : vector<2x8x8xf32>
    %422 = tpu.matmul %417, %419, %cst_134 {dimension_numbers = #tpu.dot_dimension_numbers<[2], [2], [1], [1], [0, 0, 0, 1, 1, 1], [0], [0]>} : vector<2x8x8xf32>, vector<2x8x8xf32>, vector<2x8x8xf32> -> vector<2x8x8xf32>
    "tpu.trace_stop"() : () -> ()
    %423 = vector.extract_strided_slice %2 {offsets = [3, 0, 0], sizes = [1, 8, 8], strides = [1, 1, 1]} : vector<4x8x8xf32> to vector<1x8x8xf32>
    %424 = vector.broadcast %423 : vector<1x8x8xf32> to vector<2x8x8xf32>
    %425 = arith.addf %422, %424 : vector<2x8x8xf32>
    %cst_135 = arith.constant dense<0xFF800000> : vector<2x8xf32>
    %426 = vector.multi_reduction <maximumf>, %425, %cst_135 [2] : vector<2x8x8xf32> to vector<2x8xf32>
    %427 = vector.shape_cast %426 : vector<2x8xf32> to vector<2x8x1xf32>
    %428 = vector.broadcast %427 : vector<2x8x1xf32> to vector<2x8x8xf32>
    %429 = arith.subf %425, %428 : vector<2x8x8xf32>
    %430 = math.exp %429 : vector<2x8x8xf32>
    %cst_136 = arith.constant dense<0.000000e+00> : vector<2x8xf32>
    %431 = vector.multi_reduction <add>, %430, %cst_136 [2] : vector<2x8x8xf32> to vector<2x8xf32>
    %432 = vector.shape_cast %431 : vector<2x8xf32> to vector<2x8x1xf32>
    %433 = tpu.reciprocal %432 {approx = true} : vector<2x8x1xf32> -> vector<2x8x1xf32>
    %434 = vector.broadcast %433 : vector<2x8x1xf32> to vector<2x8x8xf32>
    %435 = arith.mulf %430, %434 : vector<2x8x8xf32>
    "tpu.trace_start"() <{level = 10 : i32, message = "bqk,bkd->bqd"}> : () -> ()
    %cst_137 = arith.constant dense<0.000000e+00> : vector<2x8x8xf32>
    %436 = tpu.matmul %435, %421, %cst_137 {dimension_numbers = #tpu.dot_dimension_numbers<[2], [1], [1], [2], [0, 0, 0, 1, 1, 2], [0], [0]>} : vector<2x8x8xf32>, vector<2x8x8xf32>, vector<2x8x8xf32> -> vector<2x8x8xf32>
    "tpu.trace_stop"() : () -> ()
    %437 = vector.shape_cast %436 : vector<2x8x8xf32> to vector<16x8xf32>
    %438 = vector.extract_strided_slice %324 {offsets = [24, 0], sizes = [8, 32], strides = [1, 1]} : vector<32x32xf32> to vector<8x32xf32>
    %cst_138 = arith.constant dense<0.000000e+00> : vector<16x32xf32>
    %439 = tpu.matmul %437, %438, %cst_138 {dimension_numbers = #tpu.dot_dimension_numbers<[1], [0], [0], [1], [0, 0, 1, 1], [], []>} : vector<16x8xf32>, vector<8x32xf32>, vector<16x32xf32> -> vector<16x32xf32>
    %440 = arith.addf %415, %439 : vector<16x32xf32>
    %c0_139 = arith.constant 0 : index
    %c0_140 = arith.constant 0 : index
    %441 = vector.load %arg15[%c0_139, %c0_140] : memref<2x32xf32, #tpu.memory_space<vmem>>, vector<1x32xf32>
    %c0_141 = arith.constant 0 : index
    %c0_142 = arith.constant 0 : index
    %c0_143 = arith.constant 0 : index
    %442 = vector.load %arg16[%c0_141, %c0_142, %c0_143] : memref<2x32x32xf32, #tpu.memory_space<vmem>>, vector<1x32x32xf32>
    %443 = vector.shape_cast %442 : vector<1x32x32xf32> to vector<32x32xf32>
    %c0_144 = arith.constant 0 : index
    %c0_145 = arith.constant 0 : index
    %c0_146 = arith.constant 0 : index
    %444 = vector.load %arg17[%c0_144, %c0_145, %c0_146] : memref<2x32x64xf32, #tpu.memory_space<vmem>>, vector<1x32x64xf32>
    %445 = vector.shape_cast %444 : vector<1x32x64xf32> to vector<32x64xf32>
    %c0_147 = arith.constant 0 : index
    %c0_148 = arith.constant 0 : index
    %c0_149 = arith.constant 0 : index
    %446 = vector.load %arg18[%c0_147, %c0_148, %c0_149] : memref<2x32x32xf32, #tpu.memory_space<vmem>>, vector<1x32x32xf32>
    %447 = vector.shape_cast %446 : vector<1x32x32xf32> to vector<32x32xf32>
    %448 = arith.mulf %440, %440 : vector<16x32xf32>
    %cst_150 = arith.constant dense<0.000000e+00> : vector<16xf32>
    %449 = vector.multi_reduction <add>, %448, %cst_150 [1] : vector<16x32xf32> to vector<16xf32>
    %450 = vector.shape_cast %449 : vector<16xf32> to vector<16x1xf32>
    %cst_151 = arith.constant 3.200000e+01 : f32
    %451 = vector.broadcast %cst_151 : f32 to vector<16x1xf32>
    %452 = arith.divf %450, %451 : vector<16x1xf32>
    %cst_152 = arith.constant 9.99999997E-7 : f32
    %453 = vector.broadcast %cst_152 : f32 to vector<16x1xf32>
    %454 = arith.addf %452, %453 : vector<16x1xf32>
    %455 = math.rsqrt %454 : vector<16x1xf32>
    %456 = vector.broadcast %455 : vector<16x1xf32> to vector<16x32xf32>
    %457 = arith.mulf %440, %456 : vector<16x32xf32>
    %458 = vector.broadcast %441 : vector<1x32xf32> to vector<16x32xf32>
    %459 = arith.mulf %457, %458 : vector<16x32xf32>
    %cst_153 = arith.constant dense<0.000000e+00> : vector<16x32xf32>
    %460 = tpu.matmul %459, %443, %cst_153 {dimension_numbers = #tpu.dot_dimension_numbers<[1], [0], [0], [1], [0, 0, 1, 1], [], []>} : vector<16x32xf32>, vector<32x32xf32>, vector<16x32xf32> -> vector<16x32xf32>
    %cst_154 = arith.constant dense<0.000000e+00> : vector<16x64xf32>
    %461 = tpu.matmul %318, %445, %cst_154 {dimension_numbers = #tpu.dot_dimension_numbers<[1], [0], [0], [1], [0, 0, 1, 1], [], []>} : vector<16x32xf32>, vector<32x64xf32>, vector<16x64xf32> -> vector<16x64xf32>
    %462 = vector.extract_strided_slice %461 {offsets = [0, 0], sizes = [16, 32], strides = [1, 1]} : vector<16x64xf32> to vector<16x32xf32>
    %463 = vector.extract_strided_slice %461 {offsets = [0, 32], sizes = [16, 32], strides = [1, 1]} : vector<16x64xf32> to vector<16x32xf32>
    %464 = vector.extract_strided_slice %460 {offsets = [0, 0], sizes = [16, 8], strides = [1, 1]} : vector<16x32xf32> to vector<16x8xf32>
    %465 = vector.shape_cast %464 : vector<16x8xf32> to vector<2x8x8xf32>
    %466 = vector.extract_strided_slice %462 {offsets = [0, 0], sizes = [16, 8], strides = [1, 1]} : vector<16x32xf32> to vector<16x8xf32>
    %467 = vector.shape_cast %466 : vector<16x8xf32> to vector<2x8x8xf32>
    %468 = vector.extract_strided_slice %463 {offsets = [0, 0], sizes = [16, 8], strides = [1, 1]} : vector<16x32xf32> to vector<16x8xf32>
    %469 = vector.shape_cast %468 : vector<16x8xf32> to vector<2x8x8xf32>
    "tpu.trace_start"() <{level = 10 : i32, message = "bqd,bkd->bqk"}> : () -> ()
    %cst_155 = arith.constant dense<0.000000e+00> : vector<2x8x8xf32>
    %470 = tpu.matmul %465, %467, %cst_155 {dimension_numbers = #tpu.dot_dimension_numbers<[2], [2], [1], [1], [0, 0, 0, 1, 1, 1], [0], [0]>} : vector<2x8x8xf32>, vector<2x8x8xf32>, vector<2x8x8xf32> -> vector<2x8x8xf32>
    "tpu.trace_stop"() : () -> ()
    %471 = vector.broadcast %0 : vector<2x1x8xf32> to vector<2x8x8xf32>
    %472 = arith.addf %470, %471 : vector<2x8x8xf32>
    %cst_156 = arith.constant dense<0xFF800000> : vector<2x8xf32>
    %473 = vector.multi_reduction <maximumf>, %472, %cst_156 [2] : vector<2x8x8xf32> to vector<2x8xf32>
    %474 = vector.shape_cast %473 : vector<2x8xf32> to vector<2x8x1xf32>
    %475 = vector.broadcast %474 : vector<2x8x1xf32> to vector<2x8x8xf32>
    %476 = arith.subf %472, %475 : vector<2x8x8xf32>
    %477 = math.exp %476 : vector<2x8x8xf32>
    %cst_157 = arith.constant dense<0.000000e+00> : vector<2x8xf32>
    %478 = vector.multi_reduction <add>, %477, %cst_157 [2] : vector<2x8x8xf32> to vector<2x8xf32>
    %479 = vector.shape_cast %478 : vector<2x8xf32> to vector<2x8x1xf32>
    %480 = tpu.reciprocal %479 {approx = true} : vector<2x8x1xf32> -> vector<2x8x1xf32>
    %481 = vector.broadcast %480 : vector<2x8x1xf32> to vector<2x8x8xf32>
    %482 = arith.mulf %477, %481 : vector<2x8x8xf32>
    "tpu.trace_start"() <{level = 10 : i32, message = "bqk,bkd->bqd"}> : () -> ()
    %cst_158 = arith.constant dense<0.000000e+00> : vector<2x8x8xf32>
    %483 = tpu.matmul %482, %469, %cst_158 {dimension_numbers = #tpu.dot_dimension_numbers<[2], [1], [1], [2], [0, 0, 0, 1, 1, 2], [0], [0]>} : vector<2x8x8xf32>, vector<2x8x8xf32>, vector<2x8x8xf32> -> vector<2x8x8xf32>
    "tpu.trace_stop"() : () -> ()
    %484 = vector.shape_cast %483 : vector<2x8x8xf32> to vector<16x8xf32>
    %485 = vector.extract_strided_slice %447 {offsets = [0, 0], sizes = [8, 32], strides = [1, 1]} : vector<32x32xf32> to vector<8x32xf32>
    %cst_159 = arith.constant dense<0.000000e+00> : vector<16x32xf32>
    %486 = tpu.matmul %484, %485, %cst_159 {dimension_numbers = #tpu.dot_dimension_numbers<[1], [0], [0], [1], [0, 0, 1, 1], [], []>} : vector<16x8xf32>, vector<8x32xf32>, vector<16x32xf32> -> vector<16x32xf32>
    %487 = arith.addf %440, %486 : vector<16x32xf32>
    %488 = vector.extract_strided_slice %460 {offsets = [0, 8], sizes = [16, 8], strides = [1, 1]} : vector<16x32xf32> to vector<16x8xf32>
    %489 = vector.shape_cast %488 : vector<16x8xf32> to vector<2x8x8xf32>
    %490 = vector.extract_strided_slice %462 {offsets = [0, 8], sizes = [16, 8], strides = [1, 1]} : vector<16x32xf32> to vector<16x8xf32>
    %491 = vector.shape_cast %490 : vector<16x8xf32> to vector<2x8x8xf32>
    %492 = vector.extract_strided_slice %463 {offsets = [0, 8], sizes = [16, 8], strides = [1, 1]} : vector<16x32xf32> to vector<16x8xf32>
    %493 = vector.shape_cast %492 : vector<16x8xf32> to vector<2x8x8xf32>
    "tpu.trace_start"() <{level = 10 : i32, message = "bqd,bkd->bqk"}> : () -> ()
    %cst_160 = arith.constant dense<0.000000e+00> : vector<2x8x8xf32>
    %494 = tpu.matmul %489, %491, %cst_160 {dimension_numbers = #tpu.dot_dimension_numbers<[2], [2], [1], [1], [0, 0, 0, 1, 1, 1], [0], [0]>} : vector<2x8x8xf32>, vector<2x8x8xf32>, vector<2x8x8xf32> -> vector<2x8x8xf32>
    "tpu.trace_stop"() : () -> ()
    %495 = vector.broadcast %0 : vector<2x1x8xf32> to vector<2x8x8xf32>
    %496 = arith.addf %494, %495 : vector<2x8x8xf32>
    %cst_161 = arith.constant dense<0xFF800000> : vector<2x8xf32>
    %497 = vector.multi_reduction <maximumf>, %496, %cst_161 [2] : vector<2x8x8xf32> to vector<2x8xf32>
    %498 = vector.shape_cast %497 : vector<2x8xf32> to vector<2x8x1xf32>
    %499 = vector.broadcast %498 : vector<2x8x1xf32> to vector<2x8x8xf32>
    %500 = arith.subf %496, %499 : vector<2x8x8xf32>
    %501 = math.exp %500 : vector<2x8x8xf32>
    %cst_162 = arith.constant dense<0.000000e+00> : vector<2x8xf32>
    %502 = vector.multi_reduction <add>, %501, %cst_162 [2] : vector<2x8x8xf32> to vector<2x8xf32>
    %503 = vector.shape_cast %502 : vector<2x8xf32> to vector<2x8x1xf32>
    %504 = tpu.reciprocal %503 {approx = true} : vector<2x8x1xf32> -> vector<2x8x1xf32>
    %505 = vector.broadcast %504 : vector<2x8x1xf32> to vector<2x8x8xf32>
    %506 = arith.mulf %501, %505 : vector<2x8x8xf32>
    "tpu.trace_start"() <{level = 10 : i32, message = "bqk,bkd->bqd"}> : () -> ()
    %cst_163 = arith.constant dense<0.000000e+00> : vector<2x8x8xf32>
    %507 = tpu.matmul %506, %493, %cst_163 {dimension_numbers = #tpu.dot_dimension_numbers<[2], [1], [1], [2], [0, 0, 0, 1, 1, 2], [0], [0]>} : vector<2x8x8xf32>, vector<2x8x8xf32>, vector<2x8x8xf32> -> vector<2x8x8xf32>
    "tpu.trace_stop"() : () -> ()
    %508 = vector.shape_cast %507 : vector<2x8x8xf32> to vector<16x8xf32>
    %509 = vector.extract_strided_slice %447 {offsets = [8, 0], sizes = [8, 32], strides = [1, 1]} : vector<32x32xf32> to vector<8x32xf32>
    %cst_164 = arith.constant dense<0.000000e+00> : vector<16x32xf32>
    %510 = tpu.matmul %508, %509, %cst_164 {dimension_numbers = #tpu.dot_dimension_numbers<[1], [0], [0], [1], [0, 0, 1, 1], [], []>} : vector<16x8xf32>, vector<8x32xf32>, vector<16x32xf32> -> vector<16x32xf32>
    %511 = arith.addf %487, %510 : vector<16x32xf32>
    %512 = vector.extract_strided_slice %460 {offsets = [0, 16], sizes = [16, 8], strides = [1, 1]} : vector<16x32xf32> to vector<16x8xf32>
    %513 = vector.shape_cast %512 : vector<16x8xf32> to vector<2x8x8xf32>
    %514 = vector.extract_strided_slice %462 {offsets = [0, 16], sizes = [16, 8], strides = [1, 1]} : vector<16x32xf32> to vector<16x8xf32>
    %515 = vector.shape_cast %514 : vector<16x8xf32> to vector<2x8x8xf32>
    %516 = vector.extract_strided_slice %463 {offsets = [0, 16], sizes = [16, 8], strides = [1, 1]} : vector<16x32xf32> to vector<16x8xf32>
    %517 = vector.shape_cast %516 : vector<16x8xf32> to vector<2x8x8xf32>
    "tpu.trace_start"() <{level = 10 : i32, message = "bqd,bkd->bqk"}> : () -> ()
    %cst_165 = arith.constant dense<0.000000e+00> : vector<2x8x8xf32>
    %518 = tpu.matmul %513, %515, %cst_165 {dimension_numbers = #tpu.dot_dimension_numbers<[2], [2], [1], [1], [0, 0, 0, 1, 1, 1], [0], [0]>} : vector<2x8x8xf32>, vector<2x8x8xf32>, vector<2x8x8xf32> -> vector<2x8x8xf32>
    "tpu.trace_stop"() : () -> ()
    %519 = vector.broadcast %0 : vector<2x1x8xf32> to vector<2x8x8xf32>
    %520 = arith.addf %518, %519 : vector<2x8x8xf32>
    %cst_166 = arith.constant dense<0xFF800000> : vector<2x8xf32>
    %521 = vector.multi_reduction <maximumf>, %520, %cst_166 [2] : vector<2x8x8xf32> to vector<2x8xf32>
    %522 = vector.shape_cast %521 : vector<2x8xf32> to vector<2x8x1xf32>
    %523 = vector.broadcast %522 : vector<2x8x1xf32> to vector<2x8x8xf32>
    %524 = arith.subf %520, %523 : vector<2x8x8xf32>
    %525 = math.exp %524 : vector<2x8x8xf32>
    %cst_167 = arith.constant dense<0.000000e+00> : vector<2x8xf32>
    %526 = vector.multi_reduction <add>, %525, %cst_167 [2] : vector<2x8x8xf32> to vector<2x8xf32>
    %527 = vector.shape_cast %526 : vector<2x8xf32> to vector<2x8x1xf32>
    %528 = tpu.reciprocal %527 {approx = true} : vector<2x8x1xf32> -> vector<2x8x1xf32>
    %529 = vector.broadcast %528 : vector<2x8x1xf32> to vector<2x8x8xf32>
    %530 = arith.mulf %525, %529 : vector<2x8x8xf32>
    "tpu.trace_start"() <{level = 10 : i32, message = "bqk,bkd->bqd"}> : () -> ()
    %cst_168 = arith.constant dense<0.000000e+00> : vector<2x8x8xf32>
    %531 = tpu.matmul %530, %517, %cst_168 {dimension_numbers = #tpu.dot_dimension_numbers<[2], [1], [1], [2], [0, 0, 0, 1, 1, 2], [0], [0]>} : vector<2x8x8xf32>, vector<2x8x8xf32>, vector<2x8x8xf32> -> vector<2x8x8xf32>
    "tpu.trace_stop"() : () -> ()
    %532 = vector.shape_cast %531 : vector<2x8x8xf32> to vector<16x8xf32>
    %533 = vector.extract_strided_slice %447 {offsets = [16, 0], sizes = [8, 32], strides = [1, 1]} : vector<32x32xf32> to vector<8x32xf32>
    %cst_169 = arith.constant dense<0.000000e+00> : vector<16x32xf32>
    %534 = tpu.matmul %532, %533, %cst_169 {dimension_numbers = #tpu.dot_dimension_numbers<[1], [0], [0], [1], [0, 0, 1, 1], [], []>} : vector<16x8xf32>, vector<8x32xf32>, vector<16x32xf32> -> vector<16x32xf32>
    %535 = arith.addf %511, %534 : vector<16x32xf32>
    %536 = vector.extract_strided_slice %460 {offsets = [0, 24], sizes = [16, 8], strides = [1, 1]} : vector<16x32xf32> to vector<16x8xf32>
    %537 = vector.shape_cast %536 : vector<16x8xf32> to vector<2x8x8xf32>
    %538 = vector.extract_strided_slice %462 {offsets = [0, 24], sizes = [16, 8], strides = [1, 1]} : vector<16x32xf32> to vector<16x8xf32>
    %539 = vector.shape_cast %538 : vector<16x8xf32> to vector<2x8x8xf32>
    %540 = vector.extract_strided_slice %463 {offsets = [0, 24], sizes = [16, 8], strides = [1, 1]} : vector<16x32xf32> to vector<16x8xf32>
    %541 = vector.shape_cast %540 : vector<16x8xf32> to vector<2x8x8xf32>
    "tpu.trace_start"() <{level = 10 : i32, message = "bqd,bkd->bqk"}> : () -> ()
    %cst_170 = arith.constant dense<0.000000e+00> : vector<2x8x8xf32>
    %542 = tpu.matmul %537, %539, %cst_170 {dimension_numbers = #tpu.dot_dimension_numbers<[2], [2], [1], [1], [0, 0, 0, 1, 1, 1], [0], [0]>} : vector<2x8x8xf32>, vector<2x8x8xf32>, vector<2x8x8xf32> -> vector<2x8x8xf32>
    "tpu.trace_stop"() : () -> ()
    %543 = vector.broadcast %0 : vector<2x1x8xf32> to vector<2x8x8xf32>
    %544 = arith.addf %542, %543 : vector<2x8x8xf32>
    %cst_171 = arith.constant dense<0xFF800000> : vector<2x8xf32>
    %545 = vector.multi_reduction <maximumf>, %544, %cst_171 [2] : vector<2x8x8xf32> to vector<2x8xf32>
    %546 = vector.shape_cast %545 : vector<2x8xf32> to vector<2x8x1xf32>
    %547 = vector.broadcast %546 : vector<2x8x1xf32> to vector<2x8x8xf32>
    %548 = arith.subf %544, %547 : vector<2x8x8xf32>
    %549 = math.exp %548 : vector<2x8x8xf32>
    %cst_172 = arith.constant dense<0.000000e+00> : vector<2x8xf32>
    %550 = vector.multi_reduction <add>, %549, %cst_172 [2] : vector<2x8x8xf32> to vector<2x8xf32>
    %551 = vector.shape_cast %550 : vector<2x8xf32> to vector<2x8x1xf32>
    %552 = tpu.reciprocal %551 {approx = true} : vector<2x8x1xf32> -> vector<2x8x1xf32>
    %553 = vector.broadcast %552 : vector<2x8x1xf32> to vector<2x8x8xf32>
    %554 = arith.mulf %549, %553 : vector<2x8x8xf32>
    "tpu.trace_start"() <{level = 10 : i32, message = "bqk,bkd->bqd"}> : () -> ()
    %cst_173 = arith.constant dense<0.000000e+00> : vector<2x8x8xf32>
    %555 = tpu.matmul %554, %541, %cst_173 {dimension_numbers = #tpu.dot_dimension_numbers<[2], [1], [1], [2], [0, 0, 0, 1, 1, 2], [0], [0]>} : vector<2x8x8xf32>, vector<2x8x8xf32>, vector<2x8x8xf32> -> vector<2x8x8xf32>
    "tpu.trace_stop"() : () -> ()
    %556 = vector.shape_cast %555 : vector<2x8x8xf32> to vector<16x8xf32>
    %557 = vector.extract_strided_slice %447 {offsets = [24, 0], sizes = [8, 32], strides = [1, 1]} : vector<32x32xf32> to vector<8x32xf32>
    %cst_174 = arith.constant dense<0.000000e+00> : vector<16x32xf32>
    %558 = tpu.matmul %556, %557, %cst_174 {dimension_numbers = #tpu.dot_dimension_numbers<[1], [0], [0], [1], [0, 0, 1, 1], [], []>} : vector<16x8xf32>, vector<8x32xf32>, vector<16x32xf32> -> vector<16x32xf32>
    %559 = arith.addf %535, %558 : vector<16x32xf32>
    %c0_175 = arith.constant 0 : index
    %c0_176 = arith.constant 0 : index
    %560 = vector.load %arg19[%c0_175, %c0_176] : memref<2x32xf32, #tpu.memory_space<vmem>>, vector<1x32xf32>
    %c0_177 = arith.constant 0 : index
    %c0_178 = arith.constant 0 : index
    %c0_179 = arith.constant 0 : index
    %561 = vector.load %arg20[%c0_177, %c0_178, %c0_179] : memref<2x32x64xf32, #tpu.memory_space<vmem>>, vector<1x32x64xf32>
    %562 = vector.shape_cast %561 : vector<1x32x64xf32> to vector<32x64xf32>
    %c0_180 = arith.constant 0 : index
    %c0_181 = arith.constant 0 : index
    %c0_182 = arith.constant 0 : index
    %563 = vector.load %arg21[%c0_180, %c0_181, %c0_182] : memref<2x64x32xf32, #tpu.memory_space<vmem>>, vector<1x64x32xf32>
    %564 = vector.shape_cast %563 : vector<1x64x32xf32> to vector<64x32xf32>
    %565 = arith.mulf %559, %559 : vector<16x32xf32>
    %cst_183 = arith.constant dense<0.000000e+00> : vector<16xf32>
    %566 = vector.multi_reduction <add>, %565, %cst_183 [1] : vector<16x32xf32> to vector<16xf32>
    %567 = vector.shape_cast %566 : vector<16xf32> to vector<16x1xf32>
    %cst_184 = arith.constant 3.200000e+01 : f32
    %568 = vector.broadcast %cst_184 : f32 to vector<16x1xf32>
    %569 = arith.divf %567, %568 : vector<16x1xf32>
    %cst_185 = arith.constant 9.99999997E-7 : f32
    %570 = vector.broadcast %cst_185 : f32 to vector<16x1xf32>
    %571 = arith.addf %569, %570 : vector<16x1xf32>
    %572 = math.rsqrt %571 : vector<16x1xf32>
    %573 = vector.broadcast %572 : vector<16x1xf32> to vector<16x32xf32>
    %574 = arith.mulf %559, %573 : vector<16x32xf32>
    %575 = vector.broadcast %560 : vector<1x32xf32> to vector<16x32xf32>
    %576 = arith.mulf %574, %575 : vector<16x32xf32>
    %cst_186 = arith.constant dense<0.000000e+00> : vector<16x64xf32>
    %577 = tpu.matmul %576, %562, %cst_186 {dimension_numbers = #tpu.dot_dimension_numbers<[1], [0], [0], [1], [0, 0, 1, 1], [], []>} : vector<16x32xf32>, vector<32x64xf32>, vector<16x64xf32> -> vector<16x64xf32>
    %cst_187 = arith.constant 0.000000e+00 : f32
    %578 = vector.broadcast %cst_187 : f32 to vector<16x64xf32>
    %579 = arith.maximumf %577, %578 : vector<16x64xf32>
    %cst_188 = arith.constant dense<0.000000e+00> : vector<16x32xf32>
    %580 = tpu.matmul %579, %564, %cst_188 {dimension_numbers = #tpu.dot_dimension_numbers<[1], [0], [0], [1], [0, 0, 1, 1], [], []>} : vector<16x64xf32>, vector<64x32xf32>, vector<16x32xf32> -> vector<16x32xf32>
    %581 = arith.addf %559, %580 : vector<16x32xf32>
    %c1_189 = arith.constant 1 : index
    %c0_190 = arith.constant 0 : index
    %582 = vector.load %arg12[%c1_189, %c0_190] : memref<2x32xf32, #tpu.memory_space<vmem>>, vector<1x32xf32>
    %c1_191 = arith.constant 1 : index
    %c0_192 = arith.constant 0 : index
    %c0_193 = arith.constant 0 : index
    %583 = vector.load %arg13[%c1_191, %c0_192, %c0_193] : memref<2x32x96xf32, #tpu.memory_space<vmem>>, vector<1x32x96xf32>
    %584 = vector.shape_cast %583 : vector<1x32x96xf32> to vector<32x96xf32>
    %c1_194 = arith.constant 1 : index
    %c0_195 = arith.constant 0 : index
    %c0_196 = arith.constant 0 : index
    %585 = vector.load %arg14[%c1_194, %c0_195, %c0_196] : memref<2x32x32xf32, #tpu.memory_space<vmem>>, vector<1x32x32xf32>
    %586 = vector.shape_cast %585 : vector<1x32x32xf32> to vector<32x32xf32>
    %587 = arith.mulf %581, %581 : vector<16x32xf32>
    %cst_197 = arith.constant dense<0.000000e+00> : vector<16xf32>
    %588 = vector.multi_reduction <add>, %587, %cst_197 [1] : vector<16x32xf32> to vector<16xf32>
    %589 = vector.shape_cast %588 : vector<16xf32> to vector<16x1xf32>
    %cst_198 = arith.constant 3.200000e+01 : f32
    %590 = vector.broadcast %cst_198 : f32 to vector<16x1xf32>
    %591 = arith.divf %589, %590 : vector<16x1xf32>
    %cst_199 = arith.constant 9.99999997E-7 : f32
    %592 = vector.broadcast %cst_199 : f32 to vector<16x1xf32>
    %593 = arith.addf %591, %592 : vector<16x1xf32>
    %594 = math.rsqrt %593 : vector<16x1xf32>
    %595 = vector.broadcast %594 : vector<16x1xf32> to vector<16x32xf32>
    %596 = arith.mulf %581, %595 : vector<16x32xf32>
    %597 = vector.broadcast %582 : vector<1x32xf32> to vector<16x32xf32>
    %598 = arith.mulf %596, %597 : vector<16x32xf32>
    %cst_200 = arith.constant dense<0.000000e+00> : vector<16x96xf32>
    %599 = tpu.matmul %598, %584, %cst_200 {dimension_numbers = #tpu.dot_dimension_numbers<[1], [0], [0], [1], [0, 0, 1, 1], [], []>} : vector<16x32xf32>, vector<32x96xf32>, vector<16x96xf32> -> vector<16x96xf32>
    %600 = vector.extract_strided_slice %599 {offsets = [0, 0], sizes = [16, 32], strides = [1, 1]} : vector<16x96xf32> to vector<16x32xf32>
    %601 = vector.extract_strided_slice %599 {offsets = [0, 32], sizes = [16, 32], strides = [1, 1]} : vector<16x96xf32> to vector<16x32xf32>
    %602 = vector.extract_strided_slice %599 {offsets = [0, 64], sizes = [16, 32], strides = [1, 1]} : vector<16x96xf32> to vector<16x32xf32>
    %603 = vector.extract_strided_slice %600 {offsets = [0, 0], sizes = [16, 8], strides = [1, 1]} : vector<16x32xf32> to vector<16x8xf32>
    %604 = vector.shape_cast %603 : vector<16x8xf32> to vector<2x8x8xf32>
    %605 = vector.extract_strided_slice %601 {offsets = [0, 0], sizes = [16, 8], strides = [1, 1]} : vector<16x32xf32> to vector<16x8xf32>
    %606 = vector.shape_cast %605 : vector<16x8xf32> to vector<2x8x8xf32>
    %607 = vector.extract_strided_slice %602 {offsets = [0, 0], sizes = [16, 8], strides = [1, 1]} : vector<16x32xf32> to vector<16x8xf32>
    %608 = vector.shape_cast %607 : vector<16x8xf32> to vector<2x8x8xf32>
    "tpu.trace_start"() <{level = 10 : i32, message = "bqd,bkd->bqk"}> : () -> ()
    %cst_201 = arith.constant dense<0.000000e+00> : vector<2x8x8xf32>
    %609 = tpu.matmul %604, %606, %cst_201 {dimension_numbers = #tpu.dot_dimension_numbers<[2], [2], [1], [1], [0, 0, 0, 1, 1, 1], [0], [0]>} : vector<2x8x8xf32>, vector<2x8x8xf32>, vector<2x8x8xf32> -> vector<2x8x8xf32>
    "tpu.trace_stop"() : () -> ()
    %610 = vector.extract_strided_slice %2 {offsets = [0, 0, 0], sizes = [1, 8, 8], strides = [1, 1, 1]} : vector<4x8x8xf32> to vector<1x8x8xf32>
    %611 = vector.broadcast %610 : vector<1x8x8xf32> to vector<2x8x8xf32>
    %612 = arith.addf %609, %611 : vector<2x8x8xf32>
    %cst_202 = arith.constant dense<0xFF800000> : vector<2x8xf32>
    %613 = vector.multi_reduction <maximumf>, %612, %cst_202 [2] : vector<2x8x8xf32> to vector<2x8xf32>
    %614 = vector.shape_cast %613 : vector<2x8xf32> to vector<2x8x1xf32>
    %615 = vector.broadcast %614 : vector<2x8x1xf32> to vector<2x8x8xf32>
    %616 = arith.subf %612, %615 : vector<2x8x8xf32>
    %617 = math.exp %616 : vector<2x8x8xf32>
    %cst_203 = arith.constant dense<0.000000e+00> : vector<2x8xf32>
    %618 = vector.multi_reduction <add>, %617, %cst_203 [2] : vector<2x8x8xf32> to vector<2x8xf32>
    %619 = vector.shape_cast %618 : vector<2x8xf32> to vector<2x8x1xf32>
    %620 = tpu.reciprocal %619 {approx = true} : vector<2x8x1xf32> -> vector<2x8x1xf32>
    %621 = vector.broadcast %620 : vector<2x8x1xf32> to vector<2x8x8xf32>
    %622 = arith.mulf %617, %621 : vector<2x8x8xf32>
    "tpu.trace_start"() <{level = 10 : i32, message = "bqk,bkd->bqd"}> : () -> ()
    %cst_204 = arith.constant dense<0.000000e+00> : vector<2x8x8xf32>
    %623 = tpu.matmul %622, %608, %cst_204 {dimension_numbers = #tpu.dot_dimension_numbers<[2], [1], [1], [2], [0, 0, 0, 1, 1, 2], [0], [0]>} : vector<2x8x8xf32>, vector<2x8x8xf32>, vector<2x8x8xf32> -> vector<2x8x8xf32>
    "tpu.trace_stop"() : () -> ()
    %624 = vector.shape_cast %623 : vector<2x8x8xf32> to vector<16x8xf32>
    %625 = vector.extract_strided_slice %586 {offsets = [0, 0], sizes = [8, 32], strides = [1, 1]} : vector<32x32xf32> to vector<8x32xf32>
    %cst_205 = arith.constant dense<0.000000e+00> : vector<16x32xf32>
    %626 = tpu.matmul %624, %625, %cst_205 {dimension_numbers = #tpu.dot_dimension_numbers<[1], [0], [0], [1], [0, 0, 1, 1], [], []>} : vector<16x8xf32>, vector<8x32xf32>, vector<16x32xf32> -> vector<16x32xf32>
    %627 = arith.addf %581, %626 : vector<16x32xf32>
    %628 = vector.extract_strided_slice %600 {offsets = [0, 8], sizes = [16, 8], strides = [1, 1]} : vector<16x32xf32> to vector<16x8xf32>
    %629 = vector.shape_cast %628 : vector<16x8xf32> to vector<2x8x8xf32>
    %630 = vector.extract_strided_slice %601 {offsets = [0, 8], sizes = [16, 8], strides = [1, 1]} : vector<16x32xf32> to vector<16x8xf32>
    %631 = vector.shape_cast %630 : vector<16x8xf32> to vector<2x8x8xf32>
    %632 = vector.extract_strided_slice %602 {offsets = [0, 8], sizes = [16, 8], strides = [1, 1]} : vector<16x32xf32> to vector<16x8xf32>
    %633 = vector.shape_cast %632 : vector<16x8xf32> to vector<2x8x8xf32>
    "tpu.trace_start"() <{level = 10 : i32, message = "bqd,bkd->bqk"}> : () -> ()
    %cst_206 = arith.constant dense<0.000000e+00> : vector<2x8x8xf32>
    %634 = tpu.matmul %629, %631, %cst_206 {dimension_numbers = #tpu.dot_dimension_numbers<[2], [2], [1], [1], [0, 0, 0, 1, 1, 1], [0], [0]>} : vector<2x8x8xf32>, vector<2x8x8xf32>, vector<2x8x8xf32> -> vector<2x8x8xf32>
    "tpu.trace_stop"() : () -> ()
    %635 = vector.extract_strided_slice %2 {offsets = [1, 0, 0], sizes = [1, 8, 8], strides = [1, 1, 1]} : vector<4x8x8xf32> to vector<1x8x8xf32>
    %636 = vector.broadcast %635 : vector<1x8x8xf32> to vector<2x8x8xf32>
    %637 = arith.addf %634, %636 : vector<2x8x8xf32>
    %cst_207 = arith.constant dense<0xFF800000> : vector<2x8xf32>
    %638 = vector.multi_reduction <maximumf>, %637, %cst_207 [2] : vector<2x8x8xf32> to vector<2x8xf32>
    %639 = vector.shape_cast %638 : vector<2x8xf32> to vector<2x8x1xf32>
    %640 = vector.broadcast %639 : vector<2x8x1xf32> to vector<2x8x8xf32>
    %641 = arith.subf %637, %640 : vector<2x8x8xf32>
    %642 = math.exp %641 : vector<2x8x8xf32>
    %cst_208 = arith.constant dense<0.000000e+00> : vector<2x8xf32>
    %643 = vector.multi_reduction <add>, %642, %cst_208 [2] : vector<2x8x8xf32> to vector<2x8xf32>
    %644 = vector.shape_cast %643 : vector<2x8xf32> to vector<2x8x1xf32>
    %645 = tpu.reciprocal %644 {approx = true} : vector<2x8x1xf32> -> vector<2x8x1xf32>
    %646 = vector.broadcast %645 : vector<2x8x1xf32> to vector<2x8x8xf32>
    %647 = arith.mulf %642, %646 : vector<2x8x8xf32>
    "tpu.trace_start"() <{level = 10 : i32, message = "bqk,bkd->bqd"}> : () -> ()
    %cst_209 = arith.constant dense<0.000000e+00> : vector<2x8x8xf32>
    %648 = tpu.matmul %647, %633, %cst_209 {dimension_numbers = #tpu.dot_dimension_numbers<[2], [1], [1], [2], [0, 0, 0, 1, 1, 2], [0], [0]>} : vector<2x8x8xf32>, vector<2x8x8xf32>, vector<2x8x8xf32> -> vector<2x8x8xf32>
    "tpu.trace_stop"() : () -> ()
    %649 = vector.shape_cast %648 : vector<2x8x8xf32> to vector<16x8xf32>
    %650 = vector.extract_strided_slice %586 {offsets = [8, 0], sizes = [8, 32], strides = [1, 1]} : vector<32x32xf32> to vector<8x32xf32>
    %cst_210 = arith.constant dense<0.000000e+00> : vector<16x32xf32>
    %651 = tpu.matmul %649, %650, %cst_210 {dimension_numbers = #tpu.dot_dimension_numbers<[1], [0], [0], [1], [0, 0, 1, 1], [], []>} : vector<16x8xf32>, vector<8x32xf32>, vector<16x32xf32> -> vector<16x32xf32>
    %652 = arith.addf %627, %651 : vector<16x32xf32>
    %653 = vector.extract_strided_slice %600 {offsets = [0, 16], sizes = [16, 8], strides = [1, 1]} : vector<16x32xf32> to vector<16x8xf32>
    %654 = vector.shape_cast %653 : vector<16x8xf32> to vector<2x8x8xf32>
    %655 = vector.extract_strided_slice %601 {offsets = [0, 16], sizes = [16, 8], strides = [1, 1]} : vector<16x32xf32> to vector<16x8xf32>
    %656 = vector.shape_cast %655 : vector<16x8xf32> to vector<2x8x8xf32>
    %657 = vector.extract_strided_slice %602 {offsets = [0, 16], sizes = [16, 8], strides = [1, 1]} : vector<16x32xf32> to vector<16x8xf32>
    %658 = vector.shape_cast %657 : vector<16x8xf32> to vector<2x8x8xf32>
    "tpu.trace_start"() <{level = 10 : i32, message = "bqd,bkd->bqk"}> : () -> ()
    %cst_211 = arith.constant dense<0.000000e+00> : vector<2x8x8xf32>
    %659 = tpu.matmul %654, %656, %cst_211 {dimension_numbers = #tpu.dot_dimension_numbers<[2], [2], [1], [1], [0, 0, 0, 1, 1, 1], [0], [0]>} : vector<2x8x8xf32>, vector<2x8x8xf32>, vector<2x8x8xf32> -> vector<2x8x8xf32>
    "tpu.trace_stop"() : () -> ()
    %660 = vector.extract_strided_slice %2 {offsets = [2, 0, 0], sizes = [1, 8, 8], strides = [1, 1, 1]} : vector<4x8x8xf32> to vector<1x8x8xf32>
    %661 = vector.broadcast %660 : vector<1x8x8xf32> to vector<2x8x8xf32>
    %662 = arith.addf %659, %661 : vector<2x8x8xf32>
    %cst_212 = arith.constant dense<0xFF800000> : vector<2x8xf32>
    %663 = vector.multi_reduction <maximumf>, %662, %cst_212 [2] : vector<2x8x8xf32> to vector<2x8xf32>
    %664 = vector.shape_cast %663 : vector<2x8xf32> to vector<2x8x1xf32>
    %665 = vector.broadcast %664 : vector<2x8x1xf32> to vector<2x8x8xf32>
    %666 = arith.subf %662, %665 : vector<2x8x8xf32>
    %667 = math.exp %666 : vector<2x8x8xf32>
    %cst_213 = arith.constant dense<0.000000e+00> : vector<2x8xf32>
    %668 = vector.multi_reduction <add>, %667, %cst_213 [2] : vector<2x8x8xf32> to vector<2x8xf32>
    %669 = vector.shape_cast %668 : vector<2x8xf32> to vector<2x8x1xf32>
    %670 = tpu.reciprocal %669 {approx = true} : vector<2x8x1xf32> -> vector<2x8x1xf32>
    %671 = vector.broadcast %670 : vector<2x8x1xf32> to vector<2x8x8xf32>
    %672 = arith.mulf %667, %671 : vector<2x8x8xf32>
    "tpu.trace_start"() <{level = 10 : i32, message = "bqk,bkd->bqd"}> : () -> ()
    %cst_214 = arith.constant dense<0.000000e+00> : vector<2x8x8xf32>
    %673 = tpu.matmul %672, %658, %cst_214 {dimension_numbers = #tpu.dot_dimension_numbers<[2], [1], [1], [2], [0, 0, 0, 1, 1, 2], [0], [0]>} : vector<2x8x8xf32>, vector<2x8x8xf32>, vector<2x8x8xf32> -> vector<2x8x8xf32>
    "tpu.trace_stop"() : () -> ()
    %674 = vector.shape_cast %673 : vector<2x8x8xf32> to vector<16x8xf32>
    %675 = vector.extract_strided_slice %586 {offsets = [16, 0], sizes = [8, 32], strides = [1, 1]} : vector<32x32xf32> to vector<8x32xf32>
    %cst_215 = arith.constant dense<0.000000e+00> : vector<16x32xf32>
    %676 = tpu.matmul %674, %675, %cst_215 {dimension_numbers = #tpu.dot_dimension_numbers<[1], [0], [0], [1], [0, 0, 1, 1], [], []>} : vector<16x8xf32>, vector<8x32xf32>, vector<16x32xf32> -> vector<16x32xf32>
    %677 = arith.addf %652, %676 : vector<16x32xf32>
    %678 = vector.extract_strided_slice %600 {offsets = [0, 24], sizes = [16, 8], strides = [1, 1]} : vector<16x32xf32> to vector<16x8xf32>
    %679 = vector.shape_cast %678 : vector<16x8xf32> to vector<2x8x8xf32>
    %680 = vector.extract_strided_slice %601 {offsets = [0, 24], sizes = [16, 8], strides = [1, 1]} : vector<16x32xf32> to vector<16x8xf32>
    %681 = vector.shape_cast %680 : vector<16x8xf32> to vector<2x8x8xf32>
    %682 = vector.extract_strided_slice %602 {offsets = [0, 24], sizes = [16, 8], strides = [1, 1]} : vector<16x32xf32> to vector<16x8xf32>
    %683 = vector.shape_cast %682 : vector<16x8xf32> to vector<2x8x8xf32>
    "tpu.trace_start"() <{level = 10 : i32, message = "bqd,bkd->bqk"}> : () -> ()
    %cst_216 = arith.constant dense<0.000000e+00> : vector<2x8x8xf32>
    %684 = tpu.matmul %679, %681, %cst_216 {dimension_numbers = #tpu.dot_dimension_numbers<[2], [2], [1], [1], [0, 0, 0, 1, 1, 1], [0], [0]>} : vector<2x8x8xf32>, vector<2x8x8xf32>, vector<2x8x8xf32> -> vector<2x8x8xf32>
    "tpu.trace_stop"() : () -> ()
    %685 = vector.extract_strided_slice %2 {offsets = [3, 0, 0], sizes = [1, 8, 8], strides = [1, 1, 1]} : vector<4x8x8xf32> to vector<1x8x8xf32>
    %686 = vector.broadcast %685 : vector<1x8x8xf32> to vector<2x8x8xf32>
    %687 = arith.addf %684, %686 : vector<2x8x8xf32>
    %cst_217 = arith.constant dense<0xFF800000> : vector<2x8xf32>
    %688 = vector.multi_reduction <maximumf>, %687, %cst_217 [2] : vector<2x8x8xf32> to vector<2x8xf32>
    %689 = vector.shape_cast %688 : vector<2x8xf32> to vector<2x8x1xf32>
    %690 = vector.broadcast %689 : vector<2x8x1xf32> to vector<2x8x8xf32>
    %691 = arith.subf %687, %690 : vector<2x8x8xf32>
    %692 = math.exp %691 : vector<2x8x8xf32>
    %cst_218 = arith.constant dense<0.000000e+00> : vector<2x8xf32>
    %693 = vector.multi_reduction <add>, %692, %cst_218 [2] : vector<2x8x8xf32> to vector<2x8xf32>
    %694 = vector.shape_cast %693 : vector<2x8xf32> to vector<2x8x1xf32>
    %695 = tpu.reciprocal %694 {approx = true} : vector<2x8x1xf32> -> vector<2x8x1xf32>
    %696 = vector.broadcast %695 : vector<2x8x1xf32> to vector<2x8x8xf32>
    %697 = arith.mulf %692, %696 : vector<2x8x8xf32>
    "tpu.trace_start"() <{level = 10 : i32, message = "bqk,bkd->bqd"}> : () -> ()
    %cst_219 = arith.constant dense<0.000000e+00> : vector<2x8x8xf32>
    %698 = tpu.matmul %697, %683, %cst_219 {dimension_numbers = #tpu.dot_dimension_numbers<[2], [1], [1], [2], [0, 0, 0, 1, 1, 2], [0], [0]>} : vector<2x8x8xf32>, vector<2x8x8xf32>, vector<2x8x8xf32> -> vector<2x8x8xf32>
    "tpu.trace_stop"() : () -> ()
    %699 = vector.shape_cast %698 : vector<2x8x8xf32> to vector<16x8xf32>
    %700 = vector.extract_strided_slice %586 {offsets = [24, 0], sizes = [8, 32], strides = [1, 1]} : vector<32x32xf32> to vector<8x32xf32>
    %cst_220 = arith.constant dense<0.000000e+00> : vector<16x32xf32>
    %701 = tpu.matmul %699, %700, %cst_220 {dimension_numbers = #tpu.dot_dimension_numbers<[1], [0], [0], [1], [0, 0, 1, 1], [], []>} : vector<16x8xf32>, vector<8x32xf32>, vector<16x32xf32> -> vector<16x32xf32>
    %702 = arith.addf %677, %701 : vector<16x32xf32>
    %c1_221 = arith.constant 1 : index
    %c0_222 = arith.constant 0 : index
    %703 = vector.load %arg15[%c1_221, %c0_222] : memref<2x32xf32, #tpu.memory_space<vmem>>, vector<1x32xf32>
    %c1_223 = arith.constant 1 : index
    %c0_224 = arith.constant 0 : index
    %c0_225 = arith.constant 0 : index
    %704 = vector.load %arg16[%c1_223, %c0_224, %c0_225] : memref<2x32x32xf32, #tpu.memory_space<vmem>>, vector<1x32x32xf32>
    %705 = vector.shape_cast %704 : vector<1x32x32xf32> to vector<32x32xf32>
    %c1_226 = arith.constant 1 : index
    %c0_227 = arith.constant 0 : index
    %c0_228 = arith.constant 0 : index
    %706 = vector.load %arg17[%c1_226, %c0_227, %c0_228] : memref<2x32x64xf32, #tpu.memory_space<vmem>>, vector<1x32x64xf32>
    %707 = vector.shape_cast %706 : vector<1x32x64xf32> to vector<32x64xf32>
    %c1_229 = arith.constant 1 : index
    %c0_230 = arith.constant 0 : index
    %c0_231 = arith.constant 0 : index
    %708 = vector.load %arg18[%c1_229, %c0_230, %c0_231] : memref<2x32x32xf32, #tpu.memory_space<vmem>>, vector<1x32x32xf32>
    %709 = vector.shape_cast %708 : vector<1x32x32xf32> to vector<32x32xf32>
    %710 = arith.mulf %702, %702 : vector<16x32xf32>
    %cst_232 = arith.constant dense<0.000000e+00> : vector<16xf32>
    %711 = vector.multi_reduction <add>, %710, %cst_232 [1] : vector<16x32xf32> to vector<16xf32>
    %712 = vector.shape_cast %711 : vector<16xf32> to vector<16x1xf32>
    %cst_233 = arith.constant 3.200000e+01 : f32
    %713 = vector.broadcast %cst_233 : f32 to vector<16x1xf32>
    %714 = arith.divf %712, %713 : vector<16x1xf32>
    %cst_234 = arith.constant 9.99999997E-7 : f32
    %715 = vector.broadcast %cst_234 : f32 to vector<16x1xf32>
    %716 = arith.addf %714, %715 : vector<16x1xf32>
    %717 = math.rsqrt %716 : vector<16x1xf32>
    %718 = vector.broadcast %717 : vector<16x1xf32> to vector<16x32xf32>
    %719 = arith.mulf %702, %718 : vector<16x32xf32>
    %720 = vector.broadcast %703 : vector<1x32xf32> to vector<16x32xf32>
    %721 = arith.mulf %719, %720 : vector<16x32xf32>
    %cst_235 = arith.constant dense<0.000000e+00> : vector<16x32xf32>
    %722 = tpu.matmul %721, %705, %cst_235 {dimension_numbers = #tpu.dot_dimension_numbers<[1], [0], [0], [1], [0, 0, 1, 1], [], []>} : vector<16x32xf32>, vector<32x32xf32>, vector<16x32xf32> -> vector<16x32xf32>
    %cst_236 = arith.constant dense<0.000000e+00> : vector<16x64xf32>
    %723 = tpu.matmul %318, %707, %cst_236 {dimension_numbers = #tpu.dot_dimension_numbers<[1], [0], [0], [1], [0, 0, 1, 1], [], []>} : vector<16x32xf32>, vector<32x64xf32>, vector<16x64xf32> -> vector<16x64xf32>
    %724 = vector.extract_strided_slice %723 {offsets = [0, 0], sizes = [16, 32], strides = [1, 1]} : vector<16x64xf32> to vector<16x32xf32>
    %725 = vector.extract_strided_slice %723 {offsets = [0, 32], sizes = [16, 32], strides = [1, 1]} : vector<16x64xf32> to vector<16x32xf32>
    %726 = vector.extract_strided_slice %722 {offsets = [0, 0], sizes = [16, 8], strides = [1, 1]} : vector<16x32xf32> to vector<16x8xf32>
    %727 = vector.shape_cast %726 : vector<16x8xf32> to vector<2x8x8xf32>
    %728 = vector.extract_strided_slice %724 {offsets = [0, 0], sizes = [16, 8], strides = [1, 1]} : vector<16x32xf32> to vector<16x8xf32>
    %729 = vector.shape_cast %728 : vector<16x8xf32> to vector<2x8x8xf32>
    %730 = vector.extract_strided_slice %725 {offsets = [0, 0], sizes = [16, 8], strides = [1, 1]} : vector<16x32xf32> to vector<16x8xf32>
    %731 = vector.shape_cast %730 : vector<16x8xf32> to vector<2x8x8xf32>
    "tpu.trace_start"() <{level = 10 : i32, message = "bqd,bkd->bqk"}> : () -> ()
    %cst_237 = arith.constant dense<0.000000e+00> : vector<2x8x8xf32>
    %732 = tpu.matmul %727, %729, %cst_237 {dimension_numbers = #tpu.dot_dimension_numbers<[2], [2], [1], [1], [0, 0, 0, 1, 1, 1], [0], [0]>} : vector<2x8x8xf32>, vector<2x8x8xf32>, vector<2x8x8xf32> -> vector<2x8x8xf32>
    "tpu.trace_stop"() : () -> ()
    %733 = vector.broadcast %0 : vector<2x1x8xf32> to vector<2x8x8xf32>
    %734 = arith.addf %732, %733 : vector<2x8x8xf32>
    %cst_238 = arith.constant dense<0xFF800000> : vector<2x8xf32>
    %735 = vector.multi_reduction <maximumf>, %734, %cst_238 [2] : vector<2x8x8xf32> to vector<2x8xf32>
    %736 = vector.shape_cast %735 : vector<2x8xf32> to vector<2x8x1xf32>
    %737 = vector.broadcast %736 : vector<2x8x1xf32> to vector<2x8x8xf32>
    %738 = arith.subf %734, %737 : vector<2x8x8xf32>
    %739 = math.exp %738 : vector<2x8x8xf32>
    %cst_239 = arith.constant dense<0.000000e+00> : vector<2x8xf32>
    %740 = vector.multi_reduction <add>, %739, %cst_239 [2] : vector<2x8x8xf32> to vector<2x8xf32>
    %741 = vector.shape_cast %740 : vector<2x8xf32> to vector<2x8x1xf32>
    %742 = tpu.reciprocal %741 {approx = true} : vector<2x8x1xf32> -> vector<2x8x1xf32>
    %743 = vector.broadcast %742 : vector<2x8x1xf32> to vector<2x8x8xf32>
    %744 = arith.mulf %739, %743 : vector<2x8x8xf32>
    "tpu.trace_start"() <{level = 10 : i32, message = "bqk,bkd->bqd"}> : () -> ()
    %cst_240 = arith.constant dense<0.000000e+00> : vector<2x8x8xf32>
    %745 = tpu.matmul %744, %731, %cst_240 {dimension_numbers = #tpu.dot_dimension_numbers<[2], [1], [1], [2], [0, 0, 0, 1, 1, 2], [0], [0]>} : vector<2x8x8xf32>, vector<2x8x8xf32>, vector<2x8x8xf32> -> vector<2x8x8xf32>
    "tpu.trace_stop"() : () -> ()
    %746 = vector.shape_cast %745 : vector<2x8x8xf32> to vector<16x8xf32>
    %747 = vector.extract_strided_slice %709 {offsets = [0, 0], sizes = [8, 32], strides = [1, 1]} : vector<32x32xf32> to vector<8x32xf32>
    %cst_241 = arith.constant dense<0.000000e+00> : vector<16x32xf32>
    %748 = tpu.matmul %746, %747, %cst_241 {dimension_numbers = #tpu.dot_dimension_numbers<[1], [0], [0], [1], [0, 0, 1, 1], [], []>} : vector<16x8xf32>, vector<8x32xf32>, vector<16x32xf32> -> vector<16x32xf32>
    %749 = arith.addf %702, %748 : vector<16x32xf32>
    %750 = vector.extract_strided_slice %722 {offsets = [0, 8], sizes = [16, 8], strides = [1, 1]} : vector<16x32xf32> to vector<16x8xf32>
    %751 = vector.shape_cast %750 : vector<16x8xf32> to vector<2x8x8xf32>
    %752 = vector.extract_strided_slice %724 {offsets = [0, 8], sizes = [16, 8], strides = [1, 1]} : vector<16x32xf32> to vector<16x8xf32>
    %753 = vector.shape_cast %752 : vector<16x8xf32> to vector<2x8x8xf32>
    %754 = vector.extract_strided_slice %725 {offsets = [0, 8], sizes = [16, 8], strides = [1, 1]} : vector<16x32xf32> to vector<16x8xf32>
    %755 = vector.shape_cast %754 : vector<16x8xf32> to vector<2x8x8xf32>
    "tpu.trace_start"() <{level = 10 : i32, message = "bqd,bkd->bqk"}> : () -> ()
    %cst_242 = arith.constant dense<0.000000e+00> : vector<2x8x8xf32>
    %756 = tpu.matmul %751, %753, %cst_242 {dimension_numbers = #tpu.dot_dimension_numbers<[2], [2], [1], [1], [0, 0, 0, 1, 1, 1], [0], [0]>} : vector<2x8x8xf32>, vector<2x8x8xf32>, vector<2x8x8xf32> -> vector<2x8x8xf32>
    "tpu.trace_stop"() : () -> ()
    %757 = vector.broadcast %0 : vector<2x1x8xf32> to vector<2x8x8xf32>
    %758 = arith.addf %756, %757 : vector<2x8x8xf32>
    %cst_243 = arith.constant dense<0xFF800000> : vector<2x8xf32>
    %759 = vector.multi_reduction <maximumf>, %758, %cst_243 [2] : vector<2x8x8xf32> to vector<2x8xf32>
    %760 = vector.shape_cast %759 : vector<2x8xf32> to vector<2x8x1xf32>
    %761 = vector.broadcast %760 : vector<2x8x1xf32> to vector<2x8x8xf32>
    %762 = arith.subf %758, %761 : vector<2x8x8xf32>
    %763 = math.exp %762 : vector<2x8x8xf32>
    %cst_244 = arith.constant dense<0.000000e+00> : vector<2x8xf32>
    %764 = vector.multi_reduction <add>, %763, %cst_244 [2] : vector<2x8x8xf32> to vector<2x8xf32>
    %765 = vector.shape_cast %764 : vector<2x8xf32> to vector<2x8x1xf32>
    %766 = tpu.reciprocal %765 {approx = true} : vector<2x8x1xf32> -> vector<2x8x1xf32>
    %767 = vector.broadcast %766 : vector<2x8x1xf32> to vector<2x8x8xf32>
    %768 = arith.mulf %763, %767 : vector<2x8x8xf32>
    "tpu.trace_start"() <{level = 10 : i32, message = "bqk,bkd->bqd"}> : () -> ()
    %cst_245 = arith.constant dense<0.000000e+00> : vector<2x8x8xf32>
    %769 = tpu.matmul %768, %755, %cst_245 {dimension_numbers = #tpu.dot_dimension_numbers<[2], [1], [1], [2], [0, 0, 0, 1, 1, 2], [0], [0]>} : vector<2x8x8xf32>, vector<2x8x8xf32>, vector<2x8x8xf32> -> vector<2x8x8xf32>
    "tpu.trace_stop"() : () -> ()
    %770 = vector.shape_cast %769 : vector<2x8x8xf32> to vector<16x8xf32>
    %771 = vector.extract_strided_slice %709 {offsets = [8, 0], sizes = [8, 32], strides = [1, 1]} : vector<32x32xf32> to vector<8x32xf32>
    %cst_246 = arith.constant dense<0.000000e+00> : vector<16x32xf32>
    %772 = tpu.matmul %770, %771, %cst_246 {dimension_numbers = #tpu.dot_dimension_numbers<[1], [0], [0], [1], [0, 0, 1, 1], [], []>} : vector<16x8xf32>, vector<8x32xf32>, vector<16x32xf32> -> vector<16x32xf32>
    %773 = arith.addf %749, %772 : vector<16x32xf32>
    %774 = vector.extract_strided_slice %722 {offsets = [0, 16], sizes = [16, 8], strides = [1, 1]} : vector<16x32xf32> to vector<16x8xf32>
    %775 = vector.shape_cast %774 : vector<16x8xf32> to vector<2x8x8xf32>
    %776 = vector.extract_strided_slice %724 {offsets = [0, 16], sizes = [16, 8], strides = [1, 1]} : vector<16x32xf32> to vector<16x8xf32>
    %777 = vector.shape_cast %776 : vector<16x8xf32> to vector<2x8x8xf32>
    %778 = vector.extract_strided_slice %725 {offsets = [0, 16], sizes = [16, 8], strides = [1, 1]} : vector<16x32xf32> to vector<16x8xf32>
    %779 = vector.shape_cast %778 : vector<16x8xf32> to vector<2x8x8xf32>
    "tpu.trace_start"() <{level = 10 : i32, message = "bqd,bkd->bqk"}> : () -> ()
    %cst_247 = arith.constant dense<0.000000e+00> : vector<2x8x8xf32>
    %780 = tpu.matmul %775, %777, %cst_247 {dimension_numbers = #tpu.dot_dimension_numbers<[2], [2], [1], [1], [0, 0, 0, 1, 1, 1], [0], [0]>} : vector<2x8x8xf32>, vector<2x8x8xf32>, vector<2x8x8xf32> -> vector<2x8x8xf32>
    "tpu.trace_stop"() : () -> ()
    %781 = vector.broadcast %0 : vector<2x1x8xf32> to vector<2x8x8xf32>
    %782 = arith.addf %780, %781 : vector<2x8x8xf32>
    %cst_248 = arith.constant dense<0xFF800000> : vector<2x8xf32>
    %783 = vector.multi_reduction <maximumf>, %782, %cst_248 [2] : vector<2x8x8xf32> to vector<2x8xf32>
    %784 = vector.shape_cast %783 : vector<2x8xf32> to vector<2x8x1xf32>
    %785 = vector.broadcast %784 : vector<2x8x1xf32> to vector<2x8x8xf32>
    %786 = arith.subf %782, %785 : vector<2x8x8xf32>
    %787 = math.exp %786 : vector<2x8x8xf32>
    %cst_249 = arith.constant dense<0.000000e+00> : vector<2x8xf32>
    %788 = vector.multi_reduction <add>, %787, %cst_249 [2] : vector<2x8x8xf32> to vector<2x8xf32>
    %789 = vector.shape_cast %788 : vector<2x8xf32> to vector<2x8x1xf32>
    %790 = tpu.reciprocal %789 {approx = true} : vector<2x8x1xf32> -> vector<2x8x1xf32>
    %791 = vector.broadcast %790 : vector<2x8x1xf32> to vector<2x8x8xf32>
    %792 = arith.mulf %787, %791 : vector<2x8x8xf32>
    "tpu.trace_start"() <{level = 10 : i32, message = "bqk,bkd->bqd"}> : () -> ()
    %cst_250 = arith.constant dense<0.000000e+00> : vector<2x8x8xf32>
    %793 = tpu.matmul %792, %779, %cst_250 {dimension_numbers = #tpu.dot_dimension_numbers<[2], [1], [1], [2], [0, 0, 0, 1, 1, 2], [0], [0]>} : vector<2x8x8xf32>, vector<2x8x8xf32>, vector<2x8x8xf32> -> vector<2x8x8xf32>
    "tpu.trace_stop"() : () -> ()
    %794 = vector.shape_cast %793 : vector<2x8x8xf32> to vector<16x8xf32>
    %795 = vector.extract_strided_slice %709 {offsets = [16, 0], sizes = [8, 32], strides = [1, 1]} : vector<32x32xf32> to vector<8x32xf32>
    %cst_251 = arith.constant dense<0.000000e+00> : vector<16x32xf32>
    %796 = tpu.matmul %794, %795, %cst_251 {dimension_numbers = #tpu.dot_dimension_numbers<[1], [0], [0], [1], [0, 0, 1, 1], [], []>} : vector<16x8xf32>, vector<8x32xf32>, vector<16x32xf32> -> vector<16x32xf32>
    %797 = arith.addf %773, %796 : vector<16x32xf32>
    %798 = vector.extract_strided_slice %722 {offsets = [0, 24], sizes = [16, 8], strides = [1, 1]} : vector<16x32xf32> to vector<16x8xf32>
    %799 = vector.shape_cast %798 : vector<16x8xf32> to vector<2x8x8xf32>
    %800 = vector.extract_strided_slice %724 {offsets = [0, 24], sizes = [16, 8], strides = [1, 1]} : vector<16x32xf32> to vector<16x8xf32>
    %801 = vector.shape_cast %800 : vector<16x8xf32> to vector<2x8x8xf32>
    %802 = vector.extract_strided_slice %725 {offsets = [0, 24], sizes = [16, 8], strides = [1, 1]} : vector<16x32xf32> to vector<16x8xf32>
    %803 = vector.shape_cast %802 : vector<16x8xf32> to vector<2x8x8xf32>
    "tpu.trace_start"() <{level = 10 : i32, message = "bqd,bkd->bqk"}> : () -> ()
    %cst_252 = arith.constant dense<0.000000e+00> : vector<2x8x8xf32>
    %804 = tpu.matmul %799, %801, %cst_252 {dimension_numbers = #tpu.dot_dimension_numbers<[2], [2], [1], [1], [0, 0, 0, 1, 1, 1], [0], [0]>} : vector<2x8x8xf32>, vector<2x8x8xf32>, vector<2x8x8xf32> -> vector<2x8x8xf32>
    "tpu.trace_stop"() : () -> ()
    %805 = vector.broadcast %0 : vector<2x1x8xf32> to vector<2x8x8xf32>
    %806 = arith.addf %804, %805 : vector<2x8x8xf32>
    %cst_253 = arith.constant dense<0xFF800000> : vector<2x8xf32>
    %807 = vector.multi_reduction <maximumf>, %806, %cst_253 [2] : vector<2x8x8xf32> to vector<2x8xf32>
    %808 = vector.shape_cast %807 : vector<2x8xf32> to vector<2x8x1xf32>
    %809 = vector.broadcast %808 : vector<2x8x1xf32> to vector<2x8x8xf32>
    %810 = arith.subf %806, %809 : vector<2x8x8xf32>
    %811 = math.exp %810 : vector<2x8x8xf32>
    %cst_254 = arith.constant dense<0.000000e+00> : vector<2x8xf32>
    %812 = vector.multi_reduction <add>, %811, %cst_254 [2] : vector<2x8x8xf32> to vector<2x8xf32>
    %813 = vector.shape_cast %812 : vector<2x8xf32> to vector<2x8x1xf32>
    %814 = tpu.reciprocal %813 {approx = true} : vector<2x8x1xf32> -> vector<2x8x1xf32>
    %815 = vector.broadcast %814 : vector<2x8x1xf32> to vector<2x8x8xf32>
    %816 = arith.mulf %811, %815 : vector<2x8x8xf32>
    "tpu.trace_start"() <{level = 10 : i32, message = "bqk,bkd->bqd"}> : () -> ()
    %cst_255 = arith.constant dense<0.000000e+00> : vector<2x8x8xf32>
    %817 = tpu.matmul %816, %803, %cst_255 {dimension_numbers = #tpu.dot_dimension_numbers<[2], [1], [1], [2], [0, 0, 0, 1, 1, 2], [0], [0]>} : vector<2x8x8xf32>, vector<2x8x8xf32>, vector<2x8x8xf32> -> vector<2x8x8xf32>
    "tpu.trace_stop"() : () -> ()
    %818 = vector.shape_cast %817 : vector<2x8x8xf32> to vector<16x8xf32>
    %819 = vector.extract_strided_slice %709 {offsets = [24, 0], sizes = [8, 32], strides = [1, 1]} : vector<32x32xf32> to vector<8x32xf32>
    %cst_256 = arith.constant dense<0.000000e+00> : vector<16x32xf32>
    %820 = tpu.matmul %818, %819, %cst_256 {dimension_numbers = #tpu.dot_dimension_numbers<[1], [0], [0], [1], [0, 0, 1, 1], [], []>} : vector<16x8xf32>, vector<8x32xf32>, vector<16x32xf32> -> vector<16x32xf32>
    %821 = arith.addf %797, %820 : vector<16x32xf32>
    %c1_257 = arith.constant 1 : index
    %c0_258 = arith.constant 0 : index
    %822 = vector.load %arg19[%c1_257, %c0_258] : memref<2x32xf32, #tpu.memory_space<vmem>>, vector<1x32xf32>
    %c1_259 = arith.constant 1 : index
    %c0_260 = arith.constant 0 : index
    %c0_261 = arith.constant 0 : index
    %823 = vector.load %arg20[%c1_259, %c0_260, %c0_261] : memref<2x32x64xf32, #tpu.memory_space<vmem>>, vector<1x32x64xf32>
    %824 = vector.shape_cast %823 : vector<1x32x64xf32> to vector<32x64xf32>
    %c1_262 = arith.constant 1 : index
    %c0_263 = arith.constant 0 : index
    %c0_264 = arith.constant 0 : index
    %825 = vector.load %arg21[%c1_262, %c0_263, %c0_264] : memref<2x64x32xf32, #tpu.memory_space<vmem>>, vector<1x64x32xf32>
    %826 = vector.shape_cast %825 : vector<1x64x32xf32> to vector<64x32xf32>
    %827 = arith.mulf %821, %821 : vector<16x32xf32>
    %cst_265 = arith.constant dense<0.000000e+00> : vector<16xf32>
    %828 = vector.multi_reduction <add>, %827, %cst_265 [1] : vector<16x32xf32> to vector<16xf32>
    %829 = vector.shape_cast %828 : vector<16xf32> to vector<16x1xf32>
    %cst_266 = arith.constant 3.200000e+01 : f32
    %830 = vector.broadcast %cst_266 : f32 to vector<16x1xf32>
    %831 = arith.divf %829, %830 : vector<16x1xf32>
    %cst_267 = arith.constant 9.99999997E-7 : f32
    %832 = vector.broadcast %cst_267 : f32 to vector<16x1xf32>
    %833 = arith.addf %831, %832 : vector<16x1xf32>
    %834 = math.rsqrt %833 : vector<16x1xf32>
    %835 = vector.broadcast %834 : vector<16x1xf32> to vector<16x32xf32>
    %836 = arith.mulf %821, %835 : vector<16x32xf32>
    %837 = vector.broadcast %822 : vector<1x32xf32> to vector<16x32xf32>
    %838 = arith.mulf %836, %837 : vector<16x32xf32>
    %cst_268 = arith.constant dense<0.000000e+00> : vector<16x64xf32>
    %839 = tpu.matmul %838, %824, %cst_268 {dimension_numbers = #tpu.dot_dimension_numbers<[1], [0], [0], [1], [0, 0, 1, 1], [], []>} : vector<16x32xf32>, vector<32x64xf32>, vector<16x64xf32> -> vector<16x64xf32>
    %cst_269 = arith.constant 0.000000e+00 : f32
    %840 = vector.broadcast %cst_269 : f32 to vector<16x64xf32>
    %841 = arith.maximumf %839, %840 : vector<16x64xf32>
    %cst_270 = arith.constant dense<0.000000e+00> : vector<16x32xf32>
    %842 = tpu.matmul %841, %826, %cst_270 {dimension_numbers = #tpu.dot_dimension_numbers<[1], [0], [0], [1], [0, 0, 1, 1], [], []>} : vector<16x64xf32>, vector<64x32xf32>, vector<16x32xf32> -> vector<16x32xf32>
    %843 = arith.addf %821, %842 : vector<16x32xf32>
    %c0_271 = arith.constant 0 : index
    %c0_272 = arith.constant 0 : index
    %844 = vector.load %arg22[%c0_271, %c0_272] : memref<1x32xf32, #tpu.memory_space<vmem>>, vector<1x32xf32>
    %845 = arith.mulf %843, %843 : vector<16x32xf32>
    %cst_273 = arith.constant dense<0.000000e+00> : vector<16xf32>
    %846 = vector.multi_reduction <add>, %845, %cst_273 [1] : vector<16x32xf32> to vector<16xf32>
    %847 = vector.shape_cast %846 : vector<16xf32> to vector<16x1xf32>
    %cst_274 = arith.constant 3.200000e+01 : f32
    %848 = vector.broadcast %cst_274 : f32 to vector<16x1xf32>
    %849 = arith.divf %847, %848 : vector<16x1xf32>
    %cst_275 = arith.constant 9.99999997E-7 : f32
    %850 = vector.broadcast %cst_275 : f32 to vector<16x1xf32>
    %851 = arith.addf %849, %850 : vector<16x1xf32>
    %852 = math.rsqrt %851 : vector<16x1xf32>
    %853 = vector.broadcast %852 : vector<16x1xf32> to vector<16x32xf32>
    %854 = arith.mulf %843, %853 : vector<16x32xf32>
    %855 = vector.broadcast %844 : vector<1x32xf32> to vector<16x32xf32>
    %856 = arith.mulf %854, %855 : vector<16x32xf32>
    %857 = vector.extract_strided_slice %856 {offsets = [0, 0], sizes = [1, 32], strides = [1, 1]} : vector<16x32xf32> to vector<1x32xf32>
    %858 = vector.extract_strided_slice %856 {offsets = [8, 0], sizes = [1, 32], strides = [1, 1]} : vector<16x32xf32> to vector<1x32xf32>
    %859 = tpu.concatenate %857, %858 in 0 : vector<1x32xf32>, vector<1x32xf32> -> vector<2x32xf32>
    %c0_276 = arith.constant 0 : index
    %c0_277 = arith.constant 0 : index
    %860 = vector.load %arg23[%c0_276, %c0_277] : memref<2x32xf32, #tpu.memory_space<vmem>>, vector<2x32xf32>
    tpu.vector_store %arg23[%c0_276, %c0_277], %859 {strides = array<i32>} : memref<2x32xf32, #tpu.memory_space<vmem>>, vector<2x32xf32>,
    return
  }
}

</mosaic_0001>

<bundles_post_ra>
// kernel: t5_model_encoder_forward.1
= control target key start
LH: loop header
LB: loop body
LE: loop exit
PB: predicated region body
PF: predicated region fallthrough
CT: control target
= control target key end

     0   :  { %s7131_s0 = inlined_call_operand.vmem [shape: f32[16,32], index: 0, kind: input, shape index: {}]   ;;  %s7132_s1 = inlined_call_operand.vmem [shape: f32[16,32], index: 1, kind: input, shape index: {}]   ;;  %s7133_s2 = inlined_call_operand.vmem [shape: f32[2,1,8], index: 2, kind: input, shape index: {}]   ;;  %s7134_s3 = inlined_call_operand.vmem [shape: f32[4,8,8], index: 3, kind: input, shape index: {}]   ;;  %s7135_s4 = inlined_call_operand.vmem [shape: f32[4,8,8], index: 4, kind: input, shape index: {}]   ;;  %s7136_s5 = inlined_call_operand.vmem [shape: f32[2,32], index: 5, kind: input, shape index: {}]   ;;  %s7137_s6 = inlined_call_operand.vmem [shape: f32[2,32,96], index: 6, kind: input, shape index: {}]   ;;  %s7138_s7 = inlined_call_operand.vmem [shape: f32[2,32,32], index: 7, kind: input, shape index: {}]   ;;  %s7139_s8 = inlined_call_operand.vmem [shape: f32[2,32], index: 8, kind: input, shape index: {}]   ;;  %s7140_s9 = inlined_call_operand.vmem [shape: f32[2,32,64], index: 9, kind: input, shape index: {}]   ;;  %s7141_s10 = inlined_call_operand.vmem [shape: f32[2,64,32], index: 10, kind: input, shape index: {}]   ;;  %s7142_s11 = inlined_call_operand.vmem [shape: f32[1,32], index: 11, kind: input, shape index: {}]   ;;  %s7143_s12 = inlined_call_operand.vmem [shape: f32[2,32], index: 12, kind: input, shape index: {}]   ;;  %s7144_s13 = inlined_call_operand.vmem [shape: f32[2,32,96], index: 13, kind: input, shape index: {}]   ;;  %s7145_s14 = inlined_call_operand.vmem [shape: f32[2,32,32], index: 14, kind: input, shape index: {}]   ;;  %s7146_s15 = inlined_call_operand.vmem [shape: f32[2,32], index: 15, kind: input, shape index: {}]   ;;  %s7147_s16 = inlined_call_operand.vmem [shape: f32[2,32,32], index: 16, kind: input, shape index: {}]   ;;  %s7148_s17 = inlined_call_operand.vmem [shape: f32[2,32,64], index: 17, kind: input, shape index: {}]   ;;  %s7149_s18 = inlined_call_operand.vmem [shape: f32[2,32,32], index: 18, kind: input, shape index: {}]   ;;  %s7150_s19 = inlined_call_operand.vmem [shape: f32[2,32], index: 19, kind: input, shape index: {}]   ;;  %s7151_s20 = inlined_call_operand.vmem [shape: f32[2,32,64], index: 20, kind: input, shape index: {}]   ;;  %s7152_s21 = inlined_call_operand.vmem [shape: f32[2,64,32], index: 21, kind: input, shape index: {}]   ;;  %s7153_s22 = inlined_call_operand.vmem [shape: f32[1,32], index: 22, kind: input, shape index: {}]   ;;  %s7154_s23 = inlined_call_operand.hbm [shape: f32[2,32], index: 23, kind: output, shape index: {}]  }
   0x1   :  { %7190 = sst [smem:[#allocation5_spill]] %s7131_s0 }
   0x2   :  { %7191 = sst [smem:[#allocation6_spill]] %s7132_s1 }
   0x3   :  { %7192 = sst [smem:[#allocation7_spill]] %s7133_s2 }
   0x4   :  { %7193 = sst [smem:[#allocation8_spill]] %s7134_s3 }
   0x5   :  { %7194 = sst [smem:[#allocation9_spill]] %s7135_s4 }
   0x6   :  { %7195 = sst [smem:[#allocation10_spill]] %s7136_s5 }
   0x7   :  { %7196 = sst [smem:[#allocation11_spill]] %s7137_s6 }
   0x8   :  { %7197 = sst [smem:[#allocation12_spill]] %s7138_s7 }
   0x9   :  { %7198 = sst [smem:[#allocation13_spill]] %s7143_s12 }
   0xa   :  { %7199 = sst [smem:[#allocation14_spill]] %s7144_s13 }
   0xb   :  { %7200 = sst [smem:[#allocation15_spill]] %s7150_s19 }
   0xc   :  { %7201 = sst [smem:[#allocation16_spill]] %s7152_s21 }
   0xd   :  { %7202 = sst [smem:[#allocation17_spill]] %s7153_s22 }
   0xe   :  { %7203 = sst [smem:[#allocation18_spill]] %s7154_s23 }
   0xf   :  { %s7204_s24 = sld [smem:[#allocation5_spill]]  ;;  %vm98_vm0 = vcmask 261120  }
  0x15   :  { %v5758_v0 = vld [vmem:[%s7204_s24] sm:$0xff]  ;;  %v5763_v1 = vld [vmem:[%s7204_s24 + $0x8] sm:$0xff] }
  0x16   :  { %v96_v2 = vmul.f32 %v5758_v0, %v5758_v0  ;;  %v97_v4 = vmul.f32 %v5763_v1, %v5763_v1 }
  0x18   :  { %v99_v3 = vsel %vm98_vm0, %v96_v2, 0.0 }
  0x19   :  { %100 = vadd.xlane.f32.xlu0 %v99_v3 }
  0x1a   :  { %28 = vsyncpa [#allocation3], 0  ;;  %v102_v5 = vsel %vm98_vm0, %v97_v4, 0.0  ;;  %v5622_v6 = vmov 32.0   ;;  %s7205_s2 = sld [smem:[#allocation11_spill]]  ;;  %s7183_s24 = smov 96  }
  0x1b   :  { %5346 = vrcp.f32 %v5622_v6  ;;  %s7206_s30 = sld [smem:[#allocation10_spill]]  ;;  %vm181_vm8 = vcmask 64512   ;;  %s7177_s29 = smov 64   ;;  %vm908_vm15 = vcmask 523264  }
  0x1c   :  { %s7207_s1 = sld [smem:[#allocation7_spill]]  ;;  %s7181_s3 = smov 120  }
  0x1d   :  { %s7208_s27 = sld [smem:[#allocation8_spill]]  ;;  %s7165_s0 = smov 112  }
  0x1e   :  { %s7179_s4 = smov 88   ;;  %s7169_s25 = smov 80  }
  0x1f   :  { %s7209_s6 = sld [smem:[#allocation12_spill]]  ;;  %s7173_s5 = smov 48  }
  0x20   :  { %v91_v10 = vld [vmem:[%s7205_s2 + $0x18] sm:$0xff]  ;;  %v90_v11 = vld [vmem:[%s7205_s2 + $0x10] sm:$0xff]  ;;  %v89_v13 = vld [vmem:[%s7205_s2 + $0x8] sm:$0xff]  ;;  %s7175_s28 = smov 56   ;;  %s7163_s26 = smov 72  }
  0x21   :  { %103 = vadd.xlane.f32.xlu0 %v102_v5  ;;  %v5347_v7 = vpop.eup %5346  ;;  %159 = vmatpush.msra.mxu0 %v91_v10  ;;  %v88_v14 = vld [vmem:[%s7205_s2] sm:$0xff]  ;;  %s7167_s7 = smov 104   ;;  %s7219_s19 = smov 96  }
  0x22   :  { %v106_v8 = vmul.f32 32.0, %v5347_v7  ;;  %vm110_vm1 = vweird.f32 %v5347_v7  ;;  %v5332_v31 = vld [vmem:[%s7206_s30] ss:$0 sm:$0xff]  ;;  %v5822_v49 = vld [vmem:[%s7207_s1 + $0x1] ss:$0 sm:$0xff]  ;;  %s7220_s22 = smov 120  }
  0x23   :  { %160 = vmatpush.msra.mxu0 %v90_v11  ;;  %v5811_v46 = vld [vmem:[%s7207_s1] ss:$0 sm:$0xff]  ;;  %s7222_s21 = sld [smem:[#allocation9_spill]] }
  0x24   :  { %v107_v9 = vsub.f32 1.0, %v106_v8  ;;  %v77_v47 = vld [vmem:[%s7208_s27] sm:$0xff]  ;;  %s7223_s23 = sld [smem:[#allocation16_spill]] }
  0x25   :  { %161 = vmatpush.msra.mxu0 %v89_v13  ;;  %v5817_v48 = vadd.f32 %v5811_v46, %v77_v47  ;;  %v5826_v52 = vadd.f32 %v5822_v49, %v77_v47  ;;  %v92_v10 = vld [vmem:[%s7209_s6] sm:$0xff] }
  0x26   :  { %v108_v12 = vmul.f32 %v5347_v7, %v107_v9 }
  0x27   :  { %162 = vmatpush.msra.mxu0 %v88_v14 }
  0x28   :  { %v109_v15 = vadd.f32 %v5347_v7, %v108_v12 }
  0x2a   :  { %v5783_v16 = vsel %vm110_vm1, %v5347_v7, %v109_v15 }
  0x8c   :  { %v101_v17 = vpop.xlane.xlu0 %100 }
  0x8d   :  { %v112_v18 = vmul.f32 %v5783_v16, %v101_v17 }
  0x8f   :  { %v114_v19 = vadd.f32 1e-06, %v112_v18 }
  0x91   :  { %5348 = vrsqrt.f32 %v114_v19  ;;  %vm122_vm3 = vweird.f32 %v114_v19 }
  0x94   :  { %v104_v20 = vpop.xlane.xlu0 %103 }
  0x95   :  { %v113_v21 = vmul.f32 %v5783_v16, %v104_v20 }
  0x97   :  { %v5349_v22 = vpop.eup %5348  ;;  %v115_v23 = vadd.f32 1e-06, %v113_v21 }
  0x98   :  { %v117_v24 = vmul.f32 %v5349_v22, %v114_v19  ;;  %vm123_vm2 = vweird.f32 %v5349_v22 }
  0x99   :  { %5350 = vrsqrt.f32 %v115_v23  ;;  %vm124_vm4 = vmor %vm122_vm3, %vm123_vm2  ;;  %vm132_vm6 = vweird.f32 %v115_v23 }
  0x9a   :  { %v118_v25 = vmul.f32 %v5349_v22, %v117_v24 }
  0x9c   :  { %v119_v26 = vmul.f32 0.5, %v118_v25 }
  0x9e   :  { %v120_v27 = vsub.f32 1.5, %v119_v26 }
  0x9f   :  { %v5351_v28 = vpop.eup %5350 }
  0xa0   :  { %v127_v29 = vmul.f32 %v5351_v28, %v115_v23  ;;  %v121_v30 = vmul.f32 %v5349_v22, %v120_v27  ;;  %vm133_vm5 = vweird.f32 %v5351_v28  ;;  %v78_v23 = vld [vmem:[%s7208_s27 + $0x8] sm:$0xff] }
  0xa1   :  { %vm134_vm7 = vmor %vm132_vm6, %vm133_vm5  ;;  %v5864_v25 = vadd.f32 %v5811_v46, %v78_v23 }
  0xa2   :  { %v128_v32 = vmul.f32 %v5351_v28, %v127_v29  ;;  %v125_v33 = vsel %vm124_vm4, %v5349_v22, %v121_v30  ;;  %v5870_v30 = vadd.f32 %v5822_v49, %v78_v23 }
  0xa3   :  { %v136_v34 = vmul.f32 %v125_v33, %v5758_v0 }
  0xa4   :  { %v129_v35 = vmul.f32 0.5, %v128_v32 }
  0xa5   :  { %v139_v36 = vmul.f32 %v5332_v31, %v136_v34 }
  0xa6   :  { %v130_v37 = vsub.f32 1.5, %v129_v35 }
  0xa7   :  { %5033 = vmatmul.msk.f32.vlgmr.msra.gmra.mxu0 %vm98_vm0, %v139_v36 }
  0xa8   :  { %v131_v38 = vmul.f32 %v5351_v28, %v130_v37 }
  0xaa   :  { %v135_v39 = vsel %vm134_vm7, %v5351_v28, %v131_v38 }
  0xab   :  { %v137_v40 = vmul.f32 %v135_v39, %v5763_v1  ;;  %v5885_v39 = vld [vmem:[%s7208_s27 + $0x10] sm:$0xff] }
  0xad   :  { %v140_v41 = vmul.f32 %v5332_v31, %v137_v40  ;;  %v5889_v40 = vadd.f32 %v5811_v46, %v5885_v39 }
  0xaf   :  { %5034 = vmatmul.msk.f32.gmra.mxu0 %vm98_vm0, %v140_v41 }
 0x124   :  { %v5794_v42 = vpop.f32.mrf.mxu0 }
 0x12c   :  { %v5796_v43 = vpop.f32.mrf.mxu0 }
 0x12d   :  { %207 = vrot.lane.b32.xlu1 %v5796_v43, %s7183_s24  ;;  %v5322_v57 = vpack.i.bf16 %v5796_v43, %v5794_v42 }
 0x135   :  { %179 = vrot.lane.b32.xlu1 %v5794_v42, %s7183_s24 }
 0x19f   :  { %v208_v44 = vpop.permute.xlu1 %207 }
 0x1a0   :  { %5037 = vmatpush.xpose.msk.msra.mxu2 %vm181_vm8, %v208_v44 }
 0x1a3   :  { %5038 = vmatmul.msk.f32.vlgmr.msra.gmra.mxu2 %vm181_vm8, %v5796_v43 }
 0x1a7   :  { %v180_v45 = vpop.permute.xlu1 %179 }
 0x1a8   :  { %5035 = vmatpush.xpose.msk.msra.mxu1 %vm181_vm8, %v180_v45 }
 0x1ab   :  { %5036 = vmatmul.msk.f32.vlgmr.msra.gmra.mxu1 %vm181_vm8, %v5794_v42 }
 0x226   :  { %v230_v54 = vpop.f32.mrf.mxu2 }
 0x227   :  { %v231_v55 = vadd.f32 %v230_v54, %v5826_v52 }
 0x228   :  { %v203_v50 = vpop.f32.mrf.mxu1 }
 0x229   :  { %v204_v51 = vadd.f32 %v203_v50, %v5817_v48  ;;  %v236_v56 = vsel %vm181_vm8, %v231_v55, -inf }
 0x22b   :  { %v233_v53 = vsel %vm181_vm8, %v204_v51, -inf }
 0x22c   :  { %234 = vmax.xlane.f32.xlu2 %v233_v53 }
 0x234   :  { %237 = vmax.xlane.f32.xlu2 %v236_v56 }
 0x24c   :  { %5323 = vrot.lane.b32.xlu2 %v5322_v57, %s7177_s29  ;;  %s7214_s29 = smov 104  }
 0x254   :  { %340 = vrot.lane.b32.xlu2 %v5794_v42, %s7181_s3 }
 0x25c   :  { %368 = vrot.lane.b32.xlu2 %v5796_v43, %s7181_s3 }
 0x264   :  { %503 = vrot.lane.b32.xlu2 %v5794_v42, %s7165_s0 }
 0x29f   :  { %v235_v58 = vpop.xlane.xlu2 %234 }
 0x2a0   :  { %v239_v59 = vsub.f32 %v204_v51, %v235_v58 }
 0x2a2   :  { %v241_v60 = vmul.f32 1.442695, %v239_v59 }
 0x2a4   :  { %5352 = vpow2.f32 %v241_v60 }
 0x2a7   :  { %v238_v61 = vpop.xlane.xlu2 %237 }
 0x2a8   :  { %v240_v62 = vsub.f32 %v231_v55, %v238_v61 }
 0x2aa   :  { %v5353_v63 = vpop.eup %5352  ;;  %v243_v2 = vmul.f32 1.442695, %v240_v62 }
 0x2ab   :  { %v245_v3 = vsel %vm181_vm8, %v5353_v63, 0.0 }
 0x2ac   :  { %5354 = vpow2.f32 %v243_v2  ;;  %246 = vadd.xlane.f32.xlu0 %v245_v3 }
 0x2af   :  { %v5324_v4 = vpop.permute.xlu2 %5323 }
 0x2b0   :  { %v5325_v5 = vunpack.i.l.bf16 %v5324_v4  ;;  %v5326_v6 = vunpack.i.h.bf16 %v5324_v4 }
 0x2b2   :  { %v5355_v7 = vpop.eup %5354  ;;  %276 = vmatpush.msrb.mxu1 %v5325_v5  ;;  %302 = vmatpush.msra.mxu3 %v5326_v6 }
 0x2b3   :  { %v248_v8 = vsel %vm181_vm8, %v5355_v7, 0.0 }
 0x2b4   :  { %249 = vadd.xlane.f32.xlu1 %v248_v8  ;;  %328 = vmatpush.msra.mxu1 %v92_v10  ;;  %v93_v8 = vld [vmem:[%s7209_s6 + $0x8] sm:$0xff] }
 0x2b7   :  { %v341_v18 = vpop.permute.xlu2 %340 }
 0x2bf   :  { %v369_v20 = vpop.permute.xlu2 %368 }
 0x2c0   :  { %342 = vrot.lane.b32.xlu0 %v5794_v42, %s7179_s4 }
 0x2c7   :  { %v504_v28 = vpop.permute.xlu2 %503 }
 0x2c8   :  { %370 = vrot.lane.b32.xlu0 %v5796_v43, %s7179_s4 }
 0x2d0   :  { %505 = vrot.lane.b32.xlu0 %v5794_v42, %s7169_s25 }
 0x31f   :  { %v247_v9 = vpop.xlane.xlu0 %246 }
 0x320   :  { %5356 = vrcp.f32 %v247_v9 }
 0x326   :  { %v5357_v11 = vpop.eup %5356 }
 0x327   :  { %v250_v12 = vpop.xlane.xlu1 %249  ;;  %v253_v13 = vmul.f32 %v5357_v11, %v5353_v63 }
 0x328   :  { %5358 = vrcp.f32 %v250_v12 }
 0x329   :  { %5039 = vmatmul.msk.f32.vlgmr.msrb.gmra.mxu1 %vm181_vm8, %v253_v13 }
 0x32e   :  { %v5359_v14 = vpop.eup %5358 }
 0x32f   :  { %v254_v15 = vmul.f32 %v5359_v14, %v5355_v7 }
 0x331   :  { %5040 = vmatmul.msk.f32.vlgmr.msra.gmra.mxu3 %vm181_vm8, %v254_v15 }
 0x332   :  { %v343_v17 = vpop.permute.xlu0 %342 }
 0x333   :  { %5043 = vmatpush.xpose.msk.msrb.mxu2 %vm181_vm8, %v343_v17 }
 0x336   :  { %5044 = vmatmul.msk.f32.vlgmr.msrb.gmra.mxu2 %vm181_vm8, %v341_v18 }
 0x33a   :  { %v371_v19 = vpop.permute.xlu0 %370 }
 0x33b   :  { %5045 = vmatpush.xpose.msk.msrb.mxu3 %vm181_vm8, %v371_v19 }
 0x33e   :  { %5046 = vmatmul.msk.f32.vlgmr.msrb.gmra.mxu3 %vm181_vm8, %v369_v20  ;;  %v5924_v20 = vadd.f32 %v5822_v49, %v5885_v39 }
 0x33f   :  { %491 = vmatpush.msra.mxu3 %v93_v8 }
 0x342   :  { %v506_v21 = vpop.permute.xlu0 %505 }
 0x343   :  { %5051 = vmatpush.xpose.msk.msrb.mxu1 %vm181_vm8, %v506_v21 }
 0x3a6   :  { %v278_v22 = vpop.f32.mrf.mxu1 }
 0x3a7   :  { %5041 = vmatmul.msk.f32.vlgmr.msra.gmra.mxu1 %vm181_vm8, %v278_v22 }
 0x3b4   :  { %v304_v24 = vpop.f32.mrf.mxu3 }
 0x3b5   :  { %5042 = vmatmul.msk.f32.gmra.mxu1 %vm181_vm8, %v304_v24 }
 0x3b9   :  { %v365_v26 = vpop.f32.mrf.mxu2 }
 0x3ba   :  { %v366_v27 = vadd.f32 %v365_v26, %v5864_v25 }
 0x3bc   :  { %v396_v29 = vsel %vm181_vm8, %v366_v27, -inf }
 0x3bd   :  { %397 = vmax.xlane.f32.xlu1 %v396_v29  ;;  %5052 = vmatmul.msk.f32.vlgmr.msrb.gmra.mxu1 %vm181_vm8, %v504_v28  ;;  %v80_v29 = vld [vmem:[%s7208_s27 + $0x18] sm:$0xff]  ;;  %s7171_s27 = smov 40  }
 0x3c1   :  { %v393_v31 = vpop.f32.mrf.mxu3 }
 0x3c2   :  { %v394_v32 = vadd.f32 %v393_v31, %v5870_v30  ;;  %v5938_v31 = vadd.f32 %v5811_v46, %v80_v29 }
 0x3c4   :  { %v399_v33 = vsel %vm181_vm8, %v394_v32, -inf }
 0x3c5   :  { %400 = vmax.xlane.f32.xlu0 %v399_v33 }
 0x3d9   :  { %533 = vrot.lane.b32.xlu0 %v5796_v43, %s7169_s25  ;;  %s7216_s25 = smov 72  }
 0x3e1   :  { %581 = vrot.lane.b32.xlu0 %v5794_v42, %s7173_s5 }
 0x424   :  { %v5878_v34 = vpop.f32.mrf.mxu1 }
 0x430   :  { %v398_v35 = vpop.xlane.xlu1 %397 }
 0x431   :  { %v402_v36 = vsub.f32 %v366_v27, %v398_v35  ;;  %v94_v27 = vld [vmem:[%s7209_s6 + $0x10] sm:$0xff] }
 0x432   :  { %v5880_v37 = vpop.f32.mrf.mxu1 }
 0x433   :  { %v404_v38 = vmul.f32 1.442695, %v402_v36 }
 0x435   :  { %5360 = vpow2.f32 %v404_v38 }
 0x438   :  { %v401_v51 = vpop.xlane.xlu0 %400 }
 0x439   :  { %v403_v53 = vsub.f32 %v394_v32, %v401_v51 }
 0x43a   :  { %v528_v41 = vpop.f32.mrf.mxu1 }
 0x43b   :  { %v5361_v44 = vpop.eup %5360  ;;  %v529_v45 = vadd.f32 %v528_v41, %v5889_v40  ;;  %v406_v54 = vmul.f32 1.442695, %v403_v53 }
 0x43c   :  { %v408_v47 = vsel %vm181_vm8, %v5361_v44, 0.0 }
 0x43d   :  { %409 = vadd.xlane.f32.xlu1 %v408_v47  ;;  %v559_v50 = vsel %vm181_vm8, %v529_v45, -inf  ;;  %5362 = vpow2.f32 %v406_v54  ;;  %v5948_v47 = vadd.f32 %v5822_v49, %v80_v29 }
 0x43e   :  { %560 = vmax.xlane.f32.xlu2 %v559_v50 }
 0x443   :  { %v5363_v55 = vpop.eup %5362 }
 0x444   :  { %v411_v56 = vsel %vm181_vm8, %v5363_v55, 0.0 }
 0x44b   :  { %v534_v57 = vpop.permute.xlu0 %533 }
 0x453   :  { %v582_v62 = vpop.permute.xlu0 %581 }
 0x456   :  { %418 = vrot.lane.b32.xlu1 %v5794_v42, %s7175_s28  ;;  %444 = vrot.lane.b32.xlu2 %v5796_v43, %s7175_s28  ;;  %s7215_s28 = smov 48  }
 0x45e   :  { %531 = vrot.lane.b32.xlu2 %v5796_v43, %s7165_s0  ;;  %s7212_s0 = smov 80  }
 0x466   :  { %668 = vrot.lane.b32.xlu2 %v5794_v42, %s7163_s26 }
 0x46e   :  { %694 = vrot.lane.b32.xlu2 %v5796_v43, %s7167_s7 }
 0x480   :  { %412 = vadd.xlane.f32.xlu1 %v411_v56 }
 0x499   :  { %696 = vrot.lane.b32.xlu1 %v5796_v43, %s7163_s26  ;;  %s7213_s26 = smov 112  }
 0x4b0   :  { %v410_v2 = vpop.xlane.xlu1 %409 }
 0x4b1   :  { %v561_v58 = vpop.xlane.xlu2 %560 }
 0x4b2   :  { %v565_v59 = vsub.f32 %v529_v45, %v561_v58 }
 0x4b4   :  { %v567_v60 = vmul.f32 1.442695, %v565_v59 }
 0x4b6   :  { %5364 = vpow2.f32 %v567_v60 }
 0x4b7   :  { %5366 = vrcp.f32 %v410_v2 }
 0x4b9   :  { %v445_v61 = vpop.permute.xlu2 %444 }
 0x4ba   :  { %465 = vmatpush.msrb.mxu0 %v445_v61 }
 0x4bc   :  { %602 = vmatpush.msra.mxu0 %v582_v62  ;;  %v5365_v63 = vpop.eup %5364 }
 0x4bd   :  { %v571_v3 = vsel %vm181_vm8, %v5365_v63, 0.0  ;;  %v5367_v4 = vpop.eup %5366 }
 0x4be   :  { %572 = vadd.xlane.f32.xlu0 %v571_v3  ;;  %v416_v5 = vmul.f32 %v5367_v4, %v5361_v44 }
 0x4c1   :  { %v532_v7 = vpop.permute.xlu2 %531 }
 0x4c8   :  { %v419_v6 = vpop.permute.xlu1 %418 }
 0x4c9   :  { %439 = vmatpush.msra.mxu2 %v419_v6  ;;  %v669_v12 = vpop.permute.xlu2 %668 }
 0x4ca   :  { %5047 = vmatmul.msk.f32.vlgmr.msra.gmra.mxu2 %vm181_vm8, %v416_v5 }
 0x4cb   :  { %5053 = vmatpush.xpose.msk.msrb.mxu2 %vm181_vm8, %v534_v57 }
 0x4cf   :  { %654 = vmatpush.msra.mxu2 %v94_v27 }
 0x4d1   :  { %v695_v26 = vpop.permute.xlu2 %694 }
 0x4d2   :  { %666 = vrot.lane.b32.xlu0 %v5794_v42, %s7167_s7  ;;  %5054 = vmatmul.msk.f32.vlgmr.msrb.gmra.mxu2 %vm181_vm8, %v532_v7 }
 0x4f3   :  { %v413_v9 = vpop.xlane.xlu1 %412 }
 0x4f4   :  { %5368 = vrcp.f32 %v413_v9 }
 0x4fa   :  { %v5369_v10 = vpop.eup %5368 }
 0x4fb   :  { %v417_v11 = vmul.f32 %v5369_v10, %v5363_v55 }
 0x4fd   :  { %5048 = vmatmul.msk.f32.vlgmr.msrb.gmra.mxu0 %vm181_vm8, %v417_v11 }
 0x4fe   :  { %5059 = vmatpush.xpose.msk.msrb.mxu0 %vm181_vm8, %v669_v12  ;;  %v95_v12 = vld [vmem:[%s7209_s6 + $0x18] sm:$0xff] }
 0x50b   :  { %v697_v13 = vpop.permute.xlu1 %696 }
 0x50c   :  { %5061 = vmatpush.xpose.msk.msrb.mxu3 %vm181_vm8, %v697_v13 }
 0x531   :  { %v573_v14 = vpop.xlane.xlu0 %572 }
 0x532   :  { %5370 = vrcp.f32 %v573_v14 }
 0x538   :  { %v5371_v15 = vpop.eup %5370 }
 0x539   :  { %v579_v17 = vmul.f32 %v5371_v15, %v5365_v63  ;;  %v336_v15 = vadd.f32 %v5878_v34, %v5758_v0 }
 0x53b   :  { %5055 = vmatmul.msk.f32.vlgmr.msra.gmra.mxu0 %vm181_vm8, %v579_v17 }
 0x544   :  { %v667_v18 = vpop.permute.xlu0 %666 }
 0x545   :  { %5060 = vmatmul.msk.f32.vlgmr.msrb.gmra.mxu0 %vm181_vm8, %v667_v18 }
 0x54d   :  { %v441_v19 = vpop.f32.mrf.mxu2 }
 0x54e   :  { %5049 = vmatmul.msk.f32.vlgmr.msra.gmra.mxu3 %vm181_vm8, %v441_v19 }
 0x54f   :  { %817 = vmatpush.msra.mxu3 %v95_v12  ;;  %v832_v12 = vld [vmem:[%s7141_s10] sm:$0xff] }
 0x555   :  { %v556_v21 = vpop.f32.mrf.mxu2 }
 0x556   :  { %v557_v22 = vadd.f32 %v556_v21, %v5924_v20 }
 0x558   :  { %v562_v23 = vsel %vm181_vm8, %v557_v22, -inf }
 0x559   :  { %563 = vmax.xlane.f32.xlu0 %v562_v23 }
 0x57a   :  { %v467_v24 = vpop.f32.mrf.mxu0 }
 0x57b   :  { %5050 = vmatmul.msk.f32.gmra.mxu3 %vm181_vm8, %v467_v24 }
 0x583   :  { %5062 = vmatmul.msk.f32.vlgmr.msrb.gmra.mxu3 %vm181_vm8, %v695_v26  ;;  %v337_v26 = vadd.f32 %v5880_v37, %v5763_v1  ;;  %v830_v1 = vld [vmem:[%s7140_s9 + $0x10] sm:$0xff]  ;;  %v829_v37 = vld [vmem:[%s7140_s9 + $0x8] sm:$0xff] }
 0x5b8   :  { %v604_v28 = vpop.f32.mrf.mxu0 }
 0x5b9   :  { %5057 = vmatmul.msk.f32.vlgmr.msra.gmra.mxu2 %vm181_vm8, %v604_v28 }
 0x5c2   :  { %v691_v32 = vpop.f32.mrf.mxu0 }
 0x5c3   :  { %v692_v33 = vadd.f32 %v691_v32, %v5938_v31 }
 0x5c5   :  { %v722_v35 = vsel %vm181_vm8, %v692_v33, -inf }
 0x5c6   :  { %723 = vmax.xlane.f32.xlu2 %v722_v35  ;;  %v831_v35 = vld [vmem:[%s7140_s9 + $0x18] sm:$0xff] }
 0x5cc   :  { %v564_v36 = vpop.xlane.xlu0 %563 }
 0x5cd   :  { %v566_v38 = vsub.f32 %v557_v22, %v564_v36  ;;  %v828_v36 = vld [vmem:[%s7140_s9] sm:$0xff] }
 0x5cf   :  { %v569_v39 = vmul.f32 1.442695, %v566_v38 }
 0x5d1   :  { %5372 = vpow2.f32 %v569_v39  ;;  %v493_v45 = vpop.f32.mrf.mxu3 }
 0x5d2   :  { %v499_v18 = vadd.f32 %v493_v45, %v336_v15 }
 0x5d7   :  { %v5373_v41 = vpop.eup %5372 }
 0x5d8   :  { %v574_v44 = vsel %vm181_vm8, %v5373_v41, 0.0 }
 0x5d9   :  { %575 = vadd.xlane.f32.xlu1 %v574_v44 }
 0x5de   :  { %607 = vrot.lane.b32.xlu2 %v5796_v43, %s7173_s5  ;;  %s7217_s5 = sld [smem:[#allocation6_spill]] }
 0x5fe   :  { %v5945_v46 = vpop.f32.mrf.mxu3 }
 0x5ff   :  { %v500_v28 = vadd.f32 %v5945_v46, %v337_v26 }
 0x606   :  { %v719_v50 = vpop.f32.mrf.mxu3 }
 0x607   :  { %v720_v51 = vadd.f32 %v719_v50, %v5948_v47 }
 0x609   :  { %v725_v53 = vsel %vm181_vm8, %v720_v51, -inf }
 0x60a   :  { %726 = vmax.xlane.f32.xlu1 %v725_v53 }
 0x623   :  { %770 = vrot.lane.b32.xlu1 %v5796_v43, %s7171_s27 }
 0x639   :  { %v724_v54 = vpop.xlane.xlu2 %723 }
 0x63a   :  { %v728_v55 = vsub.f32 %v692_v33, %v724_v54  ;;  %v5335_v54 = vld [vmem:[%s7139_s8] ss:$0 sm:$0xff] }
 0x63c   :  { %v730_v56 = vmul.f32 1.442695, %v728_v55  ;;  %v656_v17 = vpop.f32.mrf.mxu2 }
 0x63d   :  { %v662_v19 = vadd.f32 %v656_v17, %v499_v18 }
 0x63e   :  { %5374 = vpow2.f32 %v730_v56 }
 0x641   :  { %v608_v57 = vpop.permute.xlu2 %607 }
 0x642   :  { %628 = vmatpush.msra.mxu1 %v608_v57 }
 0x644   :  { %v5375_v58 = vpop.eup %5374 }
 0x645   :  { %v734_v49 = vsel %vm181_vm8, %v5375_v58, 0.0 }
 0x646   :  { %735 = vadd.xlane.f32.xlu0 %v734_v49  ;;  %v838_v49 = vld [vmem:[%s7141_s10 + $0x30] sm:$0xff] }
 0x64c   :  { %v576_v59 = vpop.xlane.xlu1 %575 }
 0x64d   :  { %5376 = vrcp.f32 %v576_v59  ;;  %v837_v59 = vld [vmem:[%s7141_s10 + $0x28] sm:$0xff] }
 0x653   :  { %v5377_v60 = vpop.eup %5376 }
 0x654   :  { %v580_v61 = vmul.f32 %v5377_v60, %v5373_v41  ;;  %v836_v60 = vld [vmem:[%s7141_s10 + $0x20] sm:$0xff] }
 0x656   :  { %5056 = vmatmul.msk.f32.vlgmr.msra.gmra.mxu1 %vm181_vm8, %v580_v61 }
 0x65a   :  { %744 = vrot.lane.b32.xlu0 %v5794_v42, %s7171_s27  ;;  %s7218_s27 = smov 40  }
 0x67d   :  { %v727_v43 = vpop.xlane.xlu1 %726 }
 0x67e   :  { %v729_v62 = vsub.f32 %v720_v51, %v727_v43 }
 0x680   :  { %v732_v63 = vmul.f32 1.442695, %v729_v62  ;;  %v835_v62 = vld [vmem:[%s7141_s10 + $0x18] sm:$0xff] }
 0x682   :  { %5378 = vpow2.f32 %v732_v63 }
 0x688   :  { %v5379_v2 = vpop.eup %5378 }
 0x689   :  { %v737_v3 = vsel %vm181_vm8, %v5379_v2, 0.0 }
 0x68a   :  { %738 = vadd.xlane.f32.xlu0 %v737_v3 }
 0x695   :  { %v771_v4 = vpop.permute.xlu1 %770 }
 0x696   :  { %791 = vmatpush.msra.mxu0 %v771_v4 }
 0x6b9   :  { %v736_v5 = vpop.xlane.xlu0 %735 }
 0x6ba   :  { %5380 = vrcp.f32 %v736_v5 }
 0x6c0   :  { %v5381_v6 = vpop.eup %5380 }
 0x6c1   :  { %v742_v7 = vmul.f32 %v5381_v6, %v5375_v58  ;;  %v839_v58 = vld [vmem:[%s7141_s10 + $0x38] sm:$0xff] }
 0x6c2   :  { %923 = vmatpush.msrb.mxu2 %v839_v58 }
 0x6c4   :  { %924 = vmatpush.msrb.mxu2 %v838_v49 }
 0x6c6   :  { %925 = vmatpush.msrb.mxu2 %v837_v59 }
 0x6c8   :  { %926 = vmatpush.msrb.mxu2 %v836_v60 }
 0x6ca   :  { %927 = vmatpush.msrb.mxu2 %v835_v62 }
 0x6cc   :  { %v745_v8 = vpop.permute.xlu0 %744 }
 0x6cd   :  { %765 = vmatpush.msrb.mxu1 %v745_v8 }
 0x6ce   :  { %5063 = vmatmul.msk.f32.vlgmr.msrb.gmra.mxu1 %vm181_vm8, %v742_v7 }
 0x6cf   :  { %895 = vmatpush.msra.mxu1 %v831_v35 }
 0x6d1   :  { %896 = vmatpush.msra.mxu1 %v830_v1 }
 0x6d3   :  { %v630_v9 = vpop.f32.mrf.mxu1  ;;  %897 = vmatpush.msra.mxu1 %v829_v37 }
 0x6d4   :  { %5058 = vmatmul.msk.f32.gmra.mxu2 %vm181_vm8, %v630_v9 }
 0x6d5   :  { %898 = vmatpush.msra.mxu1 %v828_v36 }
 0x6fd   :  { %v739_v42 = vpop.xlane.xlu0 %738 }
 0x6fe   :  { %5382 = vrcp.f32 %v739_v42 }
 0x704   :  { %v5383_v10 = vpop.eup %5382 }
 0x705   :  { %v743_v11 = vmul.f32 %v5383_v10, %v5379_v2  ;;  %v834_v2 = vld [vmem:[%s7141_s10 + $0x10] sm:$0xff] }
 0x706   :  { %928 = vmatpush.msrb.mxu2 %v834_v2 }
 0x707   :  { %5064 = vmatmul.msk.f32.vlgmr.msra.gmra.mxu0 %vm181_vm8, %v743_v11  ;;  %v833_v11 = vld [vmem:[%s7141_s10 + $0x8] sm:$0xff] }
 0x708   :  { %929 = vmatpush.msrb.mxu2 %v833_v11 }
 0x70a   :  { %930 = vmatpush.msrb.mxu2 %v832_v12 }
 0x74b   :  { %v767_v13 = vpop.f32.mrf.mxu1 }
 0x74c   :  { %5065 = vmatmul.msk.f32.vlgmr.msra.gmra.mxu3 %vm181_vm8, %v767_v13 }
 0x757   :  { %v659_v27 = vpop.f32.mrf.mxu2 }
 0x758   :  { %v663_v29 = vadd.f32 %v659_v27, %v500_v28 }
 0x784   :  { %v793_v14 = vpop.f32.mrf.mxu0 }
 0x785   :  { %5066 = vmatmul.msk.f32.gmra.mxu3 %vm181_vm8, %v793_v14 }
 0x7cf   :  { %v819_v21 = vpop.f32.mrf.mxu3 }
 0x7d0   :  { %v5969_v22 = vadd.f32 %v819_v21, %v662_v19 }
 0x7d2   :  { %v840_v23 = vmul.f32 %v5969_v22, %v5969_v22 }
 0x7d4   :  { %v842_v24 = vsel %vm98_vm0, %v840_v23, 0.0 }
 0x7d5   :  { %843 = vadd.xlane.f32.xlu2 %v842_v24 }
 0x808   :  { %v822_v0 = vpop.f32.mrf.mxu3 }
 0x809   :  { %v5977_v34 = vadd.f32 %v822_v0, %v663_v29  ;;  %v5073_v29 = vld [vmem:[%s7205_s2 + $0x30] sm:$0xff]  ;;  %v5072_v0 = vld [vmem:[%s7205_s2 + $0x28] sm:$0xff] }
 0x80b   :  { %v841_v32 = vmul.f32 %v5977_v34, %v5977_v34 }
 0x80d   :  { %v845_v33 = vsel %vm98_vm0, %v841_v32, 0.0 }
 0x80e   :  { %846 = vadd.xlane.f32.xlu1 %v845_v33 }
 0x848   :  { %v844_v38 = vpop.xlane.xlu2 %843 }
 0x849   :  { %v848_v39 = vmul.f32 %v844_v38, %v5783_v16 }
 0x84b   :  { %v850_v41 = vadd.f32 1e-06, %v848_v39 }
 0x84d   :  { %5384 = vrsqrt.f32 %v850_v41  ;;  %vm858_vm10 = vweird.f32 %v850_v41 }
 0x853   :  { %v5385_v44 = vpop.eup %5384 }
 0x854   :  { %v853_v45 = vmul.f32 %v5385_v44, %v850_v41  ;;  %vm859_vm9 = vweird.f32 %v5385_v44 }
 0x855   :  { %vm860_vm11 = vmor %vm858_vm10, %vm859_vm9 }
 0x856   :  { %v854_v46 = vmul.f32 %v5385_v44, %v853_v45 }
 0x858   :  { %v855_v50 = vmul.f32 0.5, %v854_v46 }
 0x85a   :  { %v856_v51 = vsub.f32 1.5, %v855_v50 }
 0x85c   :  { %v857_v53 = vmul.f32 %v5385_v44, %v856_v51 }
 0x85e   :  { %v861_v55 = vsel %vm860_vm11, %v5385_v44, %v857_v53  ;;  %v5336_v44 = vld [vmem:[%s7206_s30 + $0x1] ss:$0 sm:$0xff]  ;;  %s7211_s30 = smov 56  }
 0x85f   :  { %v872_v56 = vmul.f32 %v861_v55, %v5969_v22 }
 0x861   :  { %v875_v57 = vmul.f32 %v5335_v54, %v872_v56 }
 0x863   :  { %5067 = vmatmul.msk.f32.vlgmr.msra.gmra.mxu1 %vm98_vm0, %v875_v57 }
 0x881   :  { %v847_v61 = vpop.xlane.xlu1 %846 }
 0x882   :  { %v849_v43 = vmul.f32 %v847_v61, %v5783_v16 }
 0x884   :  { %v851_v63 = vadd.f32 1e-06, %v849_v43 }
 0x886   :  { %5386 = vrsqrt.f32 %v851_v63  ;;  %vm868_vm13 = vweird.f32 %v851_v63 }
 0x88c   :  { %v5387_v3 = vpop.eup %5386 }
 0x88d   :  { %v863_v4 = vmul.f32 %v5387_v3, %v851_v63  ;;  %vm869_vm12 = vweird.f32 %v5387_v3 }
 0x88e   :  { %vm870_vm14 = vmor %vm868_vm13, %vm869_vm12 }
 0x88f   :  { %v864_v5 = vmul.f32 %v5387_v3, %v863_v4 }
 0x891   :  { %v865_v6 = vmul.f32 0.5, %v864_v5 }
 0x893   :  { %v866_v7 = vsub.f32 1.5, %v865_v6 }
 0x895   :  { %v867_v8 = vmul.f32 %v5387_v3, %v866_v7 }
 0x897   :  { %v871_v9 = vsel %vm870_vm14, %v5387_v3, %v867_v8 }
 0x898   :  { %v873_v42 = vmul.f32 %v871_v9, %v5977_v34 }
 0x89a   :  { %v876_v10 = vmul.f32 %v5335_v54, %v873_v42 }
 0x89c   :  { %5068 = vmatmul.msk.f32.gmra.mxu1 %vm98_vm0, %v876_v10 }
 0x8e0   :  { %v900_v13 = vpop.f32.mrf.mxu1 }
 0x8e1   :  { %v906_v14 = vmax.f32 %v900_v13, 0.0 }
 0x8e3   :  { %5069 = vmatmul.msk.f32.vlgmr.msrb.gmra.mxu2 %vm908_vm15, %v906_v14 }
 0x919   :  { %v903_v15 = vpop.f32.mrf.mxu1 }
 0x91a   :  { %v907_v17 = vmax.f32 %v903_v15, 0.0 }
 0x91c   :  { %5070 = vmatmul.msk.f32.gmra.mxu2 %vm908_vm15, %v907_v17 }
 0x966   :  { %v932_v18 = vpop.f32.mrf.mxu2 }
 0x967   :  { %v6030_v19 = vadd.f32 %v932_v18, %v5969_v22  ;;  %v5074_v22 = vld [vmem:[%s7205_s2 + $0x38] sm:$0xff] }
 0x968   :  { %1006 = vmatpush.msrb.mxu0 %v5074_v22 }
 0x969   :  { %v951_v21 = vmul.f32 %v6030_v19, %v6030_v19 }
 0x96a   :  { %1007 = vmatpush.msrb.mxu0 %v5073_v29 }
 0x96b   :  { %v953_v23 = vsel %vm98_vm0, %v951_v21, 0.0 }
 0x96c   :  { %954 = vadd.xlane.f32.xlu0 %v953_v23  ;;  %1008 = vmatpush.msrb.mxu0 %v5072_v0 }
 0x99f   :  { %v935_v24 = vpop.f32.mrf.mxu2 }
 0x9a0   :  { %v6036_v26 = vadd.f32 %v935_v24, %v5977_v34  ;;  %v5071_v34 = vld [vmem:[%s7205_s2 + $0x20] sm:$0xff]  ;;  %s7210_s2 = smov 64  }
 0x9a1   :  { %1009 = vmatpush.msrb.mxu0 %v5071_v34 }
 0x9a2   :  { %v952_v27 = vmul.f32 %v6036_v26, %v6036_v26 }
 0x9a4   :  { %v956_v28 = vsel %vm98_vm0, %v952_v27, 0.0 }
 0x9a5   :  { %957 = vadd.xlane.f32.xlu2 %v956_v28 }
 0x9df   :  { %v955_v32 = vpop.xlane.xlu0 %954 }
 0x9e0   :  { %v959_v33 = vmul.f32 %v955_v32, %v5783_v16 }
 0x9e2   :  { %v961_v35 = vadd.f32 1e-06, %v959_v33 }
 0x9e4   :  { %5388 = vrsqrt.f32 %v961_v35  ;;  %vm969_vm2 = vweird.f32 %v961_v35 }
 0x9ea   :  { %v5389_v1 = vpop.eup %5388 }
 0x9eb   :  { %v964_v37 = vmul.f32 %v5389_v1, %v961_v35  ;;  %vm970_vm1 = vweird.f32 %v5389_v1 }
 0x9ec   :  { %vm971_vm3 = vmor %vm969_vm2, %vm970_vm1 }
 0x9ed   :  { %v965_v36 = vmul.f32 %v5389_v1, %v964_v37 }
 0x9ef   :  { %v966_v38 = vmul.f32 0.5, %v965_v36 }
 0x9f1   :  { %v967_v39 = vsub.f32 1.5, %v966_v38 }
 0x9f3   :  { %v968_v41 = vmul.f32 %v5389_v1, %v967_v39 }
 0x9f5   :  { %v972_v45 = vsel %vm971_vm3, %v5389_v1, %v968_v41 }
 0x9f6   :  { %v983_v46 = vmul.f32 %v972_v45, %v6030_v19 }
 0x9f8   :  { %v986_v50 = vmul.f32 %v5336_v44, %v983_v46 }
 0x9fa   :  { %5079 = vmatmul.msk.f32.vlgmr.msrb.gmra.mxu0 %vm98_vm0, %v986_v50 }
 0xa18   :  { %v958_v51 = vpop.xlane.xlu2 %957 }
 0xa19   :  { %v960_v53 = vmul.f32 %v958_v51, %v5783_v16 }
 0xa1b   :  { %v962_v54 = vadd.f32 1e-06, %v960_v53 }
 0xa1d   :  { %5390 = vrsqrt.f32 %v962_v54  ;;  %vm979_vm5 = vweird.f32 %v962_v54 }
 0xa23   :  { %v5391_v55 = vpop.eup %5390 }
 0xa24   :  { %v974_v56 = vmul.f32 %v5391_v55, %v962_v54  ;;  %vm980_vm4 = vweird.f32 %v5391_v55 }
 0xa25   :  { %vm981_vm6 = vmor %vm979_vm5, %vm980_vm4 }
 0xa26   :  { %v975_v57 = vmul.f32 %v5391_v55, %v974_v56 }
 0xa28   :  { %v976_v58 = vmul.f32 0.5, %v975_v57 }
 0xa2a   :  { %v977_v49 = vsub.f32 1.5, %v976_v58 }
 0xa2c   :  { %v978_v59 = vmul.f32 %v5391_v55, %v977_v49 }
 0xa2e   :  { %v982_v60 = vsel %vm981_vm6, %v5391_v55, %v978_v59  ;;  %v5075_v55 = vld [vmem:[%s7209_s6 + $0x20] sm:$0xff]  ;;  %v5076_v59 = vld [vmem:[%s7209_s6 + $0x28] sm:$0xff] }
 0xa2f   :  { %v984_v61 = vmul.f32 %v982_v60, %v6036_v26 }
 0xa31   :  { %v987_v43 = vmul.f32 %v5336_v44, %v984_v61 }
 0xa33   :  { %5080 = vmatmul.msk.f32.gmra.mxu0 %vm98_vm0, %v987_v43 }
 0xa77   :  { %v6062_v62 = vpop.f32.mrf.mxu0 }
 0xa78   :  { %1018 = vrot.lane.b32.xlu0 %v6062_v62, %s7183_s24  ;;  %1178 = vrot.lane.b32.xlu1 %v6062_v62, %s7179_s4 }
 0xa80   :  { %1176 = vrot.lane.b32.xlu0 %v6062_v62, %s7181_s3  ;;  %1093 = vrot.lane.b32.xlu1 %v6062_v62, %s7210_s2 }
 0xab0   :  { %v6072_v63 = vpop.f32.mrf.mxu0 }
 0xab1   :  { %1206 = vrot.lane.b32.xlu1 %v6072_v63, %s7179_s4  ;;  %1045 = vrot.lane.b32.xlu2 %v6072_v63, %s7183_s24 }
 0xab9   :  { %1204 = vrot.lane.b32.xlu1 %v6072_v63, %s7181_s3  ;;  %s7221_s3 = smov 88  }
 0xaea   :  { %v1019_v2 = vpop.permute.xlu0 %1018  ;;  %v1179_v3 = vpop.permute.xlu1 %1178 }
 0xaeb   :  { %5081 = vmatpush.xpose.msk.msrb.mxu3 %vm181_vm8, %v1019_v2 }
 0xaee   :  { %5082 = vmatmul.msk.f32.vlgmr.msrb.gmra.mxu3 %vm181_vm8, %v6062_v62 }
 0xaef   :  { %1166 = vmatpush.msra.mxu3 %v5075_v55 }
 0xaf2   :  { %v1094_v4 = vpop.permute.xlu1 %1093  ;;  %v1177_v6 = vpop.permute.xlu0 %1176 }
 0xaf3   :  { %1114 = vmatpush.msra.mxu2 %v1094_v4 }
 0xb0b   :  { %v1046_v5 = vpop.permute.xlu2 %1045 }
 0xb0c   :  { %5083 = vmatpush.xpose.msk.msrb.mxu1 %vm181_vm8, %v1046_v5 }
 0xb0f   :  { %5084 = vmatmul.msk.f32.vlgmr.msrb.gmra.mxu1 %vm181_vm8, %v6072_v63 }
 0xb10   :  { %5089 = vmatpush.xpose.msk.msra.mxu1 %vm181_vm8, %v1179_v3 }
 0xb17   :  { %5090 = vmatmul.msk.f32.vlgmr.msra.gmra.mxu1 %vm181_vm8, %v1177_v6 }
 0xb23   :  { %v1207_v7 = vpop.permute.xlu1 %1206 }
 0xb24   :  { %5091 = vmatpush.xpose.msk.msrb.mxu2 %vm181_vm8, %v1207_v7 }
 0xb71   :  { %v1041_v8 = vpop.f32.mrf.mxu3 }
 0xb72   :  { %v1042_v9 = vadd.f32 %v1041_v8, %v5817_v48 }
 0xb74   :  { %v1071_v42 = vsel %vm181_vm8, %v1042_v9, -inf }
 0xb75   :  { %1072 = vmax.xlane.f32.xlu2 %v1071_v42 }
 0xb8c   :  { %v1068_v10 = vpop.f32.mrf.mxu1 }
 0xb8d   :  { %v1069_v11 = vadd.f32 %v1068_v10, %v5826_v52 }
 0xb8f   :  { %v1074_v12 = vsel %vm181_vm8, %v1069_v11, -inf }
 0xb90   :  { %1075 = vmax.xlane.f32.xlu1 %v1074_v12 }
 0xb94   :  { %v1201_v13 = vpop.f32.mrf.mxu1 }
 0xb95   :  { %v1202_v14 = vadd.f32 %v1201_v13, %v5864_v25  ;;  %v1205_v25 = vpop.permute.xlu1 %1204 }
 0xb97   :  { %v1232_v15 = vsel %vm181_vm8, %v1202_v14, -inf }
 0xb98   :  { %1233 = vmax.xlane.f32.xlu2 %v1232_v15 }
 0xbe8   :  { %v1073_v17 = vpop.xlane.xlu2 %1072 }
 0xbe9   :  { %v1077_v18 = vsub.f32 %v1042_v9, %v1073_v17 }
 0xbeb   :  { %v1079_v21 = vmul.f32 1.442695, %v1077_v18 }
 0xbed   :  { %5392 = vpow2.f32 %v1079_v21 }
 0xbf3   :  { %v5393_v48 = vpop.eup %5392 }
 0xbf4   :  { %v1083_v23 = vsel %vm181_vm8, %v5393_v48, 0.0 }
 0xbf5   :  { %1084 = vadd.xlane.f32.xlu0 %v1083_v23 }
 0xc03   :  { %v1076_v29 = vpop.xlane.xlu1 %1075 }
 0xc04   :  { %v1078_v0 = vsub.f32 %v1069_v11, %v1076_v29 }
 0xc06   :  { %v1081_v34 = vmul.f32 1.442695, %v1078_v0 }
 0xc09   :  { %1119 = vrot.lane.b32.xlu0 %v6072_v63, %s7210_s2 }
 0xc0b   :  { %v1234_v52 = vpop.xlane.xlu2 %1233 }
 0xc0c   :  { %v1238_v24 = vsub.f32 %v1202_v14, %v1234_v52 }
 0xc0e   :  { %v1240_v27 = vmul.f32 1.442695, %v1238_v24 }
 0xc10   :  { %5394 = vpow2.f32 %v1240_v27 }
 0xc11   :  { %5396 = vpow2.f32 %v1081_v34 }
 0xc16   :  { %v5395_v28 = vpop.eup %5394 }
 0xc17   :  { %v1244_v22 = vsel %vm181_vm8, %v5395_v28, 0.0  ;;  %v5397_v32 = vpop.eup %5396 }
 0xc18   :  { %1245 = vadd.xlane.f32.xlu2 %v1244_v22  ;;  %v1086_v33 = vsel %vm181_vm8, %v5397_v32, 0.0 }
 0xc30   :  { %1254 = vrot.lane.b32.xlu2 %v6062_v62, %s7211_s30 }
 0xc33   :  { %1087 = vadd.xlane.f32.xlu0 %v1086_v33 }
 0xc47   :  { %1339 = vrot.lane.b32.xlu0 %v6062_v62, %s7212_s0 }
 0xc4f   :  { %1337 = vrot.lane.b32.xlu0 %v6062_v62, %s7213_s26 }
 0xc57   :  { %1280 = vrot.lane.b32.xlu0 %v6072_v63, %s7211_s30 }
 0xc68   :  { %v1085_v35 = vpop.xlane.xlu0 %1084 }
 0xc69   :  { %5398 = vrcp.f32 %v1085_v35 }
 0xc6f   :  { %v5399_v1 = vpop.eup %5398 }
 0xc70   :  { %v1091_v37 = vmul.f32 %v5399_v1, %v5393_v48 }
 0xc72   :  { %5085 = vmatmul.msk.f32.vlgmr.msra.gmra.mxu2 %vm181_vm8, %v1091_v37 }
 0xc73   :  { %1327 = vmatpush.msra.mxu2 %v5076_v59 }
 0xc7a   :  { %5092 = vmatmul.msk.f32.vlgmr.msrb.gmra.mxu2 %vm181_vm8, %v1205_v25 }
 0xc7b   :  { %v1120_v36 = vpop.permute.xlu0 %1119 }
 0xc7c   :  { %1140 = vmatpush.msra.mxu0 %v1120_v36 }
 0xc8b   :  { %v1246_v38 = vpop.xlane.xlu2 %1245 }
 0xc93   :  { %v1255_v39 = vpop.permute.xlu2 %1254 }
 0xc94   :  { %1275 = vmatpush.msrb.mxu0 %v1255_v39 }
 0xca6   :  { %v1088_v41 = vpop.xlane.xlu0 %1087 }
 0xca7   :  { %5400 = vrcp.f32 %v1088_v41 }
 0xca8   :  { %5402 = vrcp.f32 %v1246_v38 }
 0xcad   :  { %v5401_v44 = vpop.eup %5400 }
 0xcae   :  { %v1092_v45 = vmul.f32 %v5401_v44, %v5397_v32  ;;  %v5403_v46 = vpop.eup %5402  ;;  %v5077_v32 = vld [vmem:[%s7209_s6 + $0x30] sm:$0xff] }
 0xcaf   :  { %v1252_v50 = vmul.f32 %v5403_v46, %v5395_v28 }
 0xcb0   :  { %5086 = vmatmul.msk.f32.vlgmr.msra.gmra.mxu0 %vm181_vm8, %v1092_v45 }
 0xcb8   :  { %5093 = vmatmul.msk.f32.vlgmr.msrb.gmra.mxu0 %vm181_vm8, %v1252_v50 }
 0xcb9   :  { %v1340_v51 = vpop.permute.xlu0 %1339 }
 0xcba   :  { %5097 = vmatpush.xpose.msk.msra.mxu0 %vm181_vm8, %v1340_v51 }
 0xcc1   :  { %v1338_v53 = vpop.permute.xlu0 %1337 }
 0xcc2   :  { %5098 = vmatmul.msk.f32.vlgmr.msra.gmra.mxu0 %vm181_vm8, %v1338_v53 }
 0xcc9   :  { %v1281_v54 = vpop.permute.xlu0 %1280 }
 0xcca   :  { %1301 = vmatpush.msrb.mxu1 %v1281_v54 }
 0xcf5   :  { %v1116_v56 = vpop.f32.mrf.mxu2 }
 0xcf6   :  { %5087 = vmatmul.msk.f32.vlgmr.msra.gmra.mxu3 %vm181_vm8, %v1116_v56 }
 0xcfd   :  { %v1229_v57 = vpop.f32.mrf.mxu2 }
 0xcfe   :  { %v1230_v58 = vadd.f32 %v1229_v57, %v5870_v30 }
 0xd00   :  { %v1235_v49 = vsel %vm181_vm8, %v1230_v58, -inf }
 0xd01   :  { %1236 = vmax.xlane.f32.xlu2 %v1235_v49 }
 0xd19   :  { %1365 = vrot.lane.b32.xlu2 %v6072_v63, %s7213_s26 }
 0xd21   :  { %1526 = vrot.lane.b32.xlu2 %v6072_v63, %s7214_s29 }
 0xd2d   :  { %v1142_v60 = vpop.f32.mrf.mxu0 }
 0xd2e   :  { %5088 = vmatmul.msk.f32.gmra.mxu3 %vm181_vm8, %v1142_v60 }
 0xd35   :  { %v1277_v61 = vpop.f32.mrf.mxu0 }
 0xd36   :  { %5095 = vmatmul.msk.f32.vlgmr.msra.gmra.mxu2 %vm181_vm8, %v1277_v61 }
 0xd3f   :  { %v1362_v5 = vpop.f32.mrf.mxu0 }
 0xd40   :  { %v1363_v6 = vadd.f32 %v1362_v5, %v5889_v40  ;;  %v6191_v5 = vld [vmem:[%s7217_s5 + $0x8] sm:$0xff] }
 0xd42   :  { %v1393_v7 = vsel %vm181_vm8, %v1363_v6, -inf }
 0xd74   :  { %v1237_v30 = vpop.xlane.xlu2 %1236 }
 0xd75   :  { %v1239_v43 = vsub.f32 %v1230_v58, %v1237_v30 }
 0xd77   :  { %v1242_v2 = vmul.f32 1.442695, %v1239_v43 }
 0xd79   :  { %5404 = vpow2.f32 %v1242_v2  ;;  %v6149_v24 = vpop.f32.mrf.mxu3 }
 0xd7c   :  { %v1366_v15 = vpop.permute.xlu2 %1365 }
 0xd7f   :  { %v5405_v3 = vpop.eup %5404 }
 0xd80   :  { %v1247_v4 = vsel %vm181_vm8, %v5405_v3, 0.0 }
 0xd81   :  { %1248 = vadd.xlane.f32.xlu1 %v1247_v4 }
 0xd84   :  { %v1527_v25 = vpop.permute.xlu2 %1526 }
 0xd89   :  { %1394 = vmax.xlane.f32.xlu1 %v1393_v7 }
 0xda2   :  { %1367 = vrot.lane.b32.xlu1 %v6072_v63, %s7212_s0 }
 0xdaa   :  { %1415 = vrot.lane.b32.xlu1 %v6062_v62, %s7215_s28 }
 0xdb1   :  { %v6153_v22 = vpop.f32.mrf.mxu3 }
 0xdb2   :  { %1500 = vrot.lane.b32.xlu1 %v6062_v62, %s7216_s25 }
 0xdb9   :  { %v6162_v35 = vpop.f32.mrf.mxu2 }
 0xdba   :  { %1498 = vrot.lane.b32.xlu1 %v6062_v62, %s7214_s29 }
 0xdf4   :  { %v1249_v8 = vpop.xlane.xlu1 %1248 }
 0xdf5   :  { %5406 = vrcp.f32 %v1249_v8 }
 0xdfb   :  { %v5407_v9 = vpop.eup %5406 }
 0xdfc   :  { %v1253_v42 = vmul.f32 %v5407_v9, %v5405_v3  ;;  %v1395_v40 = vpop.xlane.xlu1 %1394 }
 0xdfd   :  { %v1399_v10 = vsub.f32 %v1363_v6, %v1395_v40  ;;  %v1825_v6 = vmul.f32 %v6191_v5, %v6191_v5 }
 0xdfe   :  { %5094 = vmatmul.msk.f32.vlgmr.msrb.gmra.mxu1 %vm181_vm8, %v1253_v42 }
 0xdff   :  { %v1401_v11 = vmul.f32 1.442695, %v1399_v10  ;;  %v1829_v8 = vsel %vm98_vm0, %v1825_v6, 0.0 }
 0xe01   :  { %5408 = vpow2.f32 %v1401_v11 }
 0xe07   :  { %v5409_v12 = vpop.eup %5408 }
 0xe08   :  { %v1405_v13 = vsel %vm181_vm8, %v5409_v12, 0.0 }
 0xe09   :  { %1406 = vadd.xlane.f32.xlu0 %v1405_v13 }
 0xe14   :  { %v1368_v14 = vpop.permute.xlu1 %1367 }
 0xe15   :  { %5099 = vmatpush.xpose.msk.msrb.mxu3 %vm181_vm8, %v1368_v14 }
 0xe18   :  { %5100 = vmatmul.msk.f32.vlgmr.msrb.gmra.mxu3 %vm181_vm8, %v1366_v15 }
 0xe19   :  { %1488 = vmatpush.msra.mxu3 %v5077_v32  ;;  %v1816_v32 = vld [vmem:[%s7144_s13] sm:$0xff] }
 0xe1c   :  { %v1416_v17 = vpop.permute.xlu1 %1415 }
 0xe1d   :  { %1528 = vrot.lane.b32.xlu0 %v6072_v63, %s7216_s25  ;;  %1436 = vmatpush.msra.mxu1 %v1416_v17 }
 0xe24   :  { %v1501_v18 = vpop.permute.xlu1 %1500 }
 0xe25   :  { %5105 = vmatpush.xpose.msk.msrb.mxu1 %vm181_vm8, %v1501_v18 }
 0xe2c   :  { %v1499_v27 = vpop.permute.xlu1 %1498 }
 0xe7b   :  { %v1303_v21 = vpop.f32.mrf.mxu1 }
 0xe7c   :  { %5096 = vmatmul.msk.f32.gmra.mxu2 %vm181_vm8, %v1303_v21  ;;  %v1407_v48 = vpop.xlane.xlu0 %1406 }
 0xe7d   :  { %5410 = vrcp.f32 %v1407_v48 }
 0xe83   :  { %v5411_v23 = vpop.eup %5410 }
 0xe84   :  { %v1413_v52 = vmul.f32 %v5411_v23, %v5409_v12 }
 0xe86   :  { %5101 = vmatmul.msk.f32.vlgmr.msra.gmra.mxu1 %vm181_vm8, %v1413_v52 }
 0xe8e   :  { %5106 = vmatmul.msk.f32.vlgmr.msrb.gmra.mxu1 %vm181_vm8, %v1499_v27  ;;  %v1819_v27 = vld [vmem:[%s7144_s13 + $0x18] sm:$0xff] }
 0xe8f   :  { %v1529_v28 = vpop.permute.xlu0 %1528 }
 0xe90   :  { %5107 = vmatpush.xpose.msk.msrb.mxu2 %vm181_vm8, %v1529_v28  ;;  %v5337_v28 = vld [vmem:[%s7143_s12] ss:$0 sm:$0xff] }
 0xe93   :  { %5108 = vmatmul.msk.f32.vlgmr.msrb.gmra.mxu2 %vm181_vm8, %v1527_v25 }
 0xe9b   :  { %v1390_v29 = vpop.f32.mrf.mxu3 }
 0xe9c   :  { %v1391_v0 = vadd.f32 %v1390_v29, %v5924_v20  ;;  %v1818_v29 = vld [vmem:[%s7144_s13 + $0x10] sm:$0xff] }
 0xe9e   :  { %v1396_v34 = vsel %vm181_vm8, %v1391_v0, -inf }
 0xe9f   :  { %1397 = vmax.xlane.f32.xlu1 %v1396_v34 }
 0xeff   :  { %v6165_v36 = vpop.f32.mrf.mxu2 }
 0xf03   :  { %v1438_v33 = vpop.f32.mrf.mxu1 }
 0xf04   :  { %5103 = vmatmul.msk.f32.vlgmr.msra.gmra.mxu3 %vm181_vm8, %v1438_v33 }
 0xf0b   :  { %v1523_v1 = vpop.f32.mrf.mxu1 }
 0xf0c   :  { %v1524_v37 = vadd.f32 %v1523_v1, %v5938_v31  ;;  %v6176_v31 = vld [vmem:[%s7217_s5] sm:$0xff]  ;;  %v5078_v1 = vld [vmem:[%s7209_s6 + $0x38] sm:$0xff] }
 0xf0d   :  { %v1824_v53 = vmul.f32 %v6176_v31, %v6176_v31  ;;  %1649 = vmatpush.msra.mxu2 %v5078_v1 }
 0xf0e   :  { %v1554_v20 = vsel %vm181_vm8, %v1524_v37, -inf }
 0xf0f   :  { %1555 = vmax.xlane.f32.xlu2 %v1554_v20 }
 0xf12   :  { %v1398_v38 = vpop.xlane.xlu1 %1397 }
 0xf13   :  { %v1400_v39 = vsub.f32 %v1391_v0, %v1398_v38  ;;  %v1817_v0 = vld [vmem:[%s7144_s13 + $0x8] sm:$0xff]  ;;  %s7225_s13 = sld [smem:[#allocation14_spill]] }
 0xf15   :  { %v1403_v41 = vmul.f32 1.442695, %v1400_v39 }
 0xf16   :  { %v1551_v44 = vpop.f32.mrf.mxu2 }
 0xf17   :  { %5412 = vpow2.f32 %v1403_v41  ;;  %v1552_v45 = vadd.f32 %v1551_v44, %v5948_v47  ;;  %v1826_v47 = vsel %vm98_vm0, %v1824_v53, 0.0 }
 0xf19   :  { %v1557_v46 = vsel %vm181_vm8, %v1552_v45, -inf }
 0xf1a   :  { %1558 = vmax.xlane.f32.xlu0 %v1557_v46 }
 0xf1d   :  { %v5413_v50 = vpop.eup %5412 }
 0xf1e   :  { %v1408_v51 = vsel %vm181_vm8, %v5413_v50, 0.0 }
 0xf1f   :  { %1409 = vadd.xlane.f32.xlu1 %v1408_v51 }
 0xf38   :  { %1441 = vrot.lane.b32.xlu1 %v6072_v63, %s7215_s28 }
 0xf62   :  { %1827 = vadd.xlane.f32.xlu1 %v1826_v47 }
 0xf82   :  { %v1556_v54 = vpop.xlane.xlu2 %1555 }
 0xf83   :  { %v1560_v55 = vsub.f32 %v1524_v37, %v1556_v54 }
 0xf85   :  { %v1562_v56 = vmul.f32 1.442695, %v1560_v55 }
 0xf87   :  { %5414 = vpow2.f32 %v1562_v56 }
 0xf8d   :  { %v5415_v57 = vpop.eup %5414  ;;  %v1559_v58 = vpop.xlane.xlu0 %1558 }
 0xf8e   :  { %v1561_v49 = vsub.f32 %v1552_v45, %v1559_v58  ;;  %v1566_v59 = vsel %vm181_vm8, %v5415_v57, 0.0  ;;  %v1174_v58 = vadd.f32 %v6149_v24, %v6030_v19 }
 0xf8f   :  { %1567 = vadd.xlane.f32.xlu2 %v1566_v59 }
 0xf90   :  { %v1564_v60 = vmul.f32 1.442695, %v1561_v49  ;;  %v1490_v49 = vpop.f32.mrf.mxu3  ;;  %v1335_v59 = vadd.f32 %v6162_v35, %v1174_v58  ;;  %v5117_v58 = vld [vmem:[%s7141_s10 + $0x40] sm:$0xff] }
 0xf92   :  { %5416 = vpow2.f32 %v1564_v60  ;;  %v1410_v43 = vpop.xlane.xlu1 %1409  ;;  %v1496_v60 = vadd.f32 %v1490_v49, %v1335_v59 }
 0xf93   :  { %5418 = vrcp.f32 %v1410_v43 }
 0xf98   :  { %v5417_v61 = vpop.eup %5416 }
 0xf99   :  { %v1569_v30 = vsel %vm181_vm8, %v5417_v61, 0.0  ;;  %v5419_v2 = vpop.eup %5418 }
 0xf9a   :  { %1570 = vadd.xlane.f32.xlu0 %v1569_v30  ;;  %v1414_v3 = vmul.f32 %v5419_v2, %v5413_v50 }
 0xfa7   :  { %1576 = vrot.lane.b32.xlu2 %v6062_v62, %s7218_s27 }
 0xfaa   :  { %v1442_v4 = vpop.permute.xlu1 %1441 }
 0xfab   :  { %1462 = vmatpush.msrb.mxu0 %v1442_v4 }
 0xfac   :  { %5102 = vmatmul.msk.f32.vlgmr.msrb.gmra.mxu0 %vm181_vm8, %v1414_v3  ;;  %v1175_v3 = vadd.f32 %v6153_v22, %v6036_v26  ;;  %v5116_v26 = vld [vmem:[%s7140_s9 + $0x38] sm:$0xff]  ;;  %v5115_v22 = vld [vmem:[%s7140_s9 + $0x30] sm:$0xff] }
 0xfae   :  { %1602 = vrot.lane.b32.xlu0 %v6072_v63, %s7218_s27  ;;  %v1336_v6 = vadd.f32 %v6165_v36, %v1175_v3  ;;  %v5114_v36 = vld [vmem:[%s7140_s9 + $0x28] sm:$0xff] }
 0xfd0   :  { %1830 = vadd.xlane.f32.xlu2 %v1829_v8 }
 0xfd5   :  { %v1828_v7 = vpop.xlane.xlu1 %1827 }
 0xfd6   :  { %v1832_v62 = vmul.f32 %v1828_v7, %v5783_v16 }
 0xfd8   :  { %v1834_v9 = vadd.f32 1e-06, %v1832_v62 }
 0xfda   :  { %5420 = vrsqrt.f32 %v1834_v9  ;;  %vm1842_vm7 = vweird.f32 %v1834_v9 }
 0xfe0   :  { %v5421_v40 = vpop.eup %5420 }
 0xfe1   :  { %v1837_v12 = vmul.f32 %v5421_v40, %v1834_v9  ;;  %vm1843_vm9 = vweird.f32 %v5421_v40  ;;  %v5113_v9 = vld [vmem:[%s7140_s9 + $0x20] sm:$0xff] }
 0xfe2   :  { %vm1844_vm10 = vmor %vm1842_vm7, %vm1843_vm9 }
 0xfe3   :  { %v1838_v13 = vmul.f32 %v5421_v40, %v1837_v12 }
 0xfe5   :  { %v1839_v14 = vmul.f32 0.5, %v1838_v13 }
 0xfe7   :  { %v1840_v17 = vsub.f32 1.5, %v1839_v14 }
 0xfe9   :  { %v1841_v18 = vmul.f32 %v5421_v40, %v1840_v17 }
 0xfeb   :  { %v1845_v48 = vsel %vm1844_vm10, %v5421_v40, %v1841_v18 }
 0xfec   :  { %v1856_v25 = vmul.f32 %v1845_v48, %v6176_v31 }
 0xfee   :  { %v1859_v34 = vmul.f32 %v5337_v28, %v1856_v25 }
0x1002   :  { %v1568_v42 = vpop.xlane.xlu2 %1567 }
0x1003   :  { %5422 = vrcp.f32 %v1568_v42 }
0x1009   :  { %v5423_v63 = vpop.eup %5422 }
0x100a   :  { %v1574_v10 = vmul.f32 %v5423_v63, %v5415_v57  ;;  %v1577_v11 = vpop.permute.xlu2 %1576  ;;  %v6272_v63 = vld [vmem:[%s7222_s21] sm:$0xff] }
0x100b   :  { %1597 = vmatpush.msra.mxu0 %v1577_v11 }
0x100c   :  { %5109 = vmatmul.msk.f32.vlgmr.msra.gmra.mxu0 %vm181_vm8, %v1574_v10 }
0x100d   :  { %v1571_v15 = vpop.xlane.xlu0 %1570  ;;  %1729 = vmatpush.msrb.mxu0 %v5116_v26 }
0x100e   :  { %5424 = vrcp.f32 %v1571_v15 }
0x100f   :  { %1730 = vmatpush.msrb.mxu0 %v5115_v22 }
0x1011   :  { %1731 = vmatpush.msrb.mxu0 %v5114_v36 }
0x1013   :  { %1732 = vmatpush.msrb.mxu0 %v5113_v9 }
0x1014   :  { %v5425_v21 = vpop.eup %5424 }
0x1015   :  { %v1575_v23 = vmul.f32 %v5425_v21, %v5417_v61 }
0x1020   :  { %v1603_v52 = vpop.permute.xlu0 %1602 }
0x1021   :  { %1623 = vmatpush.msra.mxu1 %v1603_v52  ;;  %v5338_v52 = vld [vmem:[%s7139_s8 + $0x1] ss:$0 sm:$0xff]  ;;  %s7226_s8 = sld [smem:[#allocation13_spill]] }
0x1022   :  { %5110 = vmatmul.msk.f32.vlgmr.msra.gmra.mxu1 %vm181_vm8, %v1575_v23 }
0x1023   :  { %1879 = vmatpush.msrb.mxu1 %v1819_v27 }
0x1025   :  { %1880 = vmatpush.msrb.mxu1 %v1818_v29 }
0x1027   :  { %1881 = vmatpush.msrb.mxu1 %v1817_v0 }
0x1029   :  { %v1464_v33 = vpop.f32.mrf.mxu0  ;;  %1882 = vmatpush.msrb.mxu1 %v1816_v32 }
0x102a   :  { %5104 = vmatmul.msk.f32.gmra.mxu3 %vm181_vm8, %v1464_v33  ;;  %5129 = vmatmul.msk.f32.vlgmr.msrb.gmra.mxu1 %vm98_vm0, %v1859_v34 }
0x1043   :  { %v1831_v37 = vpop.xlane.xlu2 %1830 }
0x1044   :  { %v1833_v20 = vmul.f32 %v1831_v37, %v5783_v16 }
0x1046   :  { %v1835_v38 = vadd.f32 1e-06, %v1833_v20 }
0x1048   :  { %5426 = vrsqrt.f32 %v1835_v38  ;;  %vm1852_vm11 = vweird.f32 %v1835_v38 }
0x104e   :  { %v5427_v39 = vpop.eup %5426 }
0x104f   :  { %v1847_v41 = vmul.f32 %v5427_v39, %v1835_v38  ;;  %vm1853_vm12 = vweird.f32 %v5427_v39 }
0x1050   :  { %vm1854_vm13 = vmor %vm1852_vm11, %vm1853_vm12 }
0x1051   :  { %v1848_v44 = vmul.f32 %v5427_v39, %v1847_v41 }
0x1053   :  { %v1849_v45 = vmul.f32 0.5, %v1848_v44 }
0x1055   :  { %v1850_v46 = vsub.f32 1.5, %v1849_v45 }
0x1057   :  { %v1851_v50 = vmul.f32 %v5427_v39, %v1850_v46 }
0x1059   :  { %v1855_v51 = vsel %vm1854_vm13, %v5427_v39, %v1851_v50  ;;  %v5124_v50 = vld [vmem:[%s7141_s10 + $0x78] sm:$0xff] }
0x105a   :  { %v1857_v47 = vmul.f32 %v1855_v51, %v6191_v5  ;;  %v5123_v51 = vld [vmem:[%s7141_s10 + $0x70] sm:$0xff]  ;;  %1756 = vmatpush.msrb.mxu3 %v5124_v50  ;;  %v1821_v50 = vld [vmem:[%s7145_s14 + $0x8] sm:$0xff] }
0x105c   :  { %v1860_v54 = vmul.f32 %v5337_v28, %v1857_v47  ;;  %1757 = vmatpush.msrb.mxu3 %v5123_v51  ;;  %v5121_v47 = vld [vmem:[%s7141_s10 + $0x60] sm:$0xff] }
0x105e   :  { %5130 = vmatmul.msk.f32.gmra.mxu1 %vm98_vm0, %v1860_v54  ;;  %v5120_v54 = vld [vmem:[%s7141_s10 + $0x58] sm:$0xff] }
0x1089   :  { %v1599_v53 = vpop.f32.mrf.mxu0 }
0x108a   :  { %5111 = vmatmul.msk.f32.vlgmr.msra.gmra.mxu2 %vm181_vm8, %v1599_v53  ;;  %v5122_v53 = vld [vmem:[%s7141_s10 + $0x68] sm:$0xff] }
0x108b   :  { %1758 = vmatpush.msrb.mxu3 %v5122_v53 }
0x108d   :  { %1759 = vmatpush.msrb.mxu3 %v5121_v47  ;;  %v83_v47 = vld [vmem:[%s7222_s21 + $0x10] sm:$0xff] }
0x108f   :  { %1760 = vmatpush.msrb.mxu3 %v5120_v54 }
0x109f   :  { %v1625_v55 = vpop.f32.mrf.mxu1 }
0x10a0   :  { %5112 = vmatmul.msk.f32.gmra.mxu2 %vm181_vm8, %v1625_v55  ;;  %v5119_v55 = vld [vmem:[%s7141_s10 + $0x50] sm:$0xff] }
0x10a1   :  { %1761 = vmatpush.msrb.mxu3 %v5119_v55 }
0x10a7   :  { %v6225_v56 = vpop.f32.mrf.mxu1 }
0x10a8   :  { %1891 = vrot.lane.b32.xlu2 %v6225_v56, %s7219_s19 }
0x10ad   :  { %v1493_v4 = vpop.f32.mrf.mxu3 }
0x10ae   :  { %v1497_v19 = vadd.f32 %v1493_v4, %v1336_v6 }
0x10db   :  { %v6245_v35 = vpop.f32.mrf.mxu1 }
0x1102   :  { %v1892_v57 = vpop.permute.xlu2 %1891 }
0x1103   :  { %5131 = vmatpush.xpose.msk.msrb.mxu2 %vm181_vm8, %v1892_v57  ;;  %v5118_v57 = vld [vmem:[%s7141_s10 + $0x48] sm:$0xff]  ;;  %s7224_s10 = sld [smem:[#allocation15_spill]] }
0x1104   :  { %1762 = vmatpush.msrb.mxu3 %v5118_v57 }
0x1106   :  { %5132 = vmatmul.msk.f32.vlgmr.msrb.gmra.mxu2 %vm181_vm8, %v6225_v56  ;;  %1763 = vmatpush.msrb.mxu3 %v5117_v58 }
0x110d   :  { %v1651_v61 = vpop.f32.mrf.mxu2 }
0x110e   :  { %v6235_v30 = vadd.f32 %v1651_v61, %v1496_v60 }
0x1110   :  { %v1674_v43 = vmul.f32 %v6235_v30, %v6235_v30 }
0x1112   :  { %v1676_v2 = vsel %vm98_vm0, %v1674_v43, 0.0 }
0x1113   :  { %1677 = vadd.xlane.f32.xlu0 %v1676_v2 }
0x1123   :  { %v1654_v24 = vpop.f32.mrf.mxu2 }
0x1124   :  { %v6243_v7 = vadd.f32 %v1654_v24, %v1497_v19 }
0x1126   :  { %v1675_v8 = vmul.f32 %v6243_v7, %v6243_v7 }
0x1127   :  { %1918 = vrot.lane.b32.xlu0 %v6245_v35, %s7219_s19 }
0x1128   :  { %v1679_v62 = vsel %vm98_vm0, %v1675_v8, 0.0 }
0x1129   :  { %1680 = vadd.xlane.f32.xlu1 %v1679_v62  ;;  %v82_v62 = vld [vmem:[%s7222_s21 + $0x8] sm:$0xff] }
0x112f   :  { %2049 = vrot.lane.b32.xlu0 %v6225_v56, %s7220_s22 }
0x1142   :  { %2051 = vrot.lane.b32.xlu1 %v6225_v56, %s7221_s3 }
0x1186   :  { %v1678_v42 = vpop.xlane.xlu0 %1677 }
0x1187   :  { %v1682_v40 = vmul.f32 %v1678_v42, %v5783_v16 }
0x1189   :  { %v1684_v10 = vadd.f32 1e-06, %v1682_v40  ;;  %v1914_v11 = vpop.f32.mrf.mxu2 }
0x118a   :  { %v1915_v12 = vadd.f32 %v1914_v11, %v6272_v63 }
0x118b   :  { %5428 = vrsqrt.f32 %v1684_v10  ;;  %vm1692_vm1 = vweird.f32 %v1684_v10 }
0x118c   :  { %v1944_v13 = vsel %vm181_vm8, %v1915_v12, -inf }
0x118d   :  { %1945 = vmax.xlane.f32.xlu2 %v1944_v13 }
0x1191   :  { %v5429_v14 = vpop.eup %5428 }
0x1192   :  { %v1687_v15 = vmul.f32 %v5429_v14, %v1684_v10  ;;  %vm1693_vm14 = vweird.f32 %v5429_v14 }
0x1193   :  { %vm1694_vm2 = vmor %vm1692_vm1, %vm1693_vm14 }
0x1194   :  { %v1688_v17 = vmul.f32 %v5429_v14, %v1687_v15 }
0x1196   :  { %v1689_v18 = vmul.f32 0.5, %v1688_v17 }
0x1198   :  { %v1690_v21 = vsub.f32 1.5, %v1689_v18 }
0x1199   :  { %v1919_v48 = vpop.permute.xlu0 %1918 }
0x119a   :  { %v1691_v23 = vmul.f32 %v5429_v14, %v1690_v21  ;;  %5133 = vmatpush.xpose.msk.msra.mxu0 %vm181_vm8, %v1919_v48 }
0x119c   :  { %v1695_v27 = vsel %vm1694_vm2, %v5429_v14, %v1691_v23  ;;  %v1681_v28 = vpop.xlane.xlu1 %1680 }
0x119d   :  { %v1706_v25 = vmul.f32 %v1695_v27, %v6235_v30  ;;  %v1683_v29 = vmul.f32 %v1681_v28, %v5783_v16  ;;  %v1820_v28 = vld [vmem:[%s7145_s14] sm:$0xff] }
0x119e   :  { %2039 = vmatpush.msra.mxu2 %v1820_v28 }
0x119f   :  { %v1685_v0 = vadd.f32 1e-06, %v1683_v29  ;;  %v1709_v34 = vmul.f32 %v5338_v52, %v1706_v25 }
0x11a1   :  { %5430 = vrsqrt.f32 %v1685_v0  ;;  %5125 = vmatmul.msk.f32.vlgmr.msrb.gmra.mxu0 %vm98_vm0, %v1709_v34  ;;  %vm1702_vm4 = vweird.f32 %v1685_v0  ;;  %v2050_v46 = vpop.permute.xlu0 %2049 }
0x11a7   :  { %v5431_v32 = vpop.eup %5430 }
0x11a8   :  { %v1697_v33 = vmul.f32 %v5431_v32, %v1685_v0  ;;  %vm1703_vm3 = vweird.f32 %v5431_v32 }
0x11a9   :  { %vm1704_vm5 = vmor %vm1702_vm4, %vm1703_vm3 }
0x11aa   :  { %v1698_v1 = vmul.f32 %v5431_v32, %v1697_v33 }
0x11ac   :  { %v1699_v37 = vmul.f32 0.5, %v1698_v1 }
0x11ae   :  { %v1700_v20 = vsub.f32 1.5, %v1699_v37 }
0x11b0   :  { %v1701_v38 = vmul.f32 %v5431_v32, %v1700_v20 }
0x11b2   :  { %v1705_v39 = vsel %vm1704_vm5, %v5431_v32, %v1701_v38 }
0x11b3   :  { %v1707_v41 = vmul.f32 %v1705_v39, %v6243_v7 }
0x11b4   :  { %v2052_v44 = vpop.permute.xlu1 %2051 }
0x11b5   :  { %5139 = vmatpush.xpose.msk.msrb.mxu0 %vm181_vm8, %v2052_v44  ;;  %v1710_v45 = vmul.f32 %v5338_v52, %v1707_v41 }
0x11b7   :  { %5126 = vmatmul.msk.f32.gmra.mxu0 %vm98_vm0, %v1710_v45 }
0x11bf   :  { %5134 = vmatmul.msk.f32.vlgmr.msra.gmra.mxu0 %vm181_vm8, %v6245_v35 }
0x11c7   :  { %5140 = vmatmul.msk.f32.vlgmr.msrb.gmra.mxu0 %vm181_vm8, %v2050_v46 }
0x1200   :  { %v1946_v49 = vpop.xlane.xlu2 %1945 }
0x1201   :  { %v1950_v59 = vsub.f32 %v1915_v12, %v1946_v49 }
0x1203   :  { %v1952_v60 = vmul.f32 1.442695, %v1950_v59 }
0x1205   :  { %5432 = vpow2.f32 %v1952_v60 }
0x120b   :  { %v5433_v61 = vpop.eup %5432 }
0x120c   :  { %v1956_v43 = vsel %vm181_vm8, %v5433_v61, 0.0 }
0x120d   :  { %1957 = vadd.xlane.f32.xlu2 %v1956_v43 }
0x121e   :  { %v1734_v2 = vpop.f32.mrf.mxu0 }
0x121f   :  { %v1740_v3 = vmax.f32 %v1734_v2, 0.0 }
0x1221   :  { %5127 = vmatmul.msk.f32.vlgmr.msrb.gmra.mxu3 %vm908_vm15, %v1740_v3 }
0x1225   :  { %2079 = vrot.lane.b32.xlu2 %v6245_v35, %s7221_s3 }
0x122d   :  { %1992 = vrot.lane.b32.xlu2 %v6245_v35, %s7210_s2 }
0x1234   :  { %v1737_v4 = vpop.f32.mrf.mxu0 }
0x1235   :  { %v1741_v6 = vmax.f32 %v1737_v4, 0.0  ;;  %2212 = vrot.lane.b32.xlu2 %v6225_v56, %s7212_s0 }
0x1237   :  { %5128 = vmatmul.msk.f32.gmra.mxu3 %vm908_vm15, %v1741_v6 }
0x123c   :  { %v1941_v19 = vpop.f32.mrf.mxu0 }
0x123d   :  { %v1942_v24 = vadd.f32 %v1941_v19, %v6272_v63 }
0x123f   :  { %v1947_v8 = vsel %vm181_vm8, %v1942_v24, -inf }
0x1240   :  { %1948 = vmax.xlane.f32.xlu1 %v1947_v8 }
0x1244   :  { %v2074_v26 = vpop.f32.mrf.mxu0 }
0x1245   :  { %v2075_v22 = vadd.f32 %v2074_v26, %v82_v62 }
0x1247   :  { %v2105_v36 = vsel %vm181_vm8, %v2075_v22, -inf }
0x1248   :  { %2106 = vmax.xlane.f32.xlu0 %v2105_v36 }
0x1259   :  { %1966 = vrot.lane.b32.xlu1 %v6225_v56, %s7210_s2 }
0x125c   :  { %2077 = vrot.lane.b32.xlu0 %v6245_v35, %s7220_s22 }
0x1280   :  { %v1958_v9 = vpop.xlane.xlu2 %1957 }
0x1288   :  { %v2080_v42 = vpop.permute.xlu2 %2079 }
0x1290   :  { %v1993_v40 = vpop.permute.xlu2 %1992 }
0x1291   :  { %2013 = vmatpush.msra.mxu1 %v1993_v40 }
0x1298   :  { %v2213_v20 = vpop.permute.xlu2 %2212 }
0x12a4   :  { %v6345_v32 = vpop.f32.mrf.mxu3 }
0x12b3   :  { %v1949_v63 = vpop.xlane.xlu1 %1948 }
0x12b4   :  { %v1951_v10 = vsub.f32 %v1942_v24, %v1949_v63 }
0x12b6   :  { %v1954_v11 = vmul.f32 1.442695, %v1951_v10 }
0x12b8   :  { %5434 = vpow2.f32 %v1954_v11 }
0x12ba   :  { %v6347_v38 = vpop.f32.mrf.mxu3 }
0x12bb   :  { %v2107_v12 = vpop.xlane.xlu0 %2106 }
0x12bc   :  { %v2111_v13 = vsub.f32 %v2075_v22, %v2107_v12 }
0x12be   :  { %v5435_v14 = vpop.eup %5434  ;;  %v2113_v15 = vmul.f32 1.442695, %v2111_v13 }
0x12bf   :  { %v1959_v17 = vsel %vm181_vm8, %v5435_v14, 0.0 }
0x12c0   :  { %5436 = vpow2.f32 %v2113_v15  ;;  %1960 = vadd.xlane.f32.xlu0 %v1959_v17 }
0x12c1   :  { %5438 = vrcp.f32 %v1958_v9 }
0x12c6   :  { %v5437_v18 = vpop.eup %5436 }
0x12c7   :  { %v2117_v21 = vsel %vm181_vm8, %v5437_v18, 0.0  ;;  %v5439_v48 = vpop.eup %5438 }
0x12c8   :  { %2118 = vadd.xlane.f32.xlu1 %v2117_v21  ;;  %v1964_v23 = vmul.f32 %v5439_v48, %v5433_v61 }
0x12cb   :  { %v1967_v52 = vpop.permute.xlu1 %1966 }
0x12cc   :  { %1987 = vmatpush.msra.mxu3 %v1967_v52 }
0x12cd   :  { %5135 = vmatmul.msk.f32.vlgmr.msra.gmra.mxu3 %vm181_vm8, %v1964_v23  ;;  %v84_v23 = vld [vmem:[%s7222_s21 + $0x18] sm:$0xff] }
0x12ce   :  { %5141 = vmatpush.xpose.msk.msrb.mxu3 %vm181_vm8, %v2080_v42  ;;  %v2078_v27 = vpop.permute.xlu0 %2077 }
0x12d2   :  { %2200 = vmatpush.msra.mxu3 %v1821_v50 }
0x12d4   :  { %2127 = vrot.lane.b32.xlu0 %v6225_v56, %s7211_s30 }
0x12d5   :  { %5142 = vmatmul.msk.f32.vlgmr.msrb.gmra.mxu3 %vm181_vm8, %v2078_v27 }
0x12dc   :  { %2210 = vrot.lane.b32.xlu0 %v6225_v56, %s7213_s26 }
0x1333   :  { %v1961_v25 = vpop.xlane.xlu0 %1960 }
0x1334   :  { %5440 = vrcp.f32 %v1961_v25 }
0x133a   :  { %v5441_v29 = vpop.eup %5440 }
0x133b   :  { %v1965_v0 = vmul.f32 %v5441_v29, %v5435_v14  ;;  %v2119_v34 = vpop.xlane.xlu1 %2118  ;;  %v1822_v14 = vld [vmem:[%s7145_s14 + $0x10] sm:$0xff] }
0x133c   :  { %5442 = vrcp.f32 %v2119_v34 }
0x133d   :  { %5136 = vmatmul.msk.f32.vlgmr.msra.gmra.mxu1 %vm181_vm8, %v1965_v0 }
0x1342   :  { %v5443_v33 = vpop.eup %5442 }
0x1343   :  { %v2125_v1 = vmul.f32 %v5443_v33, %v5437_v18 }
0x1346   :  { %v2128_v37 = vpop.permute.xlu0 %2127 }
0x1347   :  { %2148 = vmatpush.msrb.mxu1 %v2128_v37 }
0x1348   :  { %5143 = vmatmul.msk.f32.vlgmr.msrb.gmra.mxu1 %vm181_vm8, %v2125_v1 }
0x1349   :  { %5147 = vmatpush.xpose.msk.msra.mxu1 %vm181_vm8, %v2213_v20 }
0x134e   :  { %v2211_v39 = vpop.permute.xlu0 %2210 }
0x1350   :  { %v1989_v41 = vpop.f32.mrf.mxu3  ;;  %5148 = vmatmul.msk.f32.vlgmr.msra.gmra.mxu1 %vm181_vm8, %v2211_v39 }
0x1351   :  { %5137 = vmatmul.msk.f32.vlgmr.msra.gmra.mxu2 %vm181_vm8, %v1989_v41 }
0x1358   :  { %v2102_v44 = vpop.f32.mrf.mxu3 }
0x1359   :  { %v2103_v45 = vadd.f32 %v2102_v44, %v82_v62 }
0x135b   :  { %v2108_v46 = vsel %vm181_vm8, %v2103_v45, -inf }
0x135c   :  { %2109 = vmax.xlane.f32.xlu2 %v2108_v46 }
0x13ba   :  { %v2015_v51 = vpop.f32.mrf.mxu1 }
0x13bb   :  { %5138 = vmatmul.msk.f32.gmra.mxu2 %vm181_vm8, %v2015_v51 }
0x13c5   :  { %v2150_v53 = vpop.f32.mrf.mxu1 }
0x13c6   :  { %5145 = vmatmul.msk.f32.vlgmr.msra.gmra.mxu3 %vm181_vm8, %v2150_v53 }
0x13cd   :  { %v2235_v54 = vpop.f32.mrf.mxu1 }
0x13ce   :  { %v2236_v55 = vadd.f32 %v2235_v54, %v83_v47  ;;  %v1771_v54 = vadd.f32 %v6345_v32, %v6235_v30 }
0x13cf   :  { %v2110_v57 = vpop.xlane.xlu2 %2109 }
0x13d0   :  { %v2112_v58 = vsub.f32 %v2103_v45, %v2110_v57  ;;  %v2266_v49 = vsel %vm181_vm8, %v2236_v55, -inf }
0x13d1   :  { %2267 = vmax.xlane.f32.xlu0 %v2266_v49 }
0x13d2   :  { %v2115_v59 = vmul.f32 1.442695, %v2112_v58 }
0x13d4   :  { %5444 = vpow2.f32 %v2115_v59  ;;  %v6393_v15 = vpop.f32.mrf.mxu2 }
0x13da   :  { %v5445_v60 = vpop.eup %5444 }
0x13db   :  { %v2120_v61 = vsel %vm181_vm8, %v5445_v60, 0.0 }
0x13dc   :  { %2121 = vadd.xlane.f32.xlu1 %v2120_v61 }
0x13e5   :  { %2240 = vrot.lane.b32.xlu0 %v6245_v35, %s7212_s0 }
0x13ed   :  { %2373 = vrot.lane.b32.xlu0 %v6225_v56, %s7216_s25 }
0x13f5   :  { %2153 = vrot.lane.b32.xlu1 %v6245_v35, %s7211_s30  ;;  %2399 = vrot.lane.b32.xlu0 %v6245_v35, %s7214_s29 }
0x13fd   :  { %2288 = vrot.lane.b32.xlu1 %v6225_v56, %s7215_s28 }
0x1405   :  { %2371 = vrot.lane.b32.xlu1 %v6225_v56, %s7214_s29 }
0x143e   :  { %v6395_v17 = vpop.f32.mrf.mxu2 }
0x1444   :  { %v2268_v43 = vpop.xlane.xlu0 %2267 }
0x1445   :  { %v2272_v2 = vsub.f32 %v2236_v55, %v2268_v43  ;;  %v1774_v55 = vmul.f32 %v1771_v54, %v1771_v54 }
0x1447   :  { %v2274_v3 = vmul.f32 1.442695, %v2272_v2  ;;  %v1776_v57 = vsel %vm98_vm0, %v1774_v55, 0.0 }
0x1449   :  { %5446 = vpow2.f32 %v2274_v3  ;;  %v6405_v29 = vpop.f32.mrf.mxu3 }
0x144f   :  { %v5447_v4 = vpop.eup %5446  ;;  %v2122_v24 = vpop.xlane.xlu1 %2121 }
0x1450   :  { %v2278_v6 = vsel %vm181_vm8, %v5447_v4, 0.0  ;;  %5448 = vrcp.f32 %v2122_v24 }
0x1451   :  { %2279 = vadd.xlane.f32.xlu2 %v2278_v6  ;;  %v1772_v6 = vadd.f32 %v6347_v38, %v6243_v7  ;;  %v2538_v7 = vld [vmem:[%s7148_s17 + $0x8] sm:$0xff] }
0x1456   :  { %v5449_v8 = vpop.eup %5448 }
0x1457   :  { %v2241_v19 = vpop.permute.xlu0 %2240  ;;  %v2126_v62 = vmul.f32 %v5449_v8, %v5445_v60 }
0x1458   :  { %5149 = vmatpush.xpose.msk.msrb.mxu2 %vm181_vm8, %v2241_v19  ;;  %v1775_v19 = vmul.f32 %v1772_v6, %v1772_v6 }
0x145a   :  { %v1779_v24 = vsel %vm98_vm0, %v1775_v19, 0.0 }
0x145c   :  { %2361 = vmatpush.msra.mxu2 %v1822_v14 }
0x145f   :  { %v2374_v36 = vpop.permute.xlu0 %2373 }
0x1467   :  { %v2154_v26 = vpop.permute.xlu1 %2153  ;;  %v2400_v13 = vpop.permute.xlu0 %2399 }
0x1468   :  { %2174 = vmatpush.msra.mxu0 %v2154_v26 }
0x1469   :  { %2238 = vrot.lane.b32.xlu2 %v6245_v35, %s7213_s26  ;;  %5144 = vmatmul.msk.f32.vlgmr.msra.gmra.mxu0 %vm181_vm8, %v2126_v62 }
0x146f   :  { %v2289_v22 = vpop.permute.xlu1 %2288 }
0x1470   :  { %2309 = vmatpush.msrb.mxu0 %v2289_v22  ;;  %v2540_v22 = vld [vmem:[%s7148_s17 + $0x18] sm:$0xff] }
0x1471   :  { %2401 = vrot.lane.b32.xlu2 %v6245_v35, %s7216_s25 }
0x1472   :  { %5155 = vmatpush.xpose.msk.msra.mxu0 %vm181_vm8, %v2374_v36  ;;  %v2539_v36 = vld [vmem:[%s7148_s17 + $0x10] sm:$0xff] }
0x1477   :  { %v2372_v11 = vpop.permute.xlu1 %2371 }
0x14c4   :  { %v2280_v9 = vpop.xlane.xlu2 %2279 }
0x14c5   :  { %5450 = vrcp.f32 %v2280_v9  ;;  %v1823_v9 = vld [vmem:[%s7145_s14 + $0x18] sm:$0xff] }
0x14cb   :  { %v5451_v42 = vpop.eup %5450 }
0x14cc   :  { %v2286_v40 = vmul.f32 %v5451_v42, %v5447_v4  ;;  %v2239_v63 = vpop.permute.xlu2 %2238 }
0x14cd   :  { %5150 = vmatmul.msk.f32.vlgmr.msrb.gmra.mxu2 %vm181_vm8, %v2239_v63 }
0x14ce   :  { %5151 = vmatmul.msk.f32.vlgmr.msrb.gmra.mxu0 %vm181_vm8, %v2286_v40  ;;  %2629 = vmatpush.msrb.mxu2 %v2540_v22  ;;  %v5340_v22 = vld [vmem:[%s7146_s15] ss:$0 sm:$0xff] }
0x14d0   :  { %2630 = vmatpush.msrb.mxu2 %v2539_v36 }
0x14d2   :  { %2631 = vmatpush.msrb.mxu2 %v2538_v7 }
0x14d4   :  { %v2402_v10 = vpop.permute.xlu2 %2401 }
0x14d5   :  { %5157 = vmatpush.xpose.msk.msrb.mxu3 %vm181_vm8, %v2402_v10 }
0x14d6   :  { %5156 = vmatmul.msk.f32.vlgmr.msra.gmra.mxu0 %vm181_vm8, %v2372_v11 }
0x14d9   :  { %2522 = vmatpush.msra.mxu3 %v1823_v9 }
0x14e6   :  { %v2176_v12 = vpop.f32.mrf.mxu0 }
0x14e7   :  { %5146 = vmatmul.msk.f32.gmra.mxu3 %vm181_vm8, %v2176_v12 }
0x14ef   :  { %5158 = vmatmul.msk.f32.vlgmr.msrb.gmra.mxu3 %vm181_vm8, %v2400_v13 }
0x154b   :  { %v2311_v18 = vpop.f32.mrf.mxu0 }
0x154c   :  { %5153 = vmatmul.msk.f32.vlgmr.msra.gmra.mxu2 %vm181_vm8, %v2311_v18  ;;  %v5339_v18 = vld [vmem:[%s7142_s11] ss:$0 sm:$0xff]  ;;  %s7228_s11 = sld [smem:[#allocation18_spill]] }
0x1550   :  { %v2263_v21 = vpop.f32.mrf.mxu2 }
0x1551   :  { %v2264_v48 = vadd.f32 %v2263_v21, %v83_v47 }
0x1552   :  { %s5024_s7 = sshll.u32 %s7228_s11, 4  ;;  %s5025_s7 = int_to_ptr.hbm [resolvable:$true] %s5024_s7 }
0x1553   :  { %v2396_v52 = vpop.f32.mrf.mxu0  ;;  %v2269_v27 = vsel %vm181_vm8, %v2264_v48, -inf }
0x1554   :  { %v2397_v28 = vadd.f32 %v2396_v52, %v84_v23  ;;  %2270 = vmax.xlane.f32.xlu1 %v2269_v27 }
0x1556   :  { %v2427_v25 = vsel %vm181_vm8, %v2397_v28, -inf }
0x1557   :  { %2428 = vmax.xlane.f32.xlu2 %v2427_v25 }
0x156a   :  { %v6407_v20 = vpop.f32.mrf.mxu3 }
0x156f   :  { %2314 = vrot.lane.b32.xlu2 %v6245_v35, %s7215_s28 }
0x1572   :  { %v2424_v51 = vpop.f32.mrf.mxu3 }
0x1573   :  { %v2425_v53 = vadd.f32 %v2424_v51, %v84_v23 }
0x1575   :  { %v2430_v47 = vsel %vm181_vm8, %v2425_v53, -inf }
0x15c7   :  { %v2271_v0 = vpop.xlane.xlu1 %2270 }
0x15c8   :  { %v2273_v34 = vsub.f32 %v2264_v48, %v2271_v0 }
0x15ca   :  { %v2276_v33 = vmul.f32 1.442695, %v2273_v34  ;;  %v2429_v1 = vpop.xlane.xlu2 %2428 }
0x15cb   :  { %v2433_v37 = vsub.f32 %v2397_v28, %v2429_v1 }
0x15cc   :  { %5452 = vpow2.f32 %v2276_v33 }
0x15cd   :  { %v2435_v39 = vmul.f32 1.442695, %v2433_v37 }
0x15cf   :  { %5454 = vpow2.f32 %v2435_v39  ;;  %v2363_v51 = vpop.f32.mrf.mxu2 }
0x15d2   :  { %v5453_v41 = vpop.eup %5452  ;;  %v2315_v44 = vpop.permute.xlu2 %2314 }
0x15d3   :  { %2335 = vmatpush.msrb.mxu1 %v2315_v44  ;;  %v2281_v45 = vsel %vm181_vm8, %v5453_v41, 0.0 }
0x15d4   :  { %2282 = vadd.xlane.f32.xlu0 %v2281_v45 }
0x15d5   :  { %v5455_v46 = vpop.eup %5454 }
0x15d6   :  { %v2439_v50 = vsel %vm181_vm8, %v5455_v46, 0.0 }
0x15d7   :  { %2440 = vadd.xlane.f32.xlu1 %v2439_v50 }
0x15df   :  { %2431 = vmax.xlane.f32.xlu1 %v2430_v47  ;;  %v2047_v47 = vadd.f32 %v6393_v15, %v6176_v31  ;;  %v2536_v15 = vld [vmem:[%s7147_s16 + $0x18] sm:$0xff] }
0x15e8   :  { %2449 = vrot.lane.b32.xlu0 %v6225_v56, %s7218_s27 }
0x1612   :  { %1777 = vadd.xlane.f32.xlu0 %v1776_v57 }
0x1647   :  { %v2283_v58 = vpop.xlane.xlu0 %2282 }
0x1648   :  { %5456 = vrcp.f32 %v2283_v58 }
0x164a   :  { %v2441_v49 = vpop.xlane.xlu1 %2440 }
0x164b   :  { %5458 = vrcp.f32 %v2441_v49 }
0x164e   :  { %v5457_v59 = vpop.eup %5456 }
0x164f   :  { %v2287_v60 = vmul.f32 %v5457_v59, %v5453_v41 }
0x1651   :  { %5152 = vmatmul.msk.f32.vlgmr.msrb.gmra.mxu1 %vm181_vm8, %v2287_v60  ;;  %v5459_v3 = vpop.eup %5458 }
0x1652   :  { %v2432_v61 = vpop.xlane.xlu1 %2431  ;;  %v2447_v56 = vmul.f32 %v5459_v3, %v5455_v46 }
0x1653   :  { %v2434_v43 = vsub.f32 %v2425_v53, %v2432_v61 }
0x1655   :  { %v2437_v2 = vmul.f32 1.442695, %v2434_v43  ;;  %v2534_v43 = vld [vmem:[%s7147_s16 + $0x8] sm:$0xff] }
0x1657   :  { %5460 = vpow2.f32 %v2437_v2  ;;  %v2533_v2 = vld [vmem:[%s7147_s16] sm:$0xff] }
0x165a   :  { %v2450_v4 = vpop.permute.xlu0 %2449 }
0x165b   :  { %2470 = vmatpush.msra.mxu1 %v2450_v4 }
0x165c   :  { %5159 = vmatmul.msk.f32.vlgmr.msra.gmra.mxu1 %vm181_vm8, %v2447_v56 }
0x165d   :  { %v5461_v30 = vpop.eup %5460  ;;  %2600 = vmatpush.msrb.mxu1 %v2536_v15 }
0x165e   :  { %v2442_v32 = vsel %vm181_vm8, %v5461_v30, 0.0 }
0x165f   :  { %2443 = vadd.xlane.f32.xlu1 %v2442_v32 }
0x1678   :  { %2475 = vrot.lane.b32.xlu1 %v6245_v35, %s7218_s27  ;;  %v2537_v35 = vld [vmem:[%s7148_s17] sm:$0xff] }
0x1679   :  { %2632 = vmatpush.msrb.mxu2 %v2537_v35 }
0x1685   :  { %v1778_v8 = vpop.xlane.xlu0 %1777 }
0x1686   :  { %v1782_v62 = vmul.f32 %v1778_v8, %v5783_v16 }
0x1688   :  { %v1784_v26 = vadd.f32 1e-06, %v1782_v62 }
0x168a   :  { %5462 = vrsqrt.f32 %v1784_v26  ;;  %vm1792_vm7 = vweird.f32 %v1784_v26 }
0x1690   :  { %v5463_v38 = vpop.eup %5462 }
0x1691   :  { %v1787_v42 = vmul.f32 %v5463_v38, %v1784_v26  ;;  %vm1793_vm6 = vweird.f32 %v5463_v38 }
0x1692   :  { %vm1794_vm9 = vmor %vm1792_vm7, %vm1793_vm6 }
0x1693   :  { %v1788_v40 = vmul.f32 %v5463_v38, %v1787_v42 }
0x1695   :  { %v1789_v63 = vmul.f32 0.5, %v1788_v40 }
0x1697   :  { %v1790_v10 = vsub.f32 1.5, %v1789_v63 }
0x1699   :  { %v1791_v11 = vmul.f32 %v5463_v38, %v1790_v10 }
0x169b   :  { %v1795_v12 = vsel %vm1794_vm9, %v5463_v38, %v1791_v11 }
0x169c   :  { %v1806_v14 = vmul.f32 %v1795_v12, %v1771_v54  ;;  %v2208_v54 = vadd.f32 %v6405_v29, %v2047_v47  ;;  %v2535_v29 = vld [vmem:[%s7147_s16 + $0x10] sm:$0xff] }
0x169d   :  { %2601 = vmatpush.msrb.mxu1 %v2535_v29 }
0x169e   :  { %v6445_v21 = vmul.f32 %v5339_v18, %v1806_v14  ;;  %v2369_v57 = vadd.f32 %v2363_v51, %v2208_v54  ;;  %v6534_v54 = vld [vmem:[%s7207_s1 + $0x1] ss:$0 sm:$0xff] }
0x169f   :  { %2602 = vmatpush.msrb.mxu1 %v2534_v43 }
0x16a1   :  { %2603 = vmatpush.msrb.mxu1 %v2533_v2 }
0x16a2   :  { %1780 = vadd.xlane.f32.xlu1 %v1779_v24  ;;  %v2048_v24 = vadd.f32 %v6395_v17, %v6191_v5 }
0x16a4   :  { %v2209_v62 = vadd.f32 %v6407_v20, %v2048_v24 }
0x16ce   :  { %v2337_v13 = vpop.f32.mrf.mxu1 }
0x16cf   :  { %5154 = vmatmul.msk.f32.gmra.mxu2 %vm181_vm8, %v2337_v13 }
0x16d2   :  { %v2444_v23 = vpop.xlane.xlu1 %2443 }
0x16d3   :  { %5464 = vrcp.f32 %v2444_v23 }
0x16d7   :  { %5165 = vmatmul.msk.f32.vlgmr.msrb.gmra.mxu2 %vm98_vm0, %v6445_v21 }
0x16d9   :  { %v2472_v48 = vpop.f32.mrf.mxu1  ;;  %v5465_v52 = vpop.eup %5464 }
0x16da   :  { %5161 = vmatmul.msk.f32.vlgmr.msra.gmra.mxu3 %vm181_vm8, %v2472_v48  ;;  %v2448_v27 = vmul.f32 %v5465_v52, %v5461_v30 }
0x16ea   :  { %v2476_v28 = vpop.permute.xlu1 %2475 }
0x16eb   :  { %2496 = vmatpush.msrb.mxu0 %v2476_v28 }
0x16ec   :  { %5160 = vmatmul.msk.f32.vlgmr.msrb.gmra.mxu0 %vm181_vm8, %v2448_v27 }
0x1715   :  { %v1781_v25 = vpop.xlane.xlu1 %1780 }
0x1716   :  { %v1783_v0 = vmul.f32 %v1781_v25, %v5783_v16 }
0x1718   :  { %v1785_v34 = vadd.f32 1e-06, %v1783_v0 }
0x171a   :  { %5466 = vrsqrt.f32 %v1785_v34  ;;  %vm1802_vm11 = vweird.f32 %v1785_v34 }
0x1720   :  { %v5467_v33 = vpop.eup %5466 }
0x1721   :  { %v1797_v1 = vmul.f32 %v5467_v33, %v1785_v34  ;;  %vm1803_vm10 = vweird.f32 %v5467_v33 }
0x1722   :  { %vm1804_vm12 = vmor %vm1802_vm11, %vm1803_vm10 }
0x1723   :  { %v1798_v37 = vmul.f32 %v5467_v33, %v1797_v1 }
0x1725   :  { %v1799_v39 = vmul.f32 0.5, %v1798_v37 }
0x1727   :  { %v1800_v41 = vsub.f32 1.5, %v1799_v39 }
0x1729   :  { %v1801_v44 = vmul.f32 %v5467_v33, %v1800_v41 }
0x172b   :  { %v1805_v45 = vsel %vm1804_vm12, %v5467_v33, %v1801_v44  ;;  %v6516_v33 = vld [vmem:[%s7207_s1] ss:$0 sm:$0xff] }
0x172c   :  { %v1807_v46 = vmul.f32 %v1805_v45, %v1772_v6 }
0x172e   :  { %v6452_v50 = vmul.f32 %v5339_v18, %v1807_v46 }
0x1730   :  { %5166 = vmatmul.msk.f32.gmra.mxu2 %vm98_vm0, %v6452_v50 }
0x1752   :  { %v2366_v53 = vpop.f32.mrf.mxu2 }
0x1753   :  { %v2370_v36 = vadd.f32 %v2366_v53, %v2209_v62 }
0x175a   :  { %v6459_v55 = vpop.f32.mrf.mxu2 }
0x175b   :  { %5167 = vmatpush.xpose.msk.msra.mxu0 %vm181_vm8, %v6459_v55 }
0x175d   :  { %v2524_v58 = vpop.f32.mrf.mxu3 }
0x175e   :  { %v6463_v49 = vadd.f32 %v2524_v58, %v2369_v57 }
0x1760   :  { %v2545_v59 = vmul.f32 %v6463_v49, %v6463_v49 }
0x1762   :  { %v2547_v60 = vsel %vm98_vm0, %v2545_v59, 0.0 }
0x1763   :  { %2548 = vadd.xlane.f32.xlu2 %v2547_v60 }
0x1769   :  { %v2498_v61 = vpop.f32.mrf.mxu0 }
0x176a   :  { %5162 = vmatmul.msk.f32.gmra.mxu3 %vm181_vm8, %v2498_v61 }
0x177b   :  { %2799 = vrot.lane.b32.xlu2 %v6459_v55, %s7220_s22 }
0x17b3   :  { %v6471_v31 = vpop.f32.mrf.mxu2 }
0x17b4   :  { %5169 = vmatpush.xpose.msk.msrb.mxu0 %vm181_vm8, %v6471_v31 }
0x17d6   :  { %v2549_v3 = vpop.xlane.xlu2 %2548 }
0x17d7   :  { %v2553_v56 = vmul.f32 %v2549_v3, %v5783_v16 }
0x17d9   :  { %v2555_v4 = vadd.f32 1e-06, %v2553_v56 }
0x17db   :  { %5468 = vrsqrt.f32 %v2555_v4  ;;  %vm2563_vm14 = vweird.f32 %v2555_v4 }
0x17de   :  { %v2800_v11 = vpop.permute.xlu2 %2799 }
0x17e1   :  { %v5469_v30 = vpop.eup %5468 }
0x17e2   :  { %v2558_v32 = vmul.f32 %v5469_v30, %v2555_v4  ;;  %vm2564_vm13 = vweird.f32 %v5469_v30 }
0x17e3   :  { %vm2565_vm1 = vmor %vm2563_vm14, %vm2564_vm13 }
0x17e4   :  { %v2559_v6 = vmul.f32 %v5469_v30, %v2558_v32 }
0x17e6   :  { %v2560_v19 = vmul.f32 0.5, %v2559_v6 }
0x17e8   :  { %v2561_v8 = vsub.f32 1.5, %v2560_v19 }
0x17ea   :  { %v2562_v26 = vmul.f32 %v5469_v30, %v2561_v8 }
0x17ec   :  { %v2566_v7 = vsel %vm2565_vm1, %v5469_v30, %v2562_v26 }
0x17ed   :  { %v2577_v35 = vmul.f32 %v2566_v7, %v6463_v49  ;;  %v2527_v38 = vpop.f32.mrf.mxu3 }
0x17ee   :  { %v6495_v9 = vadd.f32 %v2527_v38, %v2370_v36  ;;  %v2541_v36 = vld [vmem:[%s7149_s18] sm:$0xff] }
0x17ef   :  { %v2580_v42 = vmul.f32 %v5340_v22, %v2577_v35  ;;  %2787 = vmatpush.msra.mxu2 %v2541_v36 }
0x17f0   :  { %v2546_v5 = vmul.f32 %v6495_v9, %v6495_v9 }
0x17f1   :  { %5163 = vmatmul.msk.f32.vlgmr.msrb.gmra.mxu1 %vm98_vm0, %v2580_v42 }
0x17f2   :  { %v2550_v17 = vsel %vm98_vm0, %v2546_v5, 0.0 }
0x17f3   :  { %2551 = vadd.xlane.f32.xlu0 %v2550_v17 }
0x1866   :  { %v2552_v20 = vpop.xlane.xlu0 %2551 }
0x1867   :  { %v2554_v40 = vmul.f32 %v2552_v20, %v5783_v16 }
0x1869   :  { %v2556_v63 = vadd.f32 1e-06, %v2554_v40 }
0x186b   :  { %5470 = vrsqrt.f32 %v2556_v63  ;;  %vm2573_vm3 = vweird.f32 %v2556_v63 }
0x186e   :  { %v6502_v10 = vpop.f32.mrf.mxu1 }
0x186f   :  { %5168 = vmatmul.msk.f32.vlgmr.msra.gmra.mxu0 %vm181_vm8, %v6502_v10  ;;  %2797 = vrot.lane.b32.xlu0 %v6502_v10, %s7220_s22 }
0x1870   :  { %5175 = vmatpush.xpose.msk.msra.mxu0 %vm181_vm8, %v2800_v11 }
0x1871   :  { %v5471_v12 = vpop.eup %5470 }
0x1872   :  { %v2568_v13 = vmul.f32 %v5471_v12, %v2556_v63  ;;  %vm2574_vm2 = vweird.f32 %v5471_v12 }
0x1873   :  { %vm2575_vm4 = vmor %vm2573_vm3, %vm2574_vm2 }
0x1874   :  { %v2569_v14 = vmul.f32 %v5471_v12, %v2568_v13 }
0x1876   :  { %v2570_v18 = vmul.f32 0.5, %v2569_v14 }
0x1877   :  { %2714 = vrot.lane.b32.xlu0 %v6459_v55, %s7219_s19 }
0x1878   :  { %v2571_v48 = vsub.f32 1.5, %v2570_v18  ;;  %v2542_v18 = vld [vmem:[%s7149_s18 + $0x8] sm:$0xff] }
0x187a   :  { %v2572_v23 = vmul.f32 %v5471_v12, %v2571_v48 }
0x187c   :  { %v2576_v52 = vsel %vm2575_vm4, %v5471_v12, %v2572_v23 }
0x187d   :  { %v2578_v27 = vmul.f32 %v2576_v52, %v6495_v9 }
0x187f   :  { %v2581_v28 = vmul.f32 %v5340_v22, %v2578_v27 }
0x1881   :  { %5164 = vmatmul.msk.f32.gmra.mxu1 %vm98_vm0, %v2581_v28 }
0x18e1   :  { %v2798_v25 = vpop.permute.xlu0 %2797 }
0x18e9   :  { %v2715_v0 = vpop.permute.xlu0 %2714 }
0x18ea   :  { %2735 = vmatpush.msrb.mxu3 %v2715_v0 }
0x18ec   :  { %v2663_v34 = vpop.f32.mrf.mxu0 }
0x18ed   :  { %v2664_v1 = vadd.f32 %v6516_v33, %v2663_v34 }
0x18ef   :  { %v2692_v37 = vsel %vm181_vm8, %v2664_v1, -inf }
0x18f0   :  { %2693 = vmax.xlane.f32.xlu1 %v2692_v37 }
0x18fe   :  { %v6520_v39 = vpop.f32.mrf.mxu1 }
0x18ff   :  { %2825 = vrot.lane.b32.xlu0 %v6520_v39, %s7220_s22  ;;  %5170 = vmatmul.msk.f32.vlgmr.msrb.gmra.mxu0 %vm181_vm8, %v6520_v39 }
0x1907   :  { %5176 = vmatmul.msk.f32.vlgmr.msra.gmra.mxu0 %vm181_vm8, %v2798_v25 }
0x1909   :  { %2827 = vrot.lane.b32.xlu1 %v6471_v31, %s7220_s22 }
0x1963   :  { %v2694_v41 = vpop.xlane.xlu1 %2693 }
0x1964   :  { %v2698_v44 = vsub.f32 %v2664_v1, %v2694_v41 }
0x1966   :  { %v2700_v45 = vmul.f32 1.442695, %v2698_v44 }
0x1968   :  { %5472 = vpow2.f32 %v2700_v45 }
0x196e   :  { %v5473_v46 = vpop.eup %5472 }
0x196f   :  { %v2704_v51 = vsel %vm181_vm8, %v5473_v46, 0.0 }
0x1970   :  { %2705 = vadd.xlane.f32.xlu2 %v2704_v51 }
0x1971   :  { %v2826_v43 = vpop.permute.xlu0 %2825 }
0x197b   :  { %v2828_v53 = vpop.permute.xlu1 %2827 }
0x197c   :  { %v2689_v47 = vpop.f32.mrf.mxu0  ;;  %5177 = vmatpush.xpose.msk.msra.mxu3 %vm181_vm8, %v2828_v53 }
0x197d   :  { %v2690_v57 = vadd.f32 %v6534_v54, %v2689_v47 }
0x197f   :  { %v2695_v58 = vsel %vm181_vm8, %v2690_v57, -inf }
0x1980   :  { %2696 = vmax.xlane.f32.xlu0 %v2695_v58 }
0x1984   :  { %v2822_v59 = vpop.f32.mrf.mxu0 }
0x1985   :  { %v2823_v60 = vadd.f32 %v6516_v33, %v2822_v59 }
0x1987   :  { %v2853_v61 = vsel %vm181_vm8, %v2823_v60, -inf }
0x1988   :  { %2854 = vmax.xlane.f32.xlu1 %v2853_v61 }
0x1994   :  { %2875 = vrot.lane.b32.xlu0 %v6459_v55, %s7221_s3 }
0x199c   :  { %2958 = vrot.lane.b32.xlu0 %v6502_v10, %s7213_s26 }
0x19a1   :  { %2960 = vrot.lane.b32.xlu1 %v6459_v55, %s7213_s26 }
0x19a9   :  { %2901 = vrot.lane.b32.xlu1 %v6471_v31, %s7221_s3 }
0x19e3   :  { %v2706_v15 = vpop.xlane.xlu2 %2705 }
0x19e4   :  { %5474 = vrcp.f32 %v2706_v15 }
0x19ea   :  { %v5475_v29 = vpop.eup %5474 }
0x19eb   :  { %v2712_v2 = vmul.f32 %v5475_v29, %v5473_v46 }
0x19ed   :  { %5171 = vmatmul.msk.f32.vlgmr.msrb.gmra.mxu3 %vm181_vm8, %v2712_v2 }
0x19ee   :  { %2948 = vmatpush.msrb.mxu3 %v2542_v18 }
0x19f3   :  { %v2697_v3 = vpop.xlane.xlu0 %2696 }
0x19f4   :  { %v2699_v56 = vsub.f32 %v2690_v57, %v2697_v3 }
0x19f5   :  { %5178 = vmatmul.msk.f32.vlgmr.msra.gmra.mxu3 %vm181_vm8, %v2826_v43 }
0x19f6   :  { %v2702_v4 = vmul.f32 1.442695, %v2699_v56 }
0x19f8   :  { %5476 = vpow2.f32 %v2702_v4 }
0x19fb   :  { %v2855_v30 = vpop.xlane.xlu1 %2854 }
0x19fc   :  { %v2859_v32 = vsub.f32 %v2823_v60, %v2855_v30 }
0x19fe   :  { %v5477_v6 = vpop.eup %5476  ;;  %v2861_v19 = vmul.f32 1.442695, %v2859_v32 }
0x19ff   :  { %v2707_v24 = vsel %vm181_vm8, %v5477_v6, 0.0 }
0x1a00   :  { %5478 = vpow2.f32 %v2861_v19  ;;  %2708 = vadd.xlane.f32.xlu2 %v2707_v24 }
0x1a06   :  { %v5479_v8 = vpop.eup %5478  ;;  %v2876_v11 = vpop.permute.xlu0 %2875 }
0x1a07   :  { %v2865_v62 = vsel %vm181_vm8, %v5479_v8, 0.0 }
0x1a08   :  { %2866 = vadd.xlane.f32.xlu2 %v2865_v62 }
0x1a0e   :  { %v2959_v14 = vpop.permute.xlu0 %2958 }
0x1a13   :  { %v2961_v26 = vpop.permute.xlu1 %2960 }
0x1a1b   :  { %v2902_v22 = vpop.permute.xlu1 %2901 }
0x1a1c   :  { %2922 = vmatpush.msrb.mxu0 %v2902_v22 }
0x1a20   :  { %2740 = vrot.lane.b32.xlu2 %v6471_v31, %s7219_s19 }
0x1a70   :  { %v2737_v7 = vpop.f32.mrf.mxu3 }
0x1a71   :  { %5173 = vmatmul.msk.f32.vlgmr.msra.gmra.mxu2 %vm181_vm8, %v2737_v7 }
0x1a73   :  { %v2709_v35 = vpop.xlane.xlu2 %2708 }
0x1a74   :  { %5480 = vrcp.f32 %v2709_v35 }
0x1a78   :  { %v2850_v38 = vpop.f32.mrf.mxu3 }
0x1a79   :  { %v2851_v42 = vadd.f32 %v6534_v54, %v2850_v38 }
0x1a7a   :  { %v5481_v20 = vpop.eup %5480 }
0x1a7b   :  { %v2867_v5 = vpop.xlane.xlu2 %2866  ;;  %v2856_v17 = vsel %vm181_vm8, %v2851_v42, -inf  ;;  %v2713_v40 = vmul.f32 %v5481_v20, %v5477_v6 }
0x1a7c   :  { %2857 = vmax.xlane.f32.xlu2 %v2856_v17  ;;  %5482 = vrcp.f32 %v2867_v5 }
0x1a82   :  { %v5483_v12 = vpop.eup %5482 }
0x1a83   :  { %v2741_v63 = vpop.permute.xlu2 %2740  ;;  %v2873_v13 = vmul.f32 %v5483_v12, %v5479_v8 }
0x1a84   :  { %2761 = vmatpush.msra.mxu1 %v2741_v63 }
0x1a85   :  { %5172 = vmatmul.msk.f32.vlgmr.msra.gmra.mxu1 %vm181_vm8, %v2713_v40 }
0x1a86   :  { %2896 = vmatpush.msrb.mxu1 %v2876_v11 }
0x1a88   :  { %5183 = vmatpush.xpose.msk.msra.mxu1 %vm181_vm8, %v2961_v26 }
0x1a8d   :  { %5179 = vmatmul.msk.f32.vlgmr.msrb.gmra.mxu1 %vm181_vm8, %v2873_v13 }
0x1a94   :  { %2988 = vrot.lane.b32.xlu2 %v6471_v31, %s7213_s26 }
0x1a95   :  { %5184 = vmatmul.msk.f32.vlgmr.msra.gmra.mxu1 %vm181_vm8, %v2959_v14 }
0x1a9c   :  { %3119 = vrot.lane.b32.xlu2 %v6502_v10, %s7214_s29 }
0x1aef   :  { %v2858_v48 = vpop.xlane.xlu2 %2857 }
0x1af0   :  { %v2860_v23 = vsub.f32 %v2851_v42, %v2858_v48 }
0x1af2   :  { %v2863_v52 = vmul.f32 1.442695, %v2860_v23 }
0x1af4   :  { %5484 = vpow2.f32 %v2863_v52  ;;  %v6592_v15 = vpop.f32.mrf.mxu2 }
0x1af7   :  { %v2989_v27 = vpop.permute.xlu2 %2988 }
0x1af8   :  { %5185 = vmatpush.xpose.msk.msrb.mxu2 %vm181_vm8, %v2989_v27 }
0x1afa   :  { %v5485_v28 = vpop.eup %5484 }
0x1afb   :  { %v2868_v25 = vsel %vm181_vm8, %v5485_v28, 0.0 }
0x1afc   :  { %2869 = vadd.xlane.f32.xlu0 %v2868_v25 }
0x1aff   :  { %v3120_v2 = vpop.permute.xlu2 %3119 }
0x1b02   :  { %v2763_v0 = vpop.f32.mrf.mxu1 }
0x1b03   :  { %5174 = vmatmul.msk.f32.gmra.mxu2 %vm181_vm8, %v2763_v0 }
0x1b0a   :  { %v2898_v10 = vpop.f32.mrf.mxu1 }
0x1b0b   :  { %5181 = vmatmul.msk.f32.vlgmr.msrb.gmra.mxu3 %vm181_vm8, %v2898_v10 }
0x1b10   :  { %2986 = vrot.lane.b32.xlu0 %v6520_v39, %s7213_s26 }
0x1b12   :  { %v2983_v34 = vpop.f32.mrf.mxu1 }
0x1b13   :  { %v2984_v1 = vadd.f32 %v6516_v33, %v2983_v34 }
0x1b15   :  { %v3014_v37 = vsel %vm181_vm8, %v2984_v1, -inf }
0x1b16   :  { %3015 = vmax.xlane.f32.xlu1 %v3014_v37 }
0x1b18   :  { %3121 = vrot.lane.b32.xlu0 %v6459_v55, %s7214_s29 }
0x1b20   :  { %3149 = vrot.lane.b32.xlu0 %v6471_v31, %s7214_s29 }
0x1b2f   :  { %3036 = vrot.lane.b32.xlu1 %v6459_v55, %s7212_s0 }
0x1b6f   :  { %v2870_v41 = vpop.xlane.xlu0 %2869 }
0x1b70   :  { %5486 = vrcp.f32 %v2870_v41 }
0x1b76   :  { %v5487_v44 = vpop.eup %5486 }
0x1b77   :  { %v2874_v45 = vmul.f32 %v5487_v44, %v5485_v28 }
0x1b79   :  { %5180 = vmatmul.msk.f32.vlgmr.msrb.gmra.mxu0 %vm181_vm8, %v2874_v45 }
0x1b82   :  { %v2987_v46 = vpop.permute.xlu0 %2986 }
0x1b83   :  { %5186 = vmatmul.msk.f32.vlgmr.msrb.gmra.mxu2 %vm181_vm8, %v2987_v46 }
0x1b86   :  { %v6595_v43 = vpop.f32.mrf.mxu2 }
0x1b89   :  { %v3016_v51 = vpop.xlane.xlu1 %3015 }
0x1b8a   :  { %v3020_v53 = vsub.f32 %v2984_v1, %v3016_v51  ;;  %v3122_v47 = vpop.permute.xlu0 %3121 }
0x1b8c   :  { %v3022_v57 = vmul.f32 1.442695, %v3020_v53  ;;  %v2795_v53 = vadd.f32 %v6592_v15, %v6463_v49 }
0x1b8e   :  { %5488 = vpow2.f32 %v3022_v57  ;;  %v6605_v26 = vpop.f32.mrf.mxu3 }
0x1b8f   :  { %v2956_v57 = vadd.f32 %v6605_v26, %v2795_v53  ;;  %v3291_v26 = vld [vmem:[%s7223_s23 + $0x30] sm:$0xff] }
0x1b92   :  { %v3150_v58 = vpop.permute.xlu0 %3149 }
0x1b93   :  { %5193 = vmatpush.xpose.msk.msra.mxu3 %vm181_vm8, %v3150_v58 }
0x1b94   :  { %v5489_v59 = vpop.eup %5488 }
0x1b95   :  { %v3026_v60 = vsel %vm181_vm8, %v5489_v59, 0.0 }
0x1b96   :  { %3027 = vadd.xlane.f32.xlu2 %v3026_v60 }
0x1ba1   :  { %v3037_v61 = vpop.permute.xlu1 %3036 }
0x1ba2   :  { %3057 = vmatpush.msra.mxu0 %v3037_v61  ;;  %v2796_v61 = vadd.f32 %v6595_v43, %v6495_v9  ;;  %v3284_v9 = vld [vmem:[%s7151_s20 + $0x18] sm:$0xff]  ;;  %v3283_v43 = vld [vmem:[%s7151_s20 + $0x10] sm:$0xff] }
0x1ba4   :  { %5191 = vmatpush.xpose.msk.msrb.mxu0 %vm181_vm8, %v3122_v47 }
0x1bae   :  { %3147 = vrot.lane.b32.xlu2 %v6520_v39, %s7214_s29  ;;  %v2543_v39 = vld [vmem:[%s7149_s18 + $0x10] sm:$0xff] }
0x1baf   :  { %3109 = vmatpush.msra.mxu2 %v2543_v39 }
0x1bf6   :  { %v2924_v29 = vpop.f32.mrf.mxu0 }
0x1bf7   :  { %5182 = vmatmul.msk.f32.gmra.mxu3 %vm181_vm8, %v2924_v29 }
0x1c06   :  { %v3011_v3 = vpop.f32.mrf.mxu2 }
0x1c07   :  { %v3012_v56 = vadd.f32 %v6534_v54, %v3011_v3 }
0x1c09   :  { %v3028_v4 = vpop.xlane.xlu2 %3027  ;;  %v3017_v30 = vsel %vm181_vm8, %v3012_v56, -inf }
0x1c0a   :  { %5490 = vrcp.f32 %v3028_v4  ;;  %3018 = vmax.xlane.f32.xlu0 %v3017_v30 }
0x1c10   :  { %v5491_v32 = vpop.eup %5490 }
0x1c11   :  { %v3034_v6 = vmul.f32 %v5491_v32, %v5489_v59  ;;  %v3148_v19 = vpop.permute.xlu2 %3147 }
0x1c12   :  { %5194 = vmatmul.msk.f32.vlgmr.msra.gmra.mxu3 %vm181_vm8, %v3148_v19  ;;  %v3281_v19 = vld [vmem:[%s7151_s20] sm:$0xff] }
0x1c13   :  { %5187 = vmatmul.msk.f32.vlgmr.msra.gmra.mxu0 %vm181_vm8, %v3034_v6  ;;  %v3282_v6 = vld [vmem:[%s7151_s20 + $0x8] sm:$0xff] }
0x1c1b   :  { %5192 = vmatmul.msk.f32.vlgmr.msrb.gmra.mxu0 %vm181_vm8, %v3120_v2 }
0x1c7a   :  { %v6608_v7 = vpop.f32.mrf.mxu3 }
0x1c7b   :  { %v2957_v3 = vadd.f32 %v6608_v7, %v2796_v61  ;;  %v5204_v61 = vld [vmem:[%s7225_s13 + $0x28] sm:$0xff] }
0x1c7d   :  { %v3019_v24 = vpop.xlane.xlu0 %3018 }
0x1c7e   :  { %v3021_v8 = vsub.f32 %v3012_v56, %v3019_v24 }
0x1c80   :  { %v3024_v62 = vmul.f32 1.442695, %v3021_v8 }
0x1c82   :  { %5492 = vpow2.f32 %v3024_v62  ;;  %v3292_v62 = vld [vmem:[%s7223_s23 + $0x38] sm:$0xff] }
0x1c83   :  { %3375 = vmatpush.msrb.mxu2 %v3292_v62 }
0x1c85   :  { %3376 = vmatpush.msrb.mxu2 %v3291_v26 }
0x1c88   :  { %v5493_v22 = vpop.eup %5492 }
0x1c89   :  { %v3029_v36 = vsel %vm181_vm8, %v5493_v22, 0.0 }
0x1c8a   :  { %3030 = vadd.xlane.f32.xlu0 %v3029_v36  ;;  %v3289_v36 = vld [vmem:[%s7223_s23 + $0x20] sm:$0xff] }
0x1c90   :  { %v3059_v35 = vpop.f32.mrf.mxu0 }
0x1c91   :  { %5189 = vmatmul.msk.f32.vlgmr.msra.gmra.mxu2 %vm181_vm8, %v3059_v35 }
0x1c95   :  { %v3172_v38 = vpop.f32.mrf.mxu3 }
0x1c96   :  { %v3173_v42 = vadd.f32 %v6534_v54, %v3172_v38  ;;  %v3288_v38 = vld [vmem:[%s7223_s23 + $0x18] sm:$0xff] }
0x1c98   :  { %v3144_v5 = vpop.f32.mrf.mxu0  ;;  %v3178_v17 = vsel %vm181_vm8, %v3173_v42, -inf }
0x1c99   :  { %v3145_v20 = vadd.f32 %v6516_v33, %v3144_v5  ;;  %3179 = vmax.xlane.f32.xlu1 %v3178_v17  ;;  %v3287_v17 = vld [vmem:[%s7223_s23 + $0x10] sm:$0xff] }
0x1c9b   :  { %v3175_v40 = vsel %vm181_vm8, %v3145_v20, -inf }
0x1c9c   :  { %3176 = vmax.xlane.f32.xlu2 %v3175_v40 }
0x1c9e   :  { %3197 = vrot.lane.b32.xlu0 %v6459_v55, %s7216_s25 }
0x1cb2   :  { %3062 = vrot.lane.b32.xlu1 %v6471_v31, %s7212_s0 }
0x1cfd   :  { %v3031_v18 = vpop.xlane.xlu0 %3030 }
0x1d0c   :  { %v3180_v63 = vpop.xlane.xlu1 %3179 }
0x1d0d   :  { %v3182_v13 = vsub.f32 %v3173_v42, %v3180_v63 }
0x1d0f   :  { %v3177_v11 = vpop.xlane.xlu2 %3176  ;;  %v3185_v14 = vmul.f32 1.442695, %v3182_v13 }
0x1d10   :  { %v3181_v12 = vsub.f32 %v3145_v20, %v3177_v11  ;;  %v3198_v25 = vpop.permute.xlu0 %3197 }
0x1d12   :  { %v3183_v54 = vmul.f32 1.442695, %v3181_v12 }
0x1d14   :  { %5494 = vpow2.f32 %v3183_v54  ;;  %v3111_v47 = vpop.f32.mrf.mxu2 }
0x1d15   :  { %5496 = vpow2.f32 %v3185_v14  ;;  %v3117_v58 = vadd.f32 %v3111_v47, %v2956_v57  ;;  %v5341_v14 = vld [vmem:[%s7224_s10] ss:$0 sm:$0xff] }
0x1d16   :  { %5498 = vrcp.f32 %v3031_v18 }
0x1d1a   :  { %v5495_v48 = vpop.eup %5494 }
0x1d1b   :  { %v3187_v33 = vsel %vm181_vm8, %v5495_v48, 0.0  ;;  %v5497_v23 = vpop.eup %5496 }
0x1d1c   :  { %3188 = vadd.xlane.f32.xlu2 %v3187_v33  ;;  %v5499_v52 = vpop.eup %5498  ;;  %v3190_v55 = vsel %vm181_vm8, %v5497_v23, 0.0 }
0x1d1d   :  { %v3035_v27 = vmul.f32 %v5499_v52, %v5493_v22  ;;  %v3290_v22 = vld [vmem:[%s7223_s23 + $0x28] sm:$0xff] }
0x1d1e   :  { %3377 = vmatpush.msrb.mxu2 %v3290_v22 }
0x1d20   :  { %3378 = vmatpush.msrb.mxu2 %v3289_v36 }
0x1d22   :  { %3379 = vmatpush.msrb.mxu2 %v3288_v38 }
0x1d24   :  { %3191 = vadd.xlane.f32.xlu2 %v3190_v55  ;;  %v3063_v28 = vpop.permute.xlu1 %3062  ;;  %3380 = vmatpush.msrb.mxu2 %v3287_v17 }
0x1d25   :  { %3083 = vmatpush.msrb.mxu1 %v3063_v28 }
0x1d26   :  { %5188 = vmatmul.msk.f32.vlgmr.msrb.gmra.mxu1 %vm181_vm8, %v3035_v27 }
0x1d27   :  { %3218 = vmatpush.msra.mxu1 %v3198_v25 }
0x1d29   :  { %3348 = vmatpush.msrb.mxu1 %v3284_v9 }
0x1d2b   :  { %3349 = vmatpush.msrb.mxu1 %v3283_v43 }
0x1d2d   :  { %3350 = vmatpush.msrb.mxu1 %v3282_v6 }
0x1d2f   :  { %3351 = vmatpush.msrb.mxu1 %v3281_v19 }
0x1d3c   :  { %3223 = vrot.lane.b32.xlu2 %v6471_v31, %s7216_s25  ;;  %v2544_v31 = vld [vmem:[%s7149_s18 + $0x18] sm:$0xff] }
0x1d3d   :  { %3270 = vmatpush.msrb.mxu3 %v2544_v31 }
0x1d8f   :  { %v3189_v0 = vpop.xlane.xlu2 %3188 }
0x1d90   :  { %5500 = vrcp.f32 %v3189_v0 }
0x1d96   :  { %v5501_v10 = vpop.eup %5500 }
0x1d97   :  { %v3195_v34 = vmul.f32 %v5501_v10, %v5495_v48  ;;  %v3192_v1 = vpop.xlane.xlu2 %3191  ;;  %v3286_v10 = vld [vmem:[%s7223_s23 + $0x8] sm:$0xff] }
0x1d98   :  { %5502 = vrcp.f32 %v3192_v1  ;;  %3381 = vmatpush.msrb.mxu2 %v3286_v10 }
0x1d99   :  { %5195 = vmatmul.msk.f32.vlgmr.msra.gmra.mxu1 %vm181_vm8, %v3195_v34  ;;  %v3285_v34 = vld [vmem:[%s7223_s23] sm:$0xff] }
0x1d9a   :  { %3382 = vmatpush.msrb.mxu2 %v3285_v34 }
0x1d9e   :  { %v5503_v37 = vpop.eup %5502 }
0x1d9f   :  { %v3196_v41 = vmul.f32 %v5503_v37, %v5497_v23  ;;  %v3224_v44 = vpop.permute.xlu2 %3223 }
0x1da0   :  { %3244 = vmatpush.msra.mxu0 %v3224_v44 }
0x1da1   :  { %5196 = vmatmul.msk.f32.vlgmr.msra.gmra.mxu0 %vm181_vm8, %v3196_v41 }
0x1da3   :  { %v3085_v45 = vpop.f32.mrf.mxu1 }
0x1da4   :  { %5190 = vmatmul.msk.f32.gmra.mxu2 %vm181_vm8, %v3085_v45 }
0x1e16   :  { %v3220_v46 = vpop.f32.mrf.mxu1 }
0x1e17   :  { %5197 = vmatmul.msk.f32.vlgmr.msrb.gmra.mxu3 %vm181_vm8, %v3220_v46 }
0x1e1e   :  { %v3246_v51 = vpop.f32.mrf.mxu0 }
0x1e1f   :  { %5198 = vmatmul.msk.f32.gmra.mxu3 %vm181_vm8, %v3246_v51 }
0x1e27   :  { %v3114_v2 = vpop.f32.mrf.mxu2 }
0x1e28   :  { %v3118_v49 = vadd.f32 %v3114_v2, %v2957_v3 }
0x1e9a   :  { %v3272_v59 = vpop.f32.mrf.mxu3 }
0x1e9b   :  { %v6635_v60 = vadd.f32 %v3272_v59, %v3117_v58  ;;  %v5206_v59 = vld [vmem:[%s7225_s13 + $0x38] sm:$0xff] }
0x1e9c   :  { %3458 = vmatpush.msrb.mxu0 %v5206_v59 }
0x1e9d   :  { %v3293_v29 = vmul.f32 %v6635_v60, %v6635_v60 }
0x1e9f   :  { %v3295_v56 = vsel %vm98_vm0, %v3293_v29, 0.0  ;;  %v5203_v29 = vld [vmem:[%s7225_s13 + $0x20] sm:$0xff] }
0x1ea0   :  { %3296 = vadd.xlane.f32.xlu0 %v3295_v56 }
0x1ea2   :  { %v3275_v15 = vpop.f32.mrf.mxu3 }
0x1ea3   :  { %v6643_v4 = vadd.f32 %v3275_v15, %v3118_v49 }
0x1ea5   :  { %v3294_v30 = vmul.f32 %v6643_v4, %v6643_v4 }
0x1ea7   :  { %v3298_v32 = vsel %vm98_vm0, %v3294_v30, 0.0 }
0x1ea8   :  { %3299 = vadd.xlane.f32.xlu1 %v3298_v32 }
0x1f13   :  { %v3297_v39 = vpop.xlane.xlu0 %3296 }
0x1f14   :  { %v3301_v24 = vmul.f32 %v3297_v39, %v5783_v16 }
0x1f16   :  { %v3303_v8 = vadd.f32 1e-06, %v3301_v24 }
0x1f18   :  { %5504 = vrsqrt.f32 %v3303_v8  ;;  %vm3311_vm6 = vweird.f32 %v3303_v8 }
0x1f1b   :  { %v3300_v7 = vpop.xlane.xlu1 %3299 }
0x1f1c   :  { %v3302_v35 = vmul.f32 %v3300_v7, %v5783_v16 }
0x1f1e   :  { %v5505_v42 = vpop.eup %5504  ;;  %v3304_v5 = vadd.f32 1e-06, %v3302_v35 }
0x1f1f   :  { %v3306_v20 = vmul.f32 %v5505_v42, %v3303_v8  ;;  %vm3312_vm5 = vweird.f32 %v5505_v42  ;;  %v5342_v8 = vld [vmem:[%s7226_s8 + $0x1] ss:$0 sm:$0xff] }
0x1f20   :  { %5506 = vrsqrt.f32 %v3304_v5  ;;  %vm3313_vm7 = vmor %vm3311_vm6, %vm3312_vm5  ;;  %vm3321_vm10 = vweird.f32 %v3304_v5 }
0x1f21   :  { %v3307_v40 = vmul.f32 %v5505_v42, %v3306_v20 }
0x1f23   :  { %v3308_v63 = vmul.f32 0.5, %v3307_v40 }
0x1f25   :  { %v3309_v11 = vsub.f32 1.5, %v3308_v63 }
0x1f26   :  { %v5507_v12 = vpop.eup %5506 }
0x1f27   :  { %v3310_v13 = vmul.f32 %v5505_v42, %v3309_v11  ;;  %v3316_v54 = vmul.f32 %v5507_v12, %v3304_v5  ;;  %vm3322_vm9 = vweird.f32 %v5507_v12 }
0x1f28   :  { %vm3323_vm11 = vmor %vm3321_vm10, %vm3322_vm9 }
0x1f29   :  { %v3314_v18 = vsel %vm3313_vm7, %v5505_v42, %v3310_v13  ;;  %v3317_v48 = vmul.f32 %v5507_v12, %v3316_v54 }
0x1f2a   :  { %v3325_v33 = vmul.f32 %v3314_v18, %v6635_v60 }
0x1f2b   :  { %v3318_v23 = vmul.f32 0.5, %v3317_v48 }
0x1f2c   :  { %v3328_v52 = vmul.f32 %v5341_v14, %v3325_v33 }
0x1f2d   :  { %v3319_v55 = vsub.f32 1.5, %v3318_v23 }
0x1f2e   :  { %5199 = vmatmul.msk.f32.vlgmr.msrb.gmra.mxu1 %vm98_vm0, %v3328_v52 }
0x1f2f   :  { %v3320_v27 = vmul.f32 %v5507_v12, %v3319_v55 }
0x1f31   :  { %v3324_v28 = vsel %vm3323_vm11, %v5507_v12, %v3320_v27  ;;  %v6756_v27 = vld [vmem:[%s7222_s21 + $0x8] sm:$0xff] }
0x1f32   :  { %v3326_v25 = vmul.f32 %v3324_v28, %v6643_v4 }
0x1f34   :  { %v3329_v0 = vmul.f32 %v5341_v14, %v3326_v25  ;;  %v5590_v14 = vld [vmem:[%s7222_s21] sm:$0xff] }
0x1f36   :  { %5200 = vmatmul.msk.f32.gmra.mxu1 %vm98_vm0, %v3329_v0 }
0x1fab   :  { %v3353_v1 = vpop.f32.mrf.mxu1 }
0x1fac   :  { %v3359_v37 = vmax.f32 %v3353_v1, 0.0 }
0x1fae   :  { %5201 = vmatmul.msk.f32.vlgmr.msrb.gmra.mxu2 %vm908_vm15, %v3359_v37 }
0x1fb3   :  { %v3356_v41 = vpop.f32.mrf.mxu1 }
0x1fb4   :  { %v3360_v44 = vmax.f32 %v3356_v41, 0.0 }
0x1fb6   :  { %5202 = vmatmul.msk.f32.gmra.mxu2 %vm908_vm15, %v3360_v44 }
0x2031   :  { %v3384_v45 = vpop.f32.mrf.mxu2 }
0x2032   :  { %v6696_v31 = vadd.f32 %v3384_v45, %v6635_v60  ;;  %v5205_v60 = vld [vmem:[%s7225_s13 + $0x30] sm:$0xff] }
0x2033   :  { %3459 = vmatpush.msrb.mxu0 %v5205_v60 }
0x2034   :  { %v3403_v46 = vmul.f32 %v6696_v31, %v6696_v31 }
0x2035   :  { %3460 = vmatpush.msrb.mxu0 %v5204_v61 }
0x2036   :  { %v3405_v51 = vsel %vm98_vm0, %v3403_v46, 0.0 }
0x2037   :  { %3406 = vadd.xlane.f32.xlu2 %v3405_v51  ;;  %3461 = vmatpush.msrb.mxu0 %v5203_v29 }
0x2039   :  { %v3387_v53 = vpop.f32.mrf.mxu2 }
0x203a   :  { %v6702_v47 = vadd.f32 %v3387_v53, %v6643_v4 }
0x203c   :  { %v3404_v57 = vmul.f32 %v6702_v47, %v6702_v47 }
0x203e   :  { %v3408_v58 = vsel %vm98_vm0, %v3404_v57, 0.0 }
0x203f   :  { %3409 = vadd.xlane.f32.xlu0 %v3408_v58 }
0x20aa   :  { %v3407_v2 = vpop.xlane.xlu2 %3406 }
0x20ab   :  { %v3411_v3 = vmul.f32 %v3407_v2, %v5783_v16 }
0x20ad   :  { %v3413_v56 = vadd.f32 1e-06, %v3411_v3 }
0x20af   :  { %5508 = vrsqrt.f32 %v3413_v56  ;;  %vm3421_vm13 = vweird.f32 %v3413_v56 }
0x20b2   :  { %v3410_v49 = vpop.xlane.xlu0 %3409 }
0x20b3   :  { %v3412_v15 = vmul.f32 %v3410_v49, %v5783_v16 }
0x20b5   :  { %v5509_v4 = vpop.eup %5508  ;;  %v3414_v30 = vadd.f32 1e-06, %v3412_v15 }
0x20b6   :  { %v3416_v32 = vmul.f32 %v5509_v4, %v3413_v56  ;;  %vm3422_vm12 = vweird.f32 %v5509_v4 }
0x20b7   :  { %5510 = vrsqrt.f32 %v3414_v30  ;;  %vm3423_vm14 = vmor %vm3421_vm13, %vm3422_vm12  ;;  %vm3431_vm2 = vweird.f32 %v3414_v30 }
0x20b8   :  { %v3417_v9 = vmul.f32 %v5509_v4, %v3416_v32 }
0x20ba   :  { %v3418_v43 = vmul.f32 0.5, %v3417_v9 }
0x20bc   :  { %v3419_v6 = vsub.f32 1.5, %v3418_v43 }
0x20bd   :  { %v5511_v19 = vpop.eup %5510 }
0x20be   :  { %v3420_v39 = vmul.f32 %v5509_v4, %v3419_v6  ;;  %v3426_v24 = vmul.f32 %v5511_v19, %v3414_v30  ;;  %vm3432_vm1 = vweird.f32 %v5511_v19 }
0x20bf   :  { %vm3433_vm3 = vmor %vm3431_vm2, %vm3432_vm1 }
0x20c0   :  { %v3424_v62 = vsel %vm3423_vm14, %v5509_v4, %v3420_v39  ;;  %v3427_v26 = vmul.f32 %v5511_v19, %v3426_v24 }
0x20c1   :  { %v3435_v22 = vmul.f32 %v3424_v62, %v6696_v31 }
0x20c2   :  { %v3428_v36 = vmul.f32 0.5, %v3427_v26  ;;  %v5207_v26 = vld [vmem:[%s7145_s14 + $0x20] sm:$0xff] }
0x20c3   :  { %v3438_v7 = vmul.f32 %v5342_v8, %v3435_v22  ;;  %v5208_v22 = vld [vmem:[%s7145_s14 + $0x28] sm:$0xff] }
0x20c4   :  { %v3429_v35 = vsub.f32 1.5, %v3428_v36 }
0x20c5   :  { %5211 = vmatmul.msk.f32.vlgmr.msrb.gmra.mxu0 %vm98_vm0, %v3438_v7 }
0x20c6   :  { %v3430_v38 = vmul.f32 %v5511_v19, %v3429_v35 }
0x20c8   :  { %v3434_v42 = vsel %vm3433_vm3, %v5511_v19, %v3430_v38 }
0x20c9   :  { %v3436_v5 = vmul.f32 %v3434_v42, %v6702_v47  ;;  %v6795_v42 = vld [vmem:[%s7222_s21 + $0x10] sm:$0xff] }
0x20cb   :  { %v3439_v17 = vmul.f32 %v5342_v8, %v3436_v5 }
0x20cd   :  { %5212 = vmatmul.msk.f32.gmra.mxu0 %vm98_vm0, %v3439_v17 }
0x2142   :  { %v6728_v20 = vpop.f32.mrf.mxu0 }
0x2143   :  { %3630 = vrot.lane.b32.xlu2 %v6728_v20, %s7221_s3  ;;  %3470 = vrot.lane.b32.xlu1 %v6728_v20, %s7219_s19 }
0x214a   :  { %v6734_v40 = vpop.f32.mrf.mxu0 }
0x214b   :  { %3628 = vrot.lane.b32.xlu1 %v6728_v20, %s7220_s22  ;;  %3497 = vrot.lane.b32.xlu0 %v6734_v40, %s7219_s19  ;;  %v5327_v0 = vpack.i.bf16 %v6734_v40, %v6728_v20 }
0x219d   :  { %v3631_v12 = vpop.permute.xlu2 %3630 }
0x21b5   :  { %v3471_v63 = vpop.permute.xlu1 %3470 }
0x21b6   :  { %5213 = vmatpush.xpose.msk.msra.mxu3 %vm181_vm8, %v3471_v63 }
0x21b9   :  { %5214 = vmatmul.msk.f32.vlgmr.msra.gmra.mxu3 %vm181_vm8, %v6728_v20 }
0x21ba   :  { %3618 = vmatpush.msrb.mxu3 %v5207_v26 }
0x21bd   :  { %v3498_v11 = vpop.permute.xlu0 %3497  ;;  %v3629_v13 = vpop.permute.xlu1 %3628 }
0x21be   :  { %5215 = vmatpush.xpose.msk.msra.mxu1 %vm181_vm8, %v3498_v11 }
0x21c1   :  { %5216 = vmatmul.msk.f32.vlgmr.msra.gmra.mxu1 %vm181_vm8, %v6734_v40 }
0x21c2   :  { %5221 = vmatpush.xpose.msk.msrb.mxu1 %vm181_vm8, %v3631_v12 }
0x21c9   :  { %5222 = vmatmul.msk.f32.vlgmr.msrb.gmra.mxu1 %vm181_vm8, %v3629_v13 }
0x223c   :  { %v3493_v54 = vpop.f32.mrf.mxu3 }
0x223d   :  { %v3494_v18 = vadd.f32 %v5590_v14, %v3493_v54 }
0x223e   :  { %v3520_v48 = vpop.f32.mrf.mxu1 }
0x223f   :  { %v3521_v33 = vadd.f32 %v5590_v14, %v3520_v48  ;;  %v3523_v23 = vsel %vm181_vm8, %v3494_v18, -inf }
0x2240   :  { %3524 = vmax.xlane.f32.xlu0 %v3523_v23 }
0x2241   :  { %v3526_v52 = vsel %vm181_vm8, %v3521_v33, -inf }
0x2242   :  { %3527 = vmax.xlane.f32.xlu1 %v3526_v52 }
0x2246   :  { %v3653_v55 = vpop.f32.mrf.mxu1 }
0x2247   :  { %v3654_v28 = vadd.f32 %v6756_v27, %v3653_v55 }
0x2249   :  { %v3684_v25 = vsel %vm181_vm8, %v3654_v28, -inf }
0x224a   :  { %3685 = vmax.xlane.f32.xlu2 %v3684_v25 }
0x2254   :  { %5328 = vrot.lane.b32.xlu0 %v5327_v0, %s7210_s2 }
0x2262   :  { %3658 = vrot.lane.b32.xlu2 %v6734_v40, %s7221_s3 }
0x226a   :  { %3791 = vrot.lane.b32.xlu2 %v6728_v20, %s7212_s0 }
0x22b3   :  { %v3525_v10 = vpop.xlane.xlu0 %3524 }
0x22b4   :  { %v3529_v34 = vsub.f32 %v3494_v18, %v3525_v10 }
0x22b5   :  { %v3528_v1 = vpop.xlane.xlu1 %3527 }
0x22b6   :  { %v3531_v37 = vmul.f32 1.442695, %v3529_v34  ;;  %v3530_v41 = vsub.f32 %v3521_v33, %v3528_v1 }
0x22b8   :  { %5512 = vpow2.f32 %v3531_v37  ;;  %v3533_v44 = vmul.f32 1.442695, %v3530_v41 }
0x22ba   :  { %5514 = vpow2.f32 %v3533_v44 }
0x22bd   :  { %v3686_v45 = vpop.xlane.xlu2 %3685 }
0x22be   :  { %v5513_v46 = vpop.eup %5512  ;;  %v3690_v51 = vsub.f32 %v3654_v28, %v3686_v45 }
0x22bf   :  { %v3535_v53 = vsel %vm181_vm8, %v5513_v46, 0.0 }
0x22c0   :  { %v5515_v57 = vpop.eup %5514  ;;  %v3692_v58 = vmul.f32 1.442695, %v3690_v51  ;;  %3536 = vadd.xlane.f32.xlu0 %v3535_v53 }
0x22c1   :  { %v3538_v59 = vsel %vm181_vm8, %v5515_v57, 0.0 }
0x22c2   :  { %5516 = vpow2.f32 %v3692_v58  ;;  %3539 = vadd.xlane.f32.xlu1 %v3538_v59 }
0x22c5   :  { %v3659_v3 = vpop.permute.xlu2 %3658 }
0x22c6   :  { %v5329_v60 = vpop.permute.xlu0 %5328 }
0x22c7   :  { %v5331_v61 = vunpack.i.h.bf16 %v5329_v60  ;;  %v5330_v29 = vunpack.i.l.bf16 %v5329_v60 }
0x22c8   :  { %v5517_v2 = vpop.eup %5516 }
0x22c9   :  { %3566 = vmatpush.msra.mxu2 %v5330_v29  ;;  %3592 = vmatpush.msra.mxu0 %v5331_v61  ;;  %v3696_v56 = vsel %vm181_vm8, %v5517_v2, 0.0 }
0x22ca   :  { %3697 = vadd.xlane.f32.xlu1 %v3696_v56 }
0x22cb   :  { %5223 = vmatpush.xpose.msk.msrb.mxu2 %vm181_vm8, %v3659_v3  ;;  %v5593_v3 = vld [vmem:[%s7222_s21 + $0x18] sm:$0xff] }
0x22cd   :  { %v3792_v24 = vpop.permute.xlu2 %3791 }
0x22d4   :  { %3706 = vrot.lane.b32.xlu0 %v6728_v20, %s7211_s30 }
0x22dc   :  { %3789 = vrot.lane.b32.xlu0 %v6728_v20, %s7213_s26 }
0x22e3   :  { %3656 = vrot.lane.b32.xlu1 %v6734_v40, %s7220_s22 }
0x2333   :  { %v3537_v49 = vpop.xlane.xlu0 %3536 }
0x2334   :  { %5518 = vrcp.f32 %v3537_v49 }
0x2335   :  { %v3540_v15 = vpop.xlane.xlu1 %3539 }
0x2336   :  { %5520 = vrcp.f32 %v3540_v15 }
0x233a   :  { %v5519_v4 = vpop.eup %5518 }
0x233b   :  { %v3543_v30 = vmul.f32 %v5519_v4, %v5513_v46 }
0x233c   :  { %v5521_v32 = vpop.eup %5520 }
0x233d   :  { %v3544_v9 = vmul.f32 %v5521_v32, %v5515_v57  ;;  %5217 = vmatmul.msk.f32.vlgmr.msra.gmra.mxu2 %vm181_vm8, %v3543_v30  ;;  %v3698_v43 = vpop.xlane.xlu1 %3697  ;;  %v5209_v57 = vld [vmem:[%s7145_s14 + $0x30] sm:$0xff] }
0x233e   :  { %5522 = vrcp.f32 %v3698_v43  ;;  %3779 = vmatpush.msra.mxu2 %v5208_v22 }
0x233f   :  { %5218 = vmatmul.msk.f32.vlgmr.msra.gmra.mxu0 %vm181_vm8, %v3544_v9 }
0x2344   :  { %v5523_v6 = vpop.eup %5522 }
0x2345   :  { %v3704_v19 = vmul.f32 %v5523_v6, %v5517_v2 }
0x2346   :  { %v3707_v39 = vpop.permute.xlu0 %3706 }
0x2347   :  { %3727 = vmatpush.msrb.mxu0 %v3707_v39 }
0x2348   :  { %5225 = vmatmul.msk.f32.vlgmr.msrb.gmra.mxu0 %vm181_vm8, %v3704_v19 }
0x2349   :  { %5229 = vmatpush.xpose.msk.msra.mxu0 %vm181_vm8, %v3792_v24 }
0x234e   :  { %v3790_v8 = vpop.permute.xlu0 %3789 }
0x2350   :  { %5230 = vmatmul.msk.f32.vlgmr.msra.gmra.mxu0 %vm181_vm8, %v3790_v8 }
0x2355   :  { %v3657_v62 = vpop.permute.xlu1 %3656 }
0x2356   :  { %5224 = vmatmul.msk.f32.vlgmr.msrb.gmra.mxu2 %vm181_vm8, %v3657_v62 }
0x23bc   :  { %v3594_v36 = vpop.f32.mrf.mxu0 }
0x23c0   :  { %v3568_v7 = vpop.f32.mrf.mxu2 }
0x23c1   :  { %5219 = vmatmul.msk.f32.vlgmr.msrb.gmra.mxu3 %vm181_vm8, %v3568_v7 }
0x23c5   :  { %v3729_v35 = vpop.f32.mrf.mxu0 }
0x23c6   :  { %5227 = vmatmul.msk.f32.vlgmr.msra.gmra.mxu2 %vm181_vm8, %v3729_v35 }
0x23c9   :  { %5220 = vmatmul.msk.f32.gmra.mxu3 %vm181_vm8, %v3594_v36 }
0x23cd   :  { %v3814_v38 = vpop.f32.mrf.mxu0 }
0x23ce   :  { %v3815_v5 = vadd.f32 %v6795_v42, %v3814_v38 }
0x23d0   :  { %v3845_v17 = vsel %vm181_vm8, %v3815_v5, -inf }
0x23d1   :  { %3846 = vmax.xlane.f32.xlu0 %v3845_v17 }
0x23d9   :  { %v3681_v63 = vpop.f32.mrf.mxu2 }
0x23da   :  { %v3682_v11 = vadd.f32 %v6756_v27, %v3681_v63 }
0x23dc   :  { %v3687_v12 = vsel %vm181_vm8, %v3682_v11, -inf }
0x23dd   :  { %3688 = vmax.xlane.f32.xlu2 %v3687_v12 }
0x23e5   :  { %3817 = vrot.lane.b32.xlu0 %v6734_v40, %s7213_s26 }
0x23f5   :  { %3732 = vrot.lane.b32.xlu2 %v6734_v40, %s7211_s30 }
0x23fd   :  { %3867 = vrot.lane.b32.xlu2 %v6728_v20, %s7215_s28 }
0x2405   :  { %3952 = vrot.lane.b32.xlu2 %v6728_v20, %s7216_s25 }
0x240d   :  { %3978 = vrot.lane.b32.xlu2 %v6734_v40, %s7214_s29 }
0x2444   :  { %v3847_v13 = vpop.xlane.xlu0 %3846  ;;  %v6830_v59 = vpop.f32.mrf.mxu3 }
0x2445   :  { %v3851_v54 = vsub.f32 %v3815_v5, %v3847_v13 }
0x2447   :  { %v3853_v14 = vmul.f32 1.442695, %v3851_v54 }
0x2449   :  { %5524 = vpow2.f32 %v3853_v14  ;;  %v6844_v32 = vpop.f32.mrf.mxu2 }
0x244c   :  { %v6834_v29 = vpop.f32.mrf.mxu3 }
0x244f   :  { %v5525_v18 = vpop.eup %5524 }
0x2450   :  { %v3689_v48 = vpop.xlane.xlu2 %3688  ;;  %v3857_v33 = vsel %vm181_vm8, %v5525_v18, 0.0 }
0x2451   :  { %v3691_v23 = vsub.f32 %v3682_v11, %v3689_v48  ;;  %3858 = vadd.xlane.f32.xlu0 %v3857_v33 }
0x2453   :  { %v3694_v52 = vmul.f32 1.442695, %v3691_v23  ;;  %v5252_v23 = vld [vmem:[%s7148_s17 + $0x38] sm:$0xff] }
0x2455   :  { %5526 = vpow2.f32 %v3694_v52  ;;  %v5251_v52 = vld [vmem:[%s7148_s17 + $0x30] sm:$0xff] }
0x2457   :  { %v3818_v0 = vpop.permute.xlu0 %3817 }
0x2458   :  { %v3733_v55 = vpop.permute.xlu2 %3732 }
0x2459   :  { %3753 = vmatpush.msra.mxu1 %v3733_v55  ;;  %v5250_v55 = vld [vmem:[%s7148_s17 + $0x28] sm:$0xff] }
0x245b   :  { %v5527_v27 = vpop.eup %5526 }
0x245c   :  { %v3699_v28 = vsel %vm181_vm8, %v5527_v27, 0.0 }
0x245d   :  { %3700 = vadd.xlane.f32.xlu1 %v3699_v28 }
0x2460   :  { %v3868_v25 = vpop.permute.xlu2 %3867 }
0x2461   :  { %3888 = vmatpush.msrb.mxu1 %v3868_v25 }
0x2465   :  { %3950 = vrot.lane.b32.xlu0 %v6728_v20, %s7214_s29 }
0x2468   :  { %v3953_v41 = vpop.permute.xlu2 %3952 }
0x2470   :  { %v3979_v60 = vpop.permute.xlu2 %3978 }
0x2476   :  { %3819 = vrot.lane.b32.xlu1 %v6734_v40, %s7212_s0 }
0x247e   :  { %3980 = vrot.lane.b32.xlu1 %v6734_v40, %s7216_s25 }
0x24c4   :  { %v3859_v34 = vpop.xlane.xlu0 %3858 }
0x24d0   :  { %v3701_v10 = vpop.xlane.xlu1 %3700 }
0x24d1   :  { %5528 = vrcp.f32 %v3701_v10 }
0x24d2   :  { %5530 = vrcp.f32 %v3859_v34 }
0x24d7   :  { %v5529_v1 = vpop.eup %5528  ;;  %v3951_v51 = vpop.permute.xlu0 %3950 }
0x24d8   :  { %v3705_v37 = vmul.f32 %v5529_v1, %v5527_v27  ;;  %v5531_v44 = vpop.eup %5530  ;;  %v5210_v27 = vld [vmem:[%s7145_s14 + $0x38] sm:$0xff] }
0x24d9   :  { %v3865_v45 = vmul.f32 %v5531_v44, %v5525_v18 }
0x24da   :  { %5226 = vmatmul.msk.f32.vlgmr.msra.gmra.mxu1 %vm181_vm8, %v3705_v37 }
0x24db   :  { %5237 = vmatpush.xpose.msk.msra.mxu1 %vm181_vm8, %v3953_v41  ;;  %v3627_v41 = vadd.f32 %v6834_v29, %v6702_v47  ;;  %v5247_v29 = vld [vmem:[%s7147_s16 + $0x30] sm:$0xff] }
0x24e2   :  { %5233 = vmatmul.msk.f32.vlgmr.msrb.gmra.mxu1 %vm181_vm8, %v3865_v45 }
0x24e8   :  { %v3820_v46 = vpop.permute.xlu1 %3819 }
0x24e9   :  { %5231 = vmatpush.xpose.msk.msra.mxu3 %vm181_vm8, %v3820_v46 }
0x24ea   :  { %5238 = vmatmul.msk.f32.vlgmr.msra.gmra.mxu1 %vm181_vm8, %v3951_v51  ;;  %v3626_v51 = vadd.f32 %v6830_v59, %v6696_v31 }
0x24ec   :  { %5232 = vmatmul.msk.f32.vlgmr.msra.gmra.mxu3 %vm181_vm8, %v3818_v0 }
0x24ed   :  { %3940 = vmatpush.msrb.mxu3 %v5209_v57 }
0x24ef   :  { %4205 = vmatpush.msra.mxu3 %v5252_v23  ;;  %v6940_v23 = vld [vmem:[%s7207_s1] ss:$0 sm:$0xff] }
0x24f0   :  { %v3981_v53 = vpop.permute.xlu1 %3980 }
0x24f1   :  { %5239 = vmatpush.xpose.msk.msrb.mxu2 %vm181_vm8, %v3981_v53  ;;  %4206 = vmatpush.msra.mxu3 %v5251_v52 }
0x24f3   :  { %4207 = vmatpush.msra.mxu3 %v5250_v55 }
0x24f5   :  { %4101 = vmatpush.msra.mxu2 %v5210_v27 }
0x2557   :  { %v3755_v58 = vpop.f32.mrf.mxu1 }
0x2558   :  { %5228 = vmatmul.msk.f32.gmra.mxu2 %vm181_vm8, %v3755_v58 }
0x255f   :  { %v3890_v61 = vpop.f32.mrf.mxu1 }
0x2560   :  { %5235 = vmatmul.msk.f32.vlgmr.msrb.gmra.mxu3 %vm181_vm8, %v3890_v61  ;;  %5240 = vmatmul.msk.f32.vlgmr.msrb.gmra.mxu2 %vm181_vm8, %v3979_v60  ;;  %v5248_v61 = vld [vmem:[%s7147_s16 + $0x38] sm:$0xff] }
0x2567   :  { %v3975_v2 = vpop.f32.mrf.mxu1 }
0x2568   :  { %v3976_v56 = vadd.f32 %v5593_v3, %v3975_v2  ;;  %v5246_v2 = vld [vmem:[%s7147_s16 + $0x28] sm:$0xff] }
0x256a   :  { %v4006_v49 = vsel %vm181_vm8, %v3976_v56, -inf }
0x256b   :  { %4007 = vmax.xlane.f32.xlu1 %v4006_v49 }
0x256f   :  { %v3842_v15 = vpop.f32.mrf.mxu3 }
0x2570   :  { %v3843_v4 = vadd.f32 %v6795_v42, %v3842_v15 }
0x2572   :  { %v3848_v30 = vsel %vm181_vm8, %v3843_v4, -inf }
0x2573   :  { %3849 = vmax.xlane.f32.xlu0 %v3848_v30 }
0x2584   :  { %3893 = vrot.lane.b32.xlu1 %v6734_v40, %s7215_s28 }
0x25db   :  { %v6846_v6 = vpop.f32.mrf.mxu2 }
0x25dc   :  { %v3788_v44 = vadd.f32 %v6846_v6, %v3627_v41 }
0x25de   :  { %v4008_v9 = vpop.xlane.xlu1 %4007 }
0x25df   :  { %v4012_v43 = vsub.f32 %v3976_v56, %v4008_v9 }
0x25e1   :  { %v4014_v19 = vmul.f32 1.442695, %v4012_v43 }
0x25e3   :  { %5532 = vpow2.f32 %v4014_v19  ;;  %v4003_v22 = vpop.f32.mrf.mxu2  ;;  %v3942_v37 = vpop.f32.mrf.mxu3 }
0x25e4   :  { %v4004_v36 = vadd.f32 %v5593_v3, %v4003_v22  ;;  %v5245_v3 = vld [vmem:[%s7147_s16 + $0x20] sm:$0xff] }
0x25e6   :  { %v3850_v39 = vpop.xlane.xlu0 %3849  ;;  %v4009_v38 = vsel %vm181_vm8, %v4004_v36, -inf }
0x25e7   :  { %v3852_v24 = vsub.f32 %v3843_v4, %v3850_v39 }
0x25e9   :  { %v5533_v8 = vpop.eup %5532  ;;  %v3855_v62 = vmul.f32 1.442695, %v3852_v24 }
0x25ea   :  { %v4018_v26 = vsel %vm181_vm8, %v5533_v8, 0.0 }
0x25eb   :  { %5534 = vpow2.f32 %v3855_v62  ;;  %4019 = vadd.xlane.f32.xlu0 %v4018_v26  ;;  %v5343_v62 = vld [vmem:[%s7146_s15 + $0x1] ss:$0 sm:$0xff] }
0x25f1   :  { %v5535_v7 = vpop.eup %5534 }
0x25f2   :  { %v3860_v35 = vsel %vm181_vm8, %v5535_v7, 0.0 }
0x25f3   :  { %3861 = vadd.xlane.f32.xlu2 %v3860_v35  ;;  %4010 = vmax.xlane.f32.xlu0 %v4009_v38 }
0x25f6   :  { %v3894_v42 = vpop.permute.xlu1 %3893 }
0x25f7   :  { %3914 = vmatpush.msrb.mxu0 %v3894_v42 }
0x260b   :  { %4028 = vrot.lane.b32.xlu2 %v6728_v20, %s7218_s27 }
0x265e   :  { %v4020_v5 = vpop.xlane.xlu0 %4019 }
0x2666   :  { %v4011_v17 = vpop.xlane.xlu0 %4010  ;;  %v3862_v63 = vpop.xlane.xlu2 %3861 }
0x2667   :  { %v4013_v11 = vsub.f32 %v4004_v36, %v4011_v17  ;;  %5536 = vrcp.f32 %v3862_v63 }
0x2669   :  { %v4016_v12 = vmul.f32 1.442695, %v4013_v11 }
0x266b   :  { %5538 = vpow2.f32 %v4016_v12 }
0x266c   :  { %5540 = vrcp.f32 %v4020_v5 }
0x266d   :  { %v5537_v13 = vpop.eup %5536 }
0x266e   :  { %v3866_v54 = vmul.f32 %v5537_v13, %v5535_v7  ;;  %v4029_v14 = vpop.permute.xlu2 %4028 }
0x266f   :  { %4049 = vmatpush.msra.mxu0 %v4029_v14 }
0x2670   :  { %5234 = vmatmul.msk.f32.vlgmr.msrb.gmra.mxu0 %vm181_vm8, %v3866_v54 }
0x2671   :  { %v5539_v18 = vpop.eup %5538  ;;  %4182 = vmatpush.msrb.mxu0 %v5248_v61 }
0x2672   :  { %v4021_v48 = vsel %vm181_vm8, %v5539_v18, 0.0  ;;  %v5541_v33 = vpop.eup %5540 }
0x2673   :  { %4022 = vadd.xlane.f32.xlu0 %v4021_v48  ;;  %v4026_v20 = vmul.f32 %v5541_v33, %v5533_v8  ;;  %4183 = vmatpush.msrb.mxu0 %v5247_v29 }
0x2675   :  { %4184 = vmatpush.msrb.mxu0 %v5246_v2 }
0x2677   :  { %4185 = vmatpush.msrb.mxu0 %v5245_v3 }
0x2678   :  { %5241 = vmatmul.msk.f32.vlgmr.msra.gmra.mxu0 %vm181_vm8, %v4026_v20 }
0x2687   :  { %4054 = vrot.lane.b32.xlu0 %v6734_v40, %s7218_s27  ;;  %v5249_v40 = vld [vmem:[%s7148_s17 + $0x20] sm:$0xff] }
0x2688   :  { %4208 = vmatpush.msra.mxu3 %v5249_v40 }
0x26e6   :  { %v4023_v28 = vpop.xlane.xlu0 %4022 }
0x26e7   :  { %5542 = vrcp.f32 %v4023_v28 }
0x26ed   :  { %v3916_v25 = vpop.f32.mrf.mxu0  ;;  %v5543_v10 = vpop.eup %5542 }
0x26ee   :  { %5236 = vmatmul.msk.f32.gmra.mxu3 %vm181_vm8, %v3916_v25  ;;  %v4027_v34 = vmul.f32 %v5543_v10, %v5539_v18 }
0x26f5   :  { %v4051_v0 = vpop.f32.mrf.mxu0 }
0x26f6   :  { %5243 = vmatmul.msk.f32.vlgmr.msra.gmra.mxu2 %vm181_vm8, %v4051_v0  ;;  %5259 = vmatmul.msk.f32.vlgmr.msra.gmra.mxu3 %vm98_vm0, %v6445_v21  ;;  %v3787_v21 = vadd.f32 %v6844_v32, %v3626_v51 }
0x26f8   :  { %v3948_v53 = vadd.f32 %v3942_v37, %v3787_v21 }
0x26f9   :  { %v4055_v1 = vpop.permute.xlu0 %4054 }
0x26fa   :  { %4075 = vmatpush.msrb.mxu1 %v4055_v1 }
0x26fb   :  { %5242 = vmatmul.msk.f32.vlgmr.msrb.gmra.mxu1 %vm181_vm8, %v4027_v34 }
0x26fe   :  { %5260 = vmatmul.msk.f32.gmra.mxu3 %vm98_vm0, %v6452_v50 }
0x2771   :  { %v3945_v45 = vpop.f32.mrf.mxu3 }
0x2772   :  { %v3949_v46 = vadd.f32 %v3945_v45, %v3788_v44  ;;  %v6961_v45 = vld [vmem:[%s7207_s1 + $0x1] ss:$0 sm:$0xff] }
0x2778   :  { %v4077_v57 = vpop.f32.mrf.mxu1 }
0x2779   :  { %v4103_v58 = vpop.f32.mrf.mxu2  ;;  %5244 = vmatmul.msk.f32.gmra.mxu2 %vm181_vm8, %v4077_v57  ;;  %v6887_v60 = vpop.f32.mrf.mxu3 }
0x277a   :  { %v6889_v50 = vadd.f32 %v4103_v58, %v3948_v53  ;;  %4375 = vrot.lane.b32.xlu0 %v6887_v60, %s7220_s22  ;;  %5261 = vmatpush.xpose.msk.msra.mxu1 %vm181_vm8, %v6887_v60 }
0x277c   :  { %v4127_v31 = vmul.f32 %v6889_v50, %v6889_v50 }
0x277e   :  { %v4129_v47 = vsel %vm98_vm0, %v4127_v31, 0.0 }
0x277f   :  { %4130 = vadd.xlane.f32.xlu1 %v4129_v47 }
0x2781   :  { %v6898_v59 = vpop.f32.mrf.mxu3 }
0x2782   :  { %5263 = vmatpush.xpose.msk.msrb.mxu1 %vm181_vm8, %v6898_v59 }
0x27ec   :  { %v4376_v14 = vpop.permute.xlu0 %4375 }
0x27f2   :  { %v4131_v56 = vpop.xlane.xlu1 %4130 }
0x27f3   :  { %v4135_v49 = vmul.f32 %v4131_v56, %v5783_v16 }
0x27f5   :  { %v4137_v15 = vadd.f32 1e-06, %v4135_v49 }
0x27f7   :  { %5544 = vrsqrt.f32 %v4137_v15  ;;  %vm4145_vm5 = vweird.f32 %v4137_v15 }
0x27fc   :  { %v4106_v4 = vpop.f32.mrf.mxu2 }
0x27fd   :  { %v5545_v30 = vpop.eup %5544  ;;  %v6915_v32 = vadd.f32 %v4106_v4, %v3949_v46 }
0x27fe   :  { %v4140_v9 = vmul.f32 %v5545_v30, %v4137_v15  ;;  %vm4146_vm4 = vweird.f32 %v5545_v30 }
0x27ff   :  { %v4128_v43 = vmul.f32 %v6915_v32, %v6915_v32  ;;  %vm4147_vm6 = vmor %vm4145_vm5, %vm4146_vm4 }
0x2800   :  { %v4141_v6 = vmul.f32 %v5545_v30, %v4140_v9 }
0x2801   :  { %v4132_v19 = vsel %vm98_vm0, %v4128_v43, 0.0  ;;  %v5253_v43 = vld [vmem:[%s7149_s18 + $0x20] sm:$0xff] }
0x2802   :  { %v4142_v39 = vmul.f32 0.5, %v4141_v6  ;;  %4133 = vadd.xlane.f32.xlu2 %v4132_v19  ;;  %4363 = vmatpush.msrb.mxu3 %v5253_v43 }
0x2804   :  { %v4143_v24 = vsub.f32 1.5, %v4142_v39 }
0x2806   :  { %v4144_v8 = vmul.f32 %v5545_v30, %v4143_v24 }
0x2808   :  { %v4148_v26 = vsel %vm4147_vm6, %v5545_v30, %v4144_v8  ;;  %vm5013_vm6 = vcmask 1040384  }
0x2809   :  { %v4159_v22 = vmul.f32 %v4148_v26, %v6889_v50 }
0x280b   :  { %v4162_v36 = vmul.f32 %v5343_v62, %v4159_v22 }
0x280d   :  { %5257 = vmatmul.msk.f32.vlgmr.msrb.gmra.mxu0 %vm98_vm0, %v4162_v36 }
0x281a   :  { %4290 = vrot.lane.b32.xlu2 %v6887_v60, %s7219_s19 }
0x2875   :  { %v4134_v7 = vpop.xlane.xlu2 %4133 }
0x2876   :  { %v4136_v35 = vmul.f32 %v4134_v7, %v5783_v16 }
0x2878   :  { %v4138_v38 = vadd.f32 1e-06, %v4136_v35 }
0x287a   :  { %5546 = vrsqrt.f32 %v4138_v38  ;;  %vm4155_vm9 = vweird.f32 %v4138_v38 }
0x287d   :  { %v4291_v42 = vpop.permute.xlu2 %4290 }
0x287e   :  { %4311 = vmatpush.msrb.mxu2 %v4291_v42 }
0x2880   :  { %v5547_v5 = vpop.eup %5546 }
0x2881   :  { %v4150_v17 = vmul.f32 %v5547_v5, %v4138_v38  ;;  %vm4156_vm7 = vweird.f32 %v5547_v5 }
0x2882   :  { %vm4157_vm10 = vmor %vm4155_vm9, %vm4156_vm7  ;;  %vm5015_vm7 = vcmask 254976  }
0x2883   :  { %v4151_v63 = vmul.f32 %v5547_v5, %v4150_v17  ;;  %v5254_v17 = vld [vmem:[%s7149_s18 + $0x28] sm:$0xff] }
0x2885   :  { %v4152_v11 = vmul.f32 0.5, %v4151_v63 }
0x2887   :  { %v4153_v12 = vsub.f32 1.5, %v4152_v11 }
0x2889   :  { %v4154_v13 = vmul.f32 %v5547_v5, %v4153_v12 }
0x288a   :  { %v6928_v54 = vpop.f32.mrf.mxu0 }
0x288b   :  { %v4158_v18 = vsel %vm4157_vm10, %v5547_v5, %v4154_v13  ;;  %4373 = vrot.lane.b32.xlu0 %v6928_v54, %s7220_s22  ;;  %5262 = vmatmul.msk.f32.vlgmr.msra.gmra.mxu1 %vm181_vm8, %v6928_v54 }
0x288c   :  { %5269 = vmatpush.xpose.msk.msra.mxu1 %vm181_vm8, %v4376_v14  ;;  %v4160_v48 = vmul.f32 %v4158_v18, %v6915_v32 }
0x288e   :  { %v4163_v33 = vmul.f32 %v5343_v62, %v4160_v48 }
0x2890   :  { %5258 = vmatmul.msk.f32.gmra.mxu0 %vm98_vm0, %v4163_v33 }
0x28fd   :  { %v4374_v40 = vpop.permute.xlu0 %4373 }
0x2908   :  { %v4239_v20 = vpop.f32.mrf.mxu1 }
0x2909   :  { %v4240_v52 = vadd.f32 %v6940_v23, %v4239_v20 }
0x290b   :  { %v4268_v55 = vsel %vm181_vm8, %v4240_v52, -inf }
0x290c   :  { %4269 = vmax.xlane.f32.xlu0 %v4268_v55 }
0x290d   :  { %v6944_v27 = vpop.f32.mrf.mxu0 }
0x290e   :  { %4401 = vrot.lane.b32.xlu2 %v6944_v27, %s7220_s22  ;;  %5264 = vmatmul.msk.f32.vlgmr.msrb.gmra.mxu1 %vm181_vm8, %v6944_v27 }
0x2916   :  { %5270 = vmatmul.msk.f32.vlgmr.msra.gmra.mxu1 %vm181_vm8, %v4374_v40 }
0x2968   :  { %v4402_v3 = vpop.permute.xlu2 %4401 }
0x297f   :  { %v4270_v28 = vpop.xlane.xlu0 %4269 }
0x2980   :  { %v4274_v25 = vsub.f32 %v4240_v52, %v4270_v28 }
0x2982   :  { %v4276_v0 = vmul.f32 1.442695, %v4274_v25 }
0x2984   :  { %5548 = vpow2.f32 %v4276_v0 }
0x298a   :  { %v5549_v10 = vpop.eup %5548 }
0x298b   :  { %v4265_v34 = vpop.f32.mrf.mxu1  ;;  %v4280_v1 = vsel %vm181_vm8, %v5549_v10, 0.0 }
0x298c   :  { %4281 = vadd.xlane.f32.xlu1 %v4280_v1  ;;  %v4266_v46 = vadd.f32 %v6961_v45, %v4265_v34 }
0x298e   :  { %v4271_v51 = vsel %vm181_vm8, %v4266_v46, -inf }
0x2993   :  { %v4398_v37 = vpop.f32.mrf.mxu1 }
0x2994   :  { %v4399_v41 = vadd.f32 %v6940_v23, %v4398_v37 }
0x2996   :  { %v4429_v44 = vsel %vm181_vm8, %v4399_v41, -inf }
0x2997   :  { %4430 = vmax.xlane.f32.xlu0 %v4429_v44 }
0x29a5   :  { %4403 = vrot.lane.b32.xlu1 %v6898_v59, %s7220_s22 }
0x29ab   :  { %4316 = vrot.lane.b32.xlu0 %v6898_v59, %s7219_s19 }
0x29cf   :  { %4272 = vmax.xlane.f32.xlu1 %v4271_v51 }
0x29e8   :  { %4536 = vrot.lane.b32.xlu1 %v6887_v60, %s7213_s26 }
0x29ff   :  { %v4282_v21 = vpop.xlane.xlu1 %4281 }
0x2a00   :  { %5550 = vrcp.f32 %v4282_v21 }
0x2a06   :  { %v5551_v53 = vpop.eup %5550 }
0x2a07   :  { %v4288_v57 = vmul.f32 %v5551_v53, %v5549_v10 }
0x2a09   :  { %5265 = vmatmul.msk.f32.vlgmr.msrb.gmra.mxu2 %vm181_vm8, %v4288_v57 }
0x2a0a   :  { %v4431_v58 = vpop.xlane.xlu0 %4430 }
0x2a0b   :  { %v4435_v31 = vsub.f32 %v4399_v41, %v4431_v58 }
0x2a0d   :  { %v4437_v47 = vmul.f32 1.442695, %v4435_v31 }
0x2a0f   :  { %5552 = vpow2.f32 %v4437_v47 }
0x2a15   :  { %v5553_v61 = vpop.eup %5552 }
0x2a16   :  { %v4441_v29 = vsel %vm181_vm8, %v5553_v61, 0.0 }
0x2a17   :  { %v4404_v2 = vpop.permute.xlu1 %4403  ;;  %4442 = vadd.xlane.f32.xlu0 %v4441_v29 }
0x2a18   :  { %5271 = vmatpush.xpose.msk.msra.mxu2 %vm181_vm8, %v4404_v2 }
0x2a1b   :  { %5272 = vmatmul.msk.f32.vlgmr.msra.gmra.mxu2 %vm181_vm8, %v4402_v3 }
0x2a1c   :  { %4524 = vmatpush.msrb.mxu2 %v5254_v17 }
0x2a1d   :  { %v4317_v56 = vpop.permute.xlu0 %4316 }
0x2a1e   :  { %4337 = vmatpush.msra.mxu0 %v4317_v56 }
0x2a2b   :  { %4451 = vrot.lane.b32.xlu0 %v6887_v60, %s7221_s3 }
0x2a42   :  { %v4273_v49 = vpop.xlane.xlu1 %4272 }
0x2a43   :  { %v4275_v15 = vsub.f32 %v4266_v46, %v4273_v49 }
0x2a45   :  { %v4278_v4 = vmul.f32 1.442695, %v4275_v15 }
0x2a47   :  { %5554 = vpow2.f32 %v4278_v4 }
0x2a4d   :  { %v5555_v30 = vpop.eup %5554 }
0x2a4e   :  { %v4283_v9 = vsel %vm181_vm8, %v5555_v30, 0.0 }
0x2a4f   :  { %4284 = vadd.xlane.f32.xlu2 %v4283_v9 }
0x2a5a   :  { %v4537_v35 = vpop.permute.xlu1 %4536 }
0x2a67   :  { %4534 = vrot.lane.b32.xlu2 %v6928_v54, %s7213_s26 }
0x2a6f   :  { %4477 = vrot.lane.b32.xlu2 %v6898_v59, %s7221_s3 }
0x2a8a   :  { %v4443_v19 = vpop.xlane.xlu0 %4442 }
0x2a8c   :  { %v4313_v6 = vpop.f32.mrf.mxu2 }
0x2a8d   :  { %5267 = vmatmul.msk.f32.vlgmr.msrb.gmra.mxu3 %vm181_vm8, %v4313_v6 }
0x2a9d   :  { %v4452_v39 = vpop.permute.xlu0 %4451 }
0x2a9e   :  { %v4426_v24 = vpop.f32.mrf.mxu2  ;;  %4472 = vmatpush.msrb.mxu0 %v4452_v39  ;;  %v5255_v39 = vld [vmem:[%s7149_s18 + $0x30] sm:$0xff] }
0x2a9f   :  { %v4427_v8 = vadd.f32 %v6961_v45, %v4426_v24 }
0x2aa1   :  { %v4432_v62 = vsel %vm181_vm8, %v4427_v8, -inf }
0x2aa2   :  { %4433 = vmax.xlane.f32.xlu0 %v4432_v62 }
0x2ab6   :  { %4564 = vrot.lane.b32.xlu0 %v6898_v59, %s7213_s26 }
0x2abe   :  { %4612 = vrot.lane.b32.xlu0 %v6887_v60, %s7212_s0 }
0x2ac2   :  { %v4285_v26 = vpop.xlane.xlu2 %4284 }
0x2ac3   :  { %5556 = vrcp.f32 %v4285_v26 }
0x2ac4   :  { %5558 = vrcp.f32 %v4443_v19 }
0x2ac6   :  { %4725 = vrot.lane.b32.xlu0 %v6898_v59, %s7214_s29 }
0x2ac9   :  { %v5557_v22 = vpop.eup %5556 }
0x2aca   :  { %v4289_v36 = vmul.f32 %v5557_v22, %v5555_v30  ;;  %v4535_v7 = vpop.permute.xlu2 %4534  ;;  %v5559_v38 = vpop.eup %5558 }
0x2acb   :  { %v4449_v42 = vmul.f32 %v5559_v38, %v5553_v61 }
0x2acc   :  { %5266 = vmatmul.msk.f32.vlgmr.msra.gmra.mxu0 %vm181_vm8, %v4289_v36 }
0x2acd   :  { %5277 = vmatpush.xpose.msk.msra.mxu0 %vm181_vm8, %v4537_v35 }
0x2ad2   :  { %v4478_v5 = vpop.permute.xlu2 %4477 }
0x2ad3   :  { %4498 = vmatpush.msrb.mxu1 %v4478_v5 }
0x2ad4   :  { %5273 = vmatmul.msk.f32.vlgmr.msrb.gmra.mxu0 %vm181_vm8, %v4449_v42 }
0x2adc   :  { %5278 = vmatmul.msk.f32.vlgmr.msra.gmra.mxu0 %vm181_vm8, %v4535_v7 }
0x2b10   :  { %v7017_v21 = vpop.f32.mrf.mxu3 }
0x2b15   :  { %v4434_v63 = vpop.xlane.xlu0 %4433 }
0x2b16   :  { %v4436_v11 = vsub.f32 %v4427_v8, %v4434_v63 }
0x2b18   :  { %v4439_v12 = vmul.f32 1.442695, %v4436_v11 }
0x2b1a   :  { %5560 = vpow2.f32 %v4439_v12 }
0x2b20   :  { %v5561_v13 = vpop.eup %5560 }
0x2b21   :  { %v4444_v14 = vsel %vm181_vm8, %v5561_v13, 0.0 }
0x2b22   :  { %4445 = vadd.xlane.f32.xlu1 %v4444_v14 }
0x2b28   :  { %v4565_v18 = vpop.permute.xlu0 %4564 }
0x2b29   :  { %5279 = vmatpush.xpose.msk.msra.mxu3 %vm181_vm8, %v4565_v18 }
0x2b2d   :  { %4685 = vmatpush.msrb.mxu3 %v5255_v39  ;;  %v5299_v39 = vld [vmem:[%s7223_s23 + $0x50] sm:$0xff] }
0x2b30   :  { %v4613_v48 = vpop.permute.xlu0 %4612 }
0x2b31   :  { %4633 = vmatpush.msra.mxu1 %v4613_v48 }
0x2b38   :  { %v4726_v33 = vpop.permute.xlu0 %4725 }
0x2b39   :  { %5287 = vmatpush.xpose.msk.msra.mxu2 %vm181_vm8, %v4726_v33 }
0x2b3b   :  { %4562 = vrot.lane.b32.xlu1 %v6944_v27, %s7213_s26 }
0x2b43   :  { %4723 = vrot.lane.b32.xlu1 %v6944_v27, %s7214_s29 }
0x2b49   :  { %v4339_v20 = vpop.f32.mrf.mxu0 }
0x2b4a   :  { %5268 = vmatmul.msk.f32.gmra.mxu3 %vm181_vm8, %v4339_v20 }
0x2b51   :  { %v4474_v52 = vpop.f32.mrf.mxu0 }
0x2b52   :  { %5275 = vmatmul.msk.f32.vlgmr.msrb.gmra.mxu2 %vm181_vm8, %v4474_v52 }
0x2b59   :  { %v4559_v55 = vpop.f32.mrf.mxu0 }
0x2b5a   :  { %v4560_v40 = vadd.f32 %v6940_v23, %v4559_v55 }
0x2b5c   :  { %v4590_v28 = vsel %vm181_vm8, %v4560_v40, -inf }
0x2b5d   :  { %4591 = vmax.xlane.f32.xlu2 %v4590_v28 }
0x2b75   :  { %4697 = vrot.lane.b32.xlu2 %v6887_v60, %s7214_s29 }
0x2b95   :  { %v4446_v25 = vpop.xlane.xlu1 %4445 }
0x2b96   :  { %5562 = vrcp.f32 %v4446_v25 }
0x2b9c   :  { %v5563_v0 = vpop.eup %5562 }
0x2b9d   :  { %v4450_v10 = vmul.f32 %v5563_v0, %v5561_v13  ;;  %v4371_v0 = vadd.f32 %v7017_v21, %v6889_v50 }
0x2b9f   :  { %5274 = vmatmul.msk.f32.vlgmr.msrb.gmra.mxu1 %vm181_vm8, %v4450_v10 }
0x2bad   :  { %v4563_v27 = vpop.permute.xlu1 %4562 }
0x2bae   :  { %5280 = vmatmul.msk.f32.vlgmr.msra.gmra.mxu3 %vm181_vm8, %v4563_v27 }
0x2bb5   :  { %v4724_v53 = vpop.permute.xlu1 %4723 }
0x2bcd   :  { %v7020_v57 = vpop.f32.mrf.mxu3 }
0x2bd0   :  { %v4592_v34 = vpop.xlane.xlu2 %4591 }
0x2bd1   :  { %v4596_v1 = vsub.f32 %v4560_v40, %v4592_v34 }
0x2bd3   :  { %v4598_v37 = vmul.f32 1.442695, %v4596_v1 }
0x2bd5   :  { %5564 = vpow2.f32 %v4598_v37  ;;  %v7026_v3 = vpop.f32.mrf.mxu2 }
0x2bd6   :  { %v4532_v27 = vadd.f32 %v7026_v3, %v4371_v0 }
0x2bd8   :  { %v4698_v41 = vpop.permute.xlu2 %4697 }
0x2bd9   :  { %5285 = vmatpush.xpose.msk.msrb.mxu1 %vm181_vm8, %v4698_v41  ;;  %v4372_v41 = vadd.f32 %v7020_v57, %v6915_v32  ;;  %v5296_v32 = vld [vmem:[%s7151_s20 + $0x38] sm:$0xff]  ;;  %v5295_v57 = vld [vmem:[%s7151_s20 + $0x30] sm:$0xff] }
0x2bdb   :  { %v5565_v44 = vpop.eup %5564 }
0x2bdc   :  { %v4602_v46 = vsel %vm181_vm8, %v5565_v44, 0.0 }
0x2bdd   :  { %4603 = vadd.xlane.f32.xlu0 %v4602_v46 }
0x2bf1   :  { %4695 = vrot.lane.b32.xlu0 %v6928_v54, %s7214_s29  ;;  %s7227_s29 = sld [smem:[#allocation17_spill]] }
0x2c1c   :  { %v4500_v51 = vpop.f32.mrf.mxu1 }
0x2c1d   :  { %5276 = vmatmul.msk.f32.gmra.mxu2 %vm181_vm8, %v4500_v51 }
0x2c25   :  { %5288 = vmatmul.msk.f32.vlgmr.msra.gmra.mxu2 %vm181_vm8, %v4724_v53 }
0x2c31   :  { %v4587_v58 = vpop.f32.mrf.mxu3 }
0x2c32   :  { %v4588_v31 = vadd.f32 %v6961_v45, %v4587_v58 }
0x2c34   :  { %v4593_v47 = vsel %vm181_vm8, %v4588_v31, -inf }
0x2c35   :  { %4594 = vmax.xlane.f32.xlu0 %v4593_v47 }
0x2c50   :  { %v4604_v61 = vpop.xlane.xlu0 %4603 }
0x2c51   :  { %5566 = vrcp.f32 %v4604_v61  ;;  %v5294_v61 = vld [vmem:[%s7151_s20 + $0x28] sm:$0xff] }
0x2c57   :  { %v5567_v29 = vpop.eup %5566 }
0x2c58   :  { %v4610_v54 = vmul.f32 %v5567_v29, %v5565_v44  ;;  %v5293_v29 = vld [vmem:[%s7151_s20 + $0x20] sm:$0xff] }
0x2c5a   :  { %5281 = vmatmul.msk.f32.vlgmr.msra.gmra.mxu1 %vm181_vm8, %v4610_v54 }
0x2c63   :  { %v4696_v2 = vpop.permute.xlu0 %4695 }
0x2c64   :  { %5286 = vmatmul.msk.f32.vlgmr.msrb.gmra.mxu1 %vm181_vm8, %v4696_v2 }
0x2ca0   :  { %v7028_v56 = vpop.f32.mrf.mxu2 }
0x2ca1   :  { %v4533_v51 = vadd.f32 %v7028_v56, %v4372_v41  ;;  %v5304_v56 = vld [vmem:[%s7223_s23 + $0x78] sm:$0xff] }
0x2ca2   :  { %4953 = vmatpush.msra.mxu3 %v5304_v56  ;;  %v5345_v56 = vld [vmem:[%s7227_s29] ss:$0 sm:$0xff] }
0x2ca8   :  { %v4748_v49 = vpop.f32.mrf.mxu2  ;;  %v4595_v15 = vpop.xlane.xlu0 %4594 }
0x2ca9   :  { %v4749_v4 = vadd.f32 %v6961_v45, %v4748_v49  ;;  %v4597_v30 = vsub.f32 %v4588_v31, %v4595_v15  ;;  %v5303_v49 = vld [vmem:[%s7223_s23 + $0x70] sm:$0xff]  ;;  %v5302_v15 = vld [vmem:[%s7223_s23 + $0x68] sm:$0xff] }
0x2caa   :  { %4954 = vmatpush.msra.mxu3 %v5303_v49 }
0x2cab   :  { %v4600_v9 = vmul.f32 1.442695, %v4597_v30  ;;  %v4754_v43 = vsel %vm181_vm8, %v4749_v4, -inf }
0x2cac   :  { %4755 = vmax.xlane.f32.xlu1 %v4754_v43  ;;  %4955 = vmatpush.msra.mxu3 %v5302_v15  ;;  %v5300_v43 = vld [vmem:[%s7223_s23 + $0x58] sm:$0xff] }
0x2cad   :  { %5568 = vpow2.f32 %v4600_v9 }
0x2cb3   :  { %v5569_v6 = vpop.eup %5568 }
0x2cb4   :  { %v4605_v19 = vsel %vm181_vm8, %v5569_v6, 0.0 }
0x2cb5   :  { %4606 = vadd.xlane.f32.xlu0 %v4605_v19 }
0x2cc5   :  { %4638 = vrot.lane.b32.xlu1 %v6898_v59, %s7212_s0  ;;  %s5634_s0 = smov [#allocation2]  }
0x2cd7   :  { %v4635_v24 = vpop.f32.mrf.mxu1 }
0x2cd8   :  { %5283 = vmatmul.msk.f32.vlgmr.msrb.gmra.mxu3 %vm181_vm8, %v4635_v24 }
0x2ce1   :  { %v4720_v45 = vpop.f32.mrf.mxu1 }
0x2ce2   :  { %v4721_v8 = vadd.f32 %v6940_v23, %v4720_v45 }
0x2ce4   :  { %v4751_v62 = vsel %vm181_vm8, %v4721_v8, -inf }
0x2ce5   :  { %4752 = vmax.xlane.f32.xlu2 %v4751_v62 }
0x2d1f   :  { %v4756_v26 = vpop.xlane.xlu1 %4755 }
0x2d20   :  { %v4758_v22 = vsub.f32 %v4749_v4, %v4756_v26  ;;  %v5301_v4 = vld [vmem:[%s7223_s23 + $0x60] sm:$0xff] }
0x2d21   :  { %4956 = vmatpush.msra.mxu3 %v5301_v4 }
0x2d22   :  { %v4761_v36 = vmul.f32 1.442695, %v4758_v22 }
0x2d23   :  { %4957 = vmatpush.msra.mxu3 %v5300_v43 }
0x2d24   :  { %5570 = vpow2.f32 %v4761_v36 }
0x2d25   :  { %4958 = vmatpush.msra.mxu3 %v5299_v39 }
0x2d28   :  { %v4607_v35 = vpop.xlane.xlu0 %4606 }
0x2d29   :  { %5572 = vrcp.f32 %v4607_v35 }
0x2d2a   :  { %v5571_v7 = vpop.eup %5570 }
0x2d2b   :  { %v4766_v38 = vsel %vm181_vm8, %v5571_v7, 0.0 }
0x2d2c   :  { %4767 = vadd.xlane.f32.xlu0 %v4766_v38 }
0x2d2f   :  { %v5573_v42 = vpop.eup %5572 }
0x2d30   :  { %v4611_v5 = vmul.f32 %v5573_v42, %v5569_v6 }
0x2d37   :  { %v4639_v17 = vpop.permute.xlu1 %4638 }
0x2d38   :  { %4659 = vmatpush.msrb.mxu0 %v4639_v17 }
0x2d39   :  { %5282 = vmatmul.msk.f32.vlgmr.msrb.gmra.mxu0 %vm181_vm8, %v4611_v5 }
0x2d40   :  { %4799 = vrot.lane.b32.xlu0 %v6898_v59, %s7216_s25 }
0x2d58   :  { %v4753_v23 = vpop.xlane.xlu2 %4752 }
0x2d59   :  { %v4757_v63 = vsub.f32 %v4721_v8, %v4753_v23 }
0x2d5b   :  { %v4759_v11 = vmul.f32 1.442695, %v4757_v63  ;;  %v4687_v10 = vpop.f32.mrf.mxu3 }
0x2d5c   :  { %v4693_v34 = vadd.f32 %v4687_v10, %v4532_v27 }
0x2d5d   :  { %5574 = vpow2.f32 %v4759_v11 }
0x2d63   :  { %v5575_v12 = vpop.eup %5574 }
0x2d64   :  { %v4763_v13 = vsel %vm181_vm8, %v5575_v12, 0.0 }
0x2d65   :  { %4764 = vadd.xlane.f32.xlu2 %v4763_v13 }
0x2d7d   :  { %4773 = vrot.lane.b32.xlu2 %v6887_v60, %s7216_s25  ;;  %v5256_v60 = vld [vmem:[%s7149_s18 + $0x38] sm:$0xff]  ;;  %s5022_s25 = sshll.u32 %s5634_s0, 4  ;;  %s5023_s25 = int_to_ptr.vmem [resolvable:$true] %s5022_s25 }
0x2d7e   :  { %4846 = vmatpush.msrb.mxu2 %v5256_v60 }
0x2d9f   :  { %v4768_v14 = vpop.xlane.xlu0 %4767 }
0x2da0   :  { %5576 = vrcp.f32 %v4768_v14  ;;  %v5298_v14 = vld [vmem:[%s7223_s23 + $0x48] sm:$0xff] }
0x2da1   :  { %4959 = vmatpush.msra.mxu3 %v5298_v14 }
0x2da6   :  { %v5577_v18 = vpop.eup %5576 }
0x2da7   :  { %v4772_v48 = vmul.f32 %v5577_v18, %v5571_v7  ;;  %v5344_v7 = vld [vmem:[%s7224_s10 + $0x1] ss:$0 sm:$0xff] }
0x2da8   :  { %v5297_v18 = vld [vmem:[%s7223_s23 + $0x40] sm:$0xff] }
0x2da9   :  { %4960 = vmatpush.msra.mxu3 %v5297_v18 }
0x2db2   :  { %v4800_v33 = vpop.permute.xlu0 %4799 }
0x2db3   :  { %4820 = vmatpush.msra.mxu1 %v4800_v33 }
0x2db4   :  { %5290 = vmatmul.msk.f32.vlgmr.msra.gmra.mxu1 %vm181_vm8, %v4772_v48 }
0x2db6   :  { %v4661_v59 = vpop.f32.mrf.mxu0 }
0x2db7   :  { %5284 = vmatmul.msk.f32.gmra.mxu3 %vm181_vm8, %v4661_v59 }
0x2dd8   :  { %v4765_v20 = vpop.xlane.xlu2 %4764 }
0x2dd9   :  { %5578 = vrcp.f32 %v4765_v20 }
0x2ddf   :  { %v5579_v52 = vpop.eup %5578 }
0x2de0   :  { %v4771_v55 = vmul.f32 %v5579_v52, %v5575_v12  ;;  %v4774_v40 = vpop.permute.xlu2 %4773 }
0x2de1   :  { %4794 = vmatpush.msra.mxu0 %v4774_v40 }
0x2de2   :  { %5289 = vmatmul.msk.f32.vlgmr.msra.gmra.mxu0 %vm181_vm8, %v4771_v55 }
0x2de3   :  { %4926 = vmatpush.msrb.mxu0 %v5296_v32 }
0x2de5   :  { %4927 = vmatpush.msrb.mxu0 %v5295_v57 }
0x2de7   :  { %4928 = vmatpush.msrb.mxu0 %v5294_v61 }
0x2de9   :  { %4929 = vmatpush.msrb.mxu0 %v5293_v29 }
0x2e31   :  { %v4822_v25 = vpop.f32.mrf.mxu1 }
0x2e3a   :  { %v4690_v46 = vpop.f32.mrf.mxu3 }
0x2e3b   :  { %v4694_v50 = vadd.f32 %v4690_v46, %v4533_v51 }
0x2e5f   :  { %v4796_v28 = vpop.f32.mrf.mxu0 }
0x2e60   :  { %5291 = vmatmul.msk.f32.vlgmr.msrb.gmra.mxu2 %vm181_vm8, %v4796_v28 }
0x2e68   :  { %5292 = vmatmul.msk.f32.gmra.mxu2 %vm181_vm8, %v4822_v25 }
0x2ee3   :  { %v4848_v1 = vpop.f32.mrf.mxu2 }
0x2ee4   :  { %v7059_v37 = vadd.f32 %v4848_v1, %v4693_v34 }
0x2ee6   :  { %v4871_v44 = vmul.f32 %v7059_v37, %v7059_v37 }
0x2ee8   :  { %v4873_v53 = vsel %vm98_vm0, %v4871_v44, 0.0 }
0x2ee9   :  { %4874 = vadd.xlane.f32.xlu1 %v4873_v53 }
0x2eeb   :  { %v4851_v21 = vpop.f32.mrf.mxu2 }
0x2eec   :  { %v7067_v58 = vadd.f32 %v4851_v21, %v4694_v50 }
0x2eee   :  { %v4872_v31 = vmul.f32 %v7067_v58, %v7067_v58 }
0x2ef0   :  { %v4876_v47 = vsel %vm98_vm0, %v4872_v31, 0.0 }
0x2ef1   :  { %4877 = vadd.xlane.f32.xlu2 %v4876_v47 }
0x2f5c   :  { %v4875_v54 = vpop.xlane.xlu1 %4874 }
0x2f5d   :  { %v4879_v2 = vmul.f32 %v4875_v54, %v5783_v16 }
0x2f5f   :  { %v4881_v3 = vadd.f32 1e-06, %v4879_v2 }
0x2f61   :  { %5580 = vrsqrt.f32 %v4881_v3  ;;  %vm4889_vm11 = vweird.f32 %v4881_v3 }
0x2f64   :  { %v4878_v30 = vpop.xlane.xlu2 %4877 }
0x2f65   :  { %v4880_v9 = vmul.f32 %v4878_v30, %v5783_v16 }
0x2f67   :  { %v5581_v6 = vpop.eup %5580  ;;  %v4882_v19 = vadd.f32 1e-06, %v4880_v9 }
0x2f68   :  { %v4884_v24 = vmul.f32 %v5581_v6, %v4881_v3  ;;  %vm4890_vm8 = vweird.f32 %v5581_v6 }
0x2f69   :  { %5582 = vrsqrt.f32 %v4882_v19  ;;  %vm4891_vm12 = vmor %vm4889_vm11, %vm4890_vm8  ;;  %vm4899_vm14 = vweird.f32 %v4882_v19 }
0x2f6a   :  { %v4885_v45 = vmul.f32 %v5581_v6, %v4884_v24 }
0x2f6c   :  { %v4886_v8 = vmul.f32 0.5, %v4885_v45 }
0x2f6e   :  { %v4887_v62 = vsub.f32 1.5, %v4886_v8 }
0x2f6f   :  { %v5583_v26 = vpop.eup %5582 }
0x2f70   :  { %v4888_v22 = vmul.f32 %v5581_v6, %v4887_v62  ;;  %v4894_v36 = vmul.f32 %v5583_v26, %v4882_v19  ;;  %vm4900_vm13 = vweird.f32 %v5583_v26 }
0x2f71   :  { %vm4901_vm1 = vmor %vm4899_vm14, %vm4900_vm13 }
0x2f72   :  { %v4892_v35 = vsel %vm4891_vm12, %v5581_v6, %v4888_v22  ;;  %v4895_v38 = vmul.f32 %v5583_v26, %v4894_v36 }
0x2f73   :  { %v4903_v42 = vmul.f32 %v4892_v35, %v7059_v37 }
0x2f74   :  { %v4896_v5 = vmul.f32 0.5, %v4895_v38 }
0x2f75   :  { %v4906_v17 = vmul.f32 %v5344_v7, %v4903_v42 }
0x2f76   :  { %v4897_v23 = vsub.f32 1.5, %v4896_v5 }
0x2f77   :  { %5305 = vmatmul.msk.f32.vlgmr.msrb.gmra.mxu0 %vm98_vm0, %v4906_v17 }
0x2f78   :  { %v4898_v63 = vmul.f32 %v5583_v26, %v4897_v23 }
0x2f7a   :  { %v4902_v11 = vsel %vm4901_vm1, %v5583_v26, %v4898_v63 }
0x2f7b   :  { %v4904_v12 = vmul.f32 %v4902_v11, %v7067_v58 }
0x2f7d   :  { %v4907_v13 = vmul.f32 %v5344_v7, %v4904_v12 }
0x2f7f   :  { %5306 = vmatmul.msk.f32.gmra.mxu0 %vm98_vm0, %v4907_v13 }
0x2ff4   :  { %v4931_v48 = vpop.f32.mrf.mxu0 }
0x2ff5   :  { %v4937_v33 = vmax.f32 %v4931_v48, 0.0 }
0x2ff7   :  { %5307 = vmatmul.msk.f32.vlgmr.msra.gmra.mxu3 %vm908_vm15, %v4937_v33 }
0x2ffc   :  { %v4934_v59 = vpop.f32.mrf.mxu0 }
0x2ffd   :  { %v4938_v20 = vmax.f32 %v4934_v59, 0.0 }
0x2fff   :  { %5308 = vmatmul.msk.f32.gmra.mxu3 %vm908_vm15, %v4938_v20 }
0x307a   :  { %v4962_v52 = vpop.f32.mrf.mxu3 }
0x307b   :  { %v4968_v55 = vadd.f32 %v4962_v52, %v7059_v37 }
0x307d   :  { %v4971_v40 = vmul.f32 %v4968_v55, %v4968_v55 }
0x307f   :  { %v4973_v60 = vsel %vm98_vm0, %v4971_v40, 0.0 }
0x3080   :  { %4974 = vadd.xlane.f32.xlu1 %v4973_v60 }
0x3082   :  { %v4965_v28 = vpop.f32.mrf.mxu3 }
0x3083   :  { %v4969_v25 = vadd.f32 %v4965_v28, %v7067_v58 }
0x3085   :  { %v4972_v0 = vmul.f32 %v4969_v25, %v4969_v25 }
0x3087   :  { %v4976_v10 = vsel %vm98_vm0, %v4972_v0, 0.0 }
0x3088   :  { %4977 = vadd.xlane.f32.xlu0 %v4976_v10 }
0x30f3   :  { %v4975_v27 = vpop.xlane.xlu1 %4974 }
0x30f4   :  { %v4979_v34 = vmul.f32 %v4975_v27, %v5783_v16 }
0x30f6   :  { %v4981_v1 = vadd.f32 1e-06, %v4979_v34 }
0x30f8   :  { %5584 = vrsqrt.f32 %v4981_v1  ;;  %vm4989_vm15 = vweird.f32 %v4981_v1 }
0x30fb   :  { %v4978_v41 = vpop.xlane.xlu0 %4977 }
0x30fc   :  { %v4980_v44 = vmul.f32 %v4978_v41, %v5783_v16 }
0x30fe   :  { %v5585_v37 = vpop.eup %5584  ;;  %v4982_v46 = vadd.f32 1e-06, %v4980_v44 }
0x30ff   :  { %v4984_v51 = vmul.f32 %v5585_v37, %v4981_v1  ;;  %vm4990_vm0 = vweird.f32 %v5585_v37 }
0x3100   :  { %5586 = vrsqrt.f32 %v4982_v46  ;;  %vm4991_vm3 = vmor %vm4989_vm15, %vm4990_vm0  ;;  %vm4999_vm4 = vweird.f32 %v4982_v46 }
0x3101   :  { %v4985_v53 = vmul.f32 %v5585_v37, %v4984_v51 }
0x3103   :  { %v4986_v50 = vmul.f32 0.5, %v4985_v53 }
0x3105   :  { %v4987_v58 = vsub.f32 1.5, %v4986_v50 }
0x3106   :  { %v5587_v21 = vpop.eup %5586 }
0x3107   :  { %v4994_v31 = vmul.f32 %v5587_v21, %v4982_v46  ;;  %v4988_v32 = vmul.f32 %v5585_v37, %v4987_v58  ;;  %vm5000_vm2 = vweird.f32 %v5587_v21 }
0x3108   :  { %vm5001_vm5 = vmor %vm4999_vm4, %vm5000_vm2 }
0x3109   :  { %v4995_v47 = vmul.f32 %v5587_v21, %v4994_v31  ;;  %v4992_v29 = vsel %vm4991_vm3, %v5585_v37, %v4988_v32 }
0x310a   :  { %v5003_v2 = vmul.f32 %v4992_v29, %v4968_v55 }
0x310b   :  { %v4996_v57 = vmul.f32 0.5, %v4995_v47 }
0x310c   :  { %v5008_v15 = vmul.f32 %v5345_v56, %v5003_v2 }
0x310d   :  { %v4997_v61 = vsub.f32 1.5, %v4996_v57 }
0x310f   :  { %v4998_v54 = vmul.f32 %v5587_v21, %v4997_v61 }
0x3111   :  { %v5002_v16 = vsel %vm5001_vm5, %v5587_v21, %v4998_v54 }
0x3112   :  { %v5004_v3 = vmul.f32 %v5002_v16, %v4969_v25 }
0x3114   :  { %v5009_v49 = vmul.f32 %v5345_v56, %v5004_v3 }
0x3116   :  { %v5011_v4 = vrot.slane %v5009_v49, 7 }
0x3118   :  { %v5014_v30 = vsel %vm5013_vm6, %v5008_v15, %v5011_v4 }
0x3119   :  { %5016 = vst.msk [vmem:[#allocation2] sm:$0x3] %vm5015_vm7, %v5014_v30 }
0x311a   :  { %5027 = dma.vmem_to_hbm [thread:$0]  %s5023_s25, 32, %s5025_s7, [#allocation3]  }
0x311b   :  { %5620 = dma.done.wait [#allocation3], 32  }
0x311c   :  { %5621 = vsyncadd [#allocation3], 4294967264 }
0x311d   :  { %5032 = vsyncpa [#allocation3], 1 }

</bundles_post_ra>
